<compile_context>
chip_gen: v5e
topology: v5e:2x2
jax: 0.10.0
libtpu: 0.0.40
codegen_flags: <defaults>
</compile_context>

<pallas_src>
import jax
import jax.numpy as jnp
from jax.experimental import pallas as pl
from jax.experimental.pallas import tpu as pltpu

FEATURES = 32  # nn.Linear(32, 1)


def _score_kernel(x_ref, w_ref, o_ref):
    """One tm-row tile of ScoreLayer.

    x_ref: (n2, tm*32)  tm rows of n1, 32 features each, fused on the lane axis.
    w_ref: (tm*32, tm)  block-diagonal Linear weight (column i holds w at rows
                        [i*32, (i+1)*32)); resident in VMEM across the grid.
    o_ref: (tm, n2)     softmax(scores, axis=-1) output tile.
    """
    x = x_ref[...]
    if x.dtype != jnp.float32:
        x = x.astype(jnp.float32)          # v5e has no bf16 VPU/EUP path
    w = w_ref[...]
    if w.dtype != jnp.float32:
        w = w.astype(jnp.float32)

    # Linear(32 -> 1) for all tm rows at once: one MXU matmul against the
    # block-diagonal weight.  Full-precision f32 accumulation.
    s = jnp.dot(x, w, preferred_element_type=jnp.float32,
                precision=jax.lax.Precision.HIGHEST)           # (n2, tm)

    # Transpose only the small score tile (x is never transposed / re-read).
    s = s.T                                                     # (tm, n2)

    # Row softmax over n2 (== torch.softmax(..., dim=-1)), max-subtracted.
    # Exact division -> rows sum to 1 to f32 accuracy (cost hidden under DMA).
    m = jnp.max(s, axis=-1, keepdims=True)
    e = jnp.exp(s - m)
    o_ref[...] = (e / jnp.sum(e, axis=-1, keepdims=True)).astype(o_ref.dtype)


def _vmem_limit_bytes():
    """Generation-aware scoped-VMEM limit."""
    cap = None
    try:
        cap = getattr(pltpu.get_tpu_info(), "vmem_capacity_bytes", None)
    except Exception:
        cap = None
    if not cap:
        cap = 64 * 1024 * 1024            # conservative default: v7x physical
    if cap >= 100 * 1024 * 1024:          # v5e / v6e: 128 MiB physical
        return 96 * 1024 * 1024
    return 48 * 1024 * 1024               # v7x: 64 MiB physical


def _tile_bytes(tm, n2):
    """Worst-case VMEM for one grid step (everything counted double-buffered)."""
    x_tile = n2 * tm * FEATURES * 4                 # lane-dense fused x tile
    out_tile = tm * max(n2, 128) * 4                # (tm, n2) output tile
    w_tile = (tm * FEATURES) * tm * 4               # block-diagonal weight
    return 2 * (x_tile + out_tile + w_tile)


def _pick_block_m(n1, n2, budget):
    """Rows of n1 per tile; biggest tile that fits the scoped-VMEM budget."""
    if n1 <= 8:
        return n1
    # Whole-n1 tile (single grid step) whenever it fits and the O(tm^2) weight
    # stays cheap.
    if n1 <= 256 and _tile_bytes(n1, n2) <= budget:
        return n1
    candidates = (256, 128, 64, 32, 16, 8)
    # Prefer a tile that divides n1 (avoids the padded ragged path).
    for tm in candidates:
        if tm <= n1 and n1 % tm == 0 and _tile_bytes(tm, n2) <= budget:
            return tm
    for tm in candidates:
        if tm <= n1 and _tile_bytes(tm, n2) <= budget:
            return tm
    return 8


def score_layer_forward(x, w, b, n1, n2, *, block_m=None):
    """softmax(Linear(32->1)(x[:n1*n2]).view(n2, n1).T, dim=-1) -> (n1, n2).

    `b` is accepted for API parity but unused: a scalar bias added to every
    logit cancels exactly under the row softmax.
    """
    del b
    assert x.shape[-1] == FEATURES, "ScoreLayer expects 32 input features"
    assert n1 * n2 <= x.shape[0]
    assert n1 >= 1 and n2 >= 1

    vmem_limit = _vmem_limit_bytes()
    budget = vmem_limit - 12 * 1024 * 1024          # headroom for Mosaic scratch

    tm = block_m if block_m is not None else _pick_block_m(n1, n2, budget)
    tm = int(min(tm, n1))
    if tm != n1 and tm % 8 != 0:
        tm = max(8, (tm // 8) * 8)                  # (8,128) block legality

    n_blocks = pl.cdiv(n1, tm)
    n1_pad = n_blocks * tm

    # Free, contiguous view: x_g[j, i*32 + c] == x[j*n1 + i, c].
    x_g = x[: n1 * n2].reshape(n2, n1 * FEATURES)
    if n1_pad != n1:
        # Rare ragged path: zero-pad so the last tile never feeds uninitialized
        # VMEM into the matmul (zeros give zero logits in rows we slice away).
        x_g = jnp.pad(x_g, ((0, 0), (0, (n1_pad - n1) * FEATURES)))

    # Block-diagonal Linear weight: column i holds w over rows [i*32, (i+1)*32).
    w_col = jnp.asarray(w, jnp.float32).reshape(FEATURES, 1)
    w_blk = jnp.kron(jnp.eye(tm, dtype=jnp.float32), w_col)    # (tm*32, tm)

    out = pl.pallas_call(
        _score_kernel,
        out_shape=jax.ShapeDtypeStruct((n1_pad, n2), jnp.float32),
        grid=(n_blocks,),
        in_specs=[
            # x tile: all of n2 resident, tiled (and double-buffered by the
            # Pallas pipeline) over n1; lane-dense since tm*32 % 128 == 0
            # whenever tm % 4 == 0, else it is the full (single-tile) extent.
            pl.BlockSpec((n2, tm * FEATURES), lambda i: (0, i)),
            # Block-diagonal weight, resident (constant block index -> fetched
            # once by the pipeline).
            pl.BlockSpec((tm * FEATURES, tm), lambda i: (0, 0)),
        ],
        out_specs=pl.BlockSpec((tm, n2), lambda i: (i, 0)),
        compiler_params=pltpu.CompilerParams(
            dimension_semantics=("parallel",),      # row tiles are independent
            vmem_limit_bytes=vmem_limit,
        ),
    )(x_g, w_blk)

    return out[:n1] if n1_pad != n1 else out


def _reference(x, w, b, n1, n2):
    # Pure-JAX mirror of the PyTorch forward (bias included) for verification.
    wv = jnp.asarray(w, jnp.float32).reshape(FEATURES)
    bv = jnp.asarray(b, jnp.float32).reshape(())
    s = jnp.sum(x[: n1 * n2].astype(jnp.float32) * wv, axis=-1) + bv
    s = s.reshape(n2, n1).T
    return jax.nn.softmax(s, axis=-1)


def _check(x, w, b, n1, n2, block_m=None):
    out = jax.block_until_ready(
        score_layer_forward(x, w, b, n1, n2, block_m=block_m))
    ref = _reference(x, w, b, n1, n2)
    assert out.shape == (n1, n2)
    assert jnp.allclose(out, ref, atol=1e-4, rtol=1e-4), (n1, n2, block_m)
    assert jnp.allclose(out.sum(axis=-1), jnp.ones((n1,)), atol=1e-5)


if __name__ == "__main__":
    key = jax.random.PRNGKey(0)
    kx, kw, kb = jax.random.split(key, 3)

    # Largest test needs n1*n2 = 256*128 rows; extra rows exercise x[:n1*n2].
    M = 256 * 128 + 64
    x = jax.random.normal(kx, (M, FEATURES), dtype=jnp.float32)

    bound = 1.0 / (FEATURES ** 0.5)  # PyTorch default Linear init range
    w = jax.random.uniform(kw, (1, FEATURES), minval=-bound, maxval=bound,
                           dtype=jnp.float32)
    b = jax.random.uniform(kb, (1,), minval=-bound, maxval=bound,
                           dtype=jnp.float32)

    # 1) Module-consistent shapes (max_size=32): single whole-n1 tile.
    _check(x, w, b, n1=32, n2=32)

    # 2) Larger synthetic shape: multi-tile pipelined grid over n1 (grid=(2,)).
    _check(x, w, b, n1=256, n2=128, block_m=128)

    # 3) Tiny, unaligned shapes (single tile).
    _check(x, w, b, n1=6, n2=16)

    # 4) Ragged n1 (40 rows, 16-row tiles -> padded to 48, grid=(3,)).
    _check(x, w, b, n1=40, n2=16, block_m=16)

    print("KERNEL_OK")
</pallas_src>

<mosaic_0001>
module attributes {stable_mosaic.version = 11 : i64} {
  func.func @_score_kernel(%arg0: i32, %arg1: memref<32x1024xf32, #tpu.memory_space<vmem>>, %arg2: memref<1024x32xf32, #tpu.memory_space<vmem>>, %arg3: memref<32x32xf32, #tpu.memory_space<vmem>>) attributes {dimension_semantics = [#tpu.dimension_semantics<parallel>], iteration_bounds = array<i64: 1>, scalar_prefetch = 0 : i64, scratch_operands = 0 : i64, tpu.core_type = #tpu.core_type<tc>, window_params = [{transform_indices = @transform_0, window_bounds = array<i64: 32, 1024>}, {pipeline_mode = #tpu.pipeline_mode<synchronous>, transform_indices = @transform_1, window_bounds = array<i64: 1024, 32>}, {transform_indices = @transform_2, window_bounds = array<i64: 32, 32>}]} {
    %c0 = arith.constant 0 : index
    %c0_0 = arith.constant 0 : index
    %0 = vector.load %arg1[%c0, %c0_0] : memref<32x1024xf32, #tpu.memory_space<vmem>>, vector<32x1024xf32>
    %c0_1 = arith.constant 0 : index
    %c0_2 = arith.constant 0 : index
    %1 = vector.load %arg2[%c0_1, %c0_2] : memref<1024x32xf32, #tpu.memory_space<vmem>>, vector<1024x32xf32>
    %cst = arith.constant dense<0.000000e+00> : vector<32x32xf32>
    %2 = tpu.matmul %0, %1, %cst {dimension_numbers = #tpu.dot_dimension_numbers<[1], [0], [0], [1], [0, 0, 1, 1], [], []>, precision = #tpu.contract_precision<fp32>} : vector<32x1024xf32>, vector<1024x32xf32>, vector<32x32xf32> -> vector<32x32xf32>
    %3 = tpu.transpose %2, [1, 0] : vector<32x32xf32> -> vector<32x32xf32>
    %cst_3 = arith.constant dense<0xFF800000> : vector<32xf32>
    %4 = vector.multi_reduction <maximumf>, %3, %cst_3 [1] : vector<32x32xf32> to vector<32xf32>
    %5 = vector.shape_cast %4 : vector<32xf32> to vector<32x1xf32>
    %6 = vector.broadcast %5 : vector<32x1xf32> to vector<32x32xf32>
    %7 = arith.subf %3, %6 : vector<32x32xf32>
    %8 = math.exp %7 : vector<32x32xf32>
    %cst_4 = arith.constant dense<0.000000e+00> : vector<32xf32>
    %9 = vector.multi_reduction <add>, %8, %cst_4 [1] : vector<32x32xf32> to vector<32xf32>
    %10 = vector.shape_cast %9 : vector<32xf32> to vector<32x1xf32>
    %11 = vector.broadcast %10 : vector<32x1xf32> to vector<32x32xf32>
    %12 = arith.divf %8, %11 : vector<32x32xf32>
    %c0_5 = arith.constant 0 : index
    %c0_6 = arith.constant 0 : index
    %13 = vector.load %arg3[%c0_5, %c0_6] : memref<32x32xf32, #tpu.memory_space<vmem>>, vector<32x32xf32>
    tpu.vector_store %arg3[%c0_5, %c0_6], %12 {strides = array<i32>} : memref<32x32xf32, #tpu.memory_space<vmem>>, vector<32x32xf32>,
    return
  }
  func.func @transform_0(%arg0: i32) -> (i32, i32) {
    %c0_i32 = arith.constant 0 : i32
    %c0_i32_0 = arith.constant 0 : i32
    return %c0_i32, %arg0 : i32, i32
  }
  func.func @transform_1(%arg0: i32) -> (i32, i32) {
    %c0_i32 = arith.constant 0 : i32
    %c0_i32_0 = arith.constant 0 : i32
    %c0_i32_1 = arith.constant 0 : i32
    return %c0_i32, %c0_i32_0 : i32, i32
  }
  func.func @transform_2(%arg0: i32) -> (i32, i32) {
    %c0_i32 = arith.constant 0 : i32
    %c0_i32_0 = arith.constant 0 : i32
    return %arg0, %c0_i32 : i32, i32
  }
}

</mosaic_0001>

<bundles_post_ra>
// kernel: tpu_custom_call.1
= control target key start
LH: loop header
LB: loop body
LE: loop exit
PB: predicated region body
PF: predicated region fallthrough
CT: control target
= control target key end

     0   :  { %s7065_s0 = inlined_call_operand.vmem [shape: f32[32,1024], index: 0, kind: input, shape index: {}]   ;;  %s7066_s1 = inlined_call_operand.vmem [shape: f32[1024,32], index: 1, kind: input, shape index: {}]   ;;  %s7067_s2 = inlined_call_operand.hbm [shape: f32[32,32], index: 2, kind: output, shape index: {}]  }
   0x1   :  { %v59_v0 = vld [vmem:[%s7066_s1 + $0x78] sm:$0xff]  ;;  %v58_v1 = vld [vmem:[%s7066_s1 + $0x70] sm:$0xff]  ;;  %v57_v2 = vld [vmem:[%s7066_s1 + $0x68] sm:$0xff] }
   0x2   :  { %v3868_v3 = vand.u32 4294901760, %v59_v0  ;;  %v3870_v4 = vand.u32 4294901760, %v58_v1  ;;  %v3872_v5 = vand.u32 4294901760, %v57_v2  ;;  %v56_v6 = vld [vmem:[%s7066_s1 + $0x60] sm:$0xff]  ;;  %v55_v7 = vld [vmem:[%s7066_s1 + $0x58] sm:$0xff]  ;;  %v54_v8 = vld [vmem:[%s7066_s1 + $0x50] sm:$0xff] }
   0x3   :  { %v3883_v9 = vand.u32 4294901760, %v56_v6  ;;  %v3885_v10 = vand.u32 4294901760, %v55_v7  ;;  %v3887_v11 = vand.u32 4294901760, %v54_v8  ;;  %v53_v12 = vld [vmem:[%s7066_s1 + $0x48] sm:$0xff]  ;;  %v52_v13 = vld [vmem:[%s7066_s1 + $0x40] sm:$0xff]  ;;  %v51_v18 = vld [vmem:[%s7066_s1 + $0x38] sm:$0xff] }
   0x4   :  { %173 = vmatpush.msra.mxu0 %v3868_v3  ;;  %v3897_v14 = vsub.f32 %v59_v0, %v3868_v3  ;;  %v3900_v15 = vsub.f32 %v58_v1, %v3870_v4  ;;  %420 = vmatpush.msra.mxu3 %v3868_v3  ;;  %v3904_v16 = vsub.f32 %v57_v2, %v3872_v5  ;;  %v3906_v17 = vand.u32 4294901760, %v53_v12  ;;  %v50_v29 = vld [vmem:[%s7066_s1 + $0x30] sm:$0xff] }
   0x5   :  { %v3912_v19 = vsub.f32 %v56_v6, %v3883_v9  ;;  %v3915_v20 = vsub.f32 %v55_v7, %v3885_v10  ;;  %v3917_v21 = vand.u32 4294901760, %v52_v13  ;;  %v3920_v22 = vsub.f32 %v54_v8, %v3887_v11 }
   0x6   :  { %175 = vmatpush.msra.mxu0 %v3870_v4  ;;  %352 = vmatpush.msra.mxu2 %v3897_v14  ;;  %v239_v23 = vand.u32 4294901760, %v3897_v14  ;;  %v7082_v24 = vand.u32 4294901760, %v3900_v15  ;;  %v7080_v25 = vand.u32 4294901760, %v3904_v16  ;;  %v3929_v27 = vand.u32 4294901760, %v51_v18 }
   0x7   :  { %422 = vmatpush.msra.mxu3 %v3870_v4  ;;  %v7079_v26 = vand.u32 4294901760, %v3912_v19  ;;  %v3932_v28 = vsub.f32 %v53_v12, %v3906_v17  ;;  %v7077_v33 = vand.u32 4294901760, %v3915_v20 }
   0x8   :  { %177 = vmatpush.msra.mxu0 %v3872_v5  ;;  %355 = vmatpush.msra.mxu2 %v3900_v15  ;;  %v240_v30 = vsub.f32 %v3897_v14, %v239_v23  ;;  %v246_v31 = vsub.f32 %v3900_v15, %v7082_v24  ;;  %v252_v32 = vsub.f32 %v3904_v16, %v7080_v25 }
   0x9   :  { %7 = vsyncpa [#allocation3], 0  ;;  %424 = vmatpush.msra.mxu3 %v3872_v5  ;;  %v7075_v34 = vand.u32 4294901760, %v3920_v22  ;;  %v3952_v35 = vsub.f32 %v52_v13, %v3917_v21  ;;  %v49_v36 = vld [vmem:[%s7066_s1 + $0x28] sm:$0xff]  ;;  %v258_v39 = vsub.f32 %v3912_v19, %v7079_v26  ;;  %v3962_v40 = vand.u32 4294901760, %v50_v29  ;;  %v48_v43 = vld [vmem:[%s7066_s1 + $0x20] sm:$0xff] }
   0xa   :  { %179 = vmatpush.msra.mxu0 %v3883_v9  ;;  %v241_v37 = vand.u32 4294901760, %v240_v30  ;;  %358 = vmatpush.msra.mxu2 %v3904_v16  ;;  %v247_v38 = vand.u32 4294901760, %v246_v31  ;;  %v7074_v41 = vand.u32 4294901760, %v3932_v28  ;;  %v3967_v42 = vsub.f32 %v51_v18, %v3929_v27  ;;  %v47_v49 = vld [vmem:[%s7066_s1 + $0x18] sm:$0xff]  ;;  %v46_v55 = vld [vmem:[%s7066_s1 + $0x10] sm:$0xff]  ;;  %v12_v56 = vld [vmem:[%s7065_s0] sm:$0xff] }
   0xb   :  { %426 = vmatpush.msra.mxu3 %v3883_v9  ;;  %v253_v44 = vand.u32 4294901760, %v252_v32  ;;  %v264_v45 = vsub.f32 %v3915_v20, %v7077_v33  ;;  %v3976_v46 = vand.u32 4294901760, %v49_v36  ;;  %v270_v47 = vsub.f32 %v3920_v22, %v7075_v34  ;;  %v45_v62 = vld [vmem:[%s7066_s1 + $0x8] sm:$0xff]  ;;  %v75_v6 = vld [vmem:[%s7066_s1 + $0xf8] sm:$0xff]  ;;  %v44_v12 = vld [vmem:[%s7066_s1] sm:$0xff]  ;;  %s3783_s23 = sshll.u32 %s7067_s2, 4  ;;  %s3784_s23 = int_to_ptr.hbm [resolvable:$true] %s3783_s23 }
   0xc   :  { %181 = vmatpush.msra.mxu0 %v3885_v10  ;;  %242 = vmatpush.msra.mxu1 %v241_v37  ;;  %v7072_v48 = vand.u32 4294901760, %v3952_v35  ;;  %v259_v50 = vand.u32 4294901760, %v258_v39  ;;  %v3988_v51 = vand.u32 4294901760, %v48_v43  ;;  %v3991_v52 = vsub.f32 %v50_v29, %v3962_v40  ;;  %v69_v24 = vld [vmem:[%s7066_s1 + $0xc8] sm:$0xff]  ;;  %v68_v14 = vld [vmem:[%s7066_s1 + $0xc0] sm:$0xff]  ;;  %s3842_s24 = smov 128  }
   0xd   :  { %361 = vmatpush.msra.mxu2 %v3912_v19  ;;  %428 = vmatpush.msra.mxu3 %v3885_v10  ;;  %v276_v53 = vsub.f32 %v3932_v28, %v7074_v41  ;;  %v7071_v54 = vand.u32 4294901760, %v3967_v42  ;;  %v265_v57 = vand.u32 4294901760, %v264_v45  ;;  %v4006_v58 = vand.u32 4294901760, %v47_v49  ;;  %s3843_s25 = smov 8  }
   0xe   :  { %183 = vmatpush.msra.mxu0 %v3887_v11  ;;  %248 = vmatpush.msra.mxu1 %v247_v38  ;;  %v4009_v59 = vsub.f32 %v49_v36, %v3976_v46  ;;  %v271_v60 = vand.u32 4294901760, %v270_v47  ;;  %v282_v61 = vsub.f32 %v3952_v35, %v7072_v48  ;;  %v4020_v63 = vand.u32 4294901760, %v46_v55  ;;  %v20_v36 = vld [vmem:[%s7065_s0 + $0x40] sm:$0xff] }
   0xf   :  { %364 = vmatpush.msra.mxu2 %v3915_v20  ;;  %430 = vmatpush.msra.mxu3 %v3887_v11  ;;  %v7070_v0 = vand.u32 4294901760, %v3991_v52  ;;  %v4024_v1 = vsub.f32 %v48_v43, %v3988_v51  ;;  %v4026_v2 = vand.u32 4294901760, %v12_v56  ;;  %v277_v7 = vand.u32 4294901760, %v276_v53 }
  0x10   :  { %185 = vmatpush.msra.mxu0 %v3906_v17  ;;  %254 = vmatpush.msra.mxu1 %v253_v44  ;;  %v288_v8 = vsub.f32 %v3967_v42, %v7071_v54  ;;  %v4040_v13 = vand.u32 4294901760, %v45_v62  ;;  %v7068_v18 = vand.u32 4294901760, %v4009_v59  ;;  %v4044_v29 = vsub.f32 %v47_v49, %v4006_v58  ;;  %v74_v44 = vld [vmem:[%s7066_s1 + $0xf0] sm:$0xff] }
  0x11   :  { %367 = vmatpush.msra.mxu2 %v3920_v22  ;;  %432 = vmatpush.msra.mxu3 %v3906_v17  ;;  %v4047_v30 = vsub.f32 %v12_v56, %v4026_v2  ;;  %v283_v31 = vand.u32 4294901760, %v282_v61  ;;  %v4051_v32 = vand.u32 4294901760, %v75_v6  ;;  %v294_v37 = vsub.f32 %v3991_v52, %v7070_v0  ;;  %v73_v56 = vld [vmem:[%s7066_s1 + $0xe8] sm:$0xff] }
  0x12   :  { %187 = vmatpush.msra.mxu0 %v3917_v21  ;;  %260 = vmatpush.msra.mxu1 %v259_v50  ;;  %v4060_v38 = vand.u32 4294901760, %v44_v12  ;;  %v7069_v39 = vand.u32 4294901760, %v4024_v1  ;;  %v4064_v43 = vsub.f32 %v46_v55, %v4020_v63  ;;  %v289_v45 = vand.u32 4294901760, %v288_v8 }
  0x13   :  { %370 = vmatpush.msra.mxu2 %v3932_v28  ;;  %434 = vmatpush.msra.mxu3 %v3917_v21  ;;  %v7081_v47 = vand.u32 4294901760, %v4047_v30  ;;  %v300_v49 = vsub.f32 %v4009_v59, %v7068_v18  ;;  %v7073_v50 = vand.u32 4294901760, %v4044_v29  ;;  %v4078_v53 = vsub.f32 %v45_v62, %v4040_v13 }
  0x14   :  { %189 = vmatpush.msra.mxu0 %v3929_v27  ;;  %266 = vmatpush.msra.mxu1 %v265_v57  ;;  %7204 = vst [vmem:[#allocation5_spill] sm:$0xff] %v4060_v38  ;;  %v4080_v55 = vand.u32 4294901760, %v20_v36  ;;  %v4087_v57 = vand.u32 4294901760, %v74_v44  ;;  %v295_v61 = vand.u32 4294901760, %v294_v37  ;;  %v306_v62 = vsub.f32 %v4024_v1, %v7069_v39 }
  0x15   :  { %373 = vmatpush.msra.mxu2 %v3952_v35  ;;  %436 = vmatpush.msra.mxu3 %v3929_v27  ;;  %v4098_v8 = vsub.f32 %v44_v12, %v4060_v38  ;;  %v4105_v18 = vand.u32 4294901760, %v73_v56  ;;  %v301_v37 = vand.u32 4294901760, %v300_v49  ;;  %v312_v12 = vsub.f32 %v4044_v29, %v7073_v50 }
  0x16   :  { %191 = vmatpush.msra.mxu0 %v3962_v40  ;;  %272 = vmatpush.msra.mxu1 %v271_v60  ;;  %v4090_v60 = vsub.f32 %v75_v6, %v4051_v32  ;;  %v207_v6 = vsub.f32 %v4047_v30, %v7081_v47  ;;  %v7078_v39 = vand.u32 4294901760, %v4078_v53  ;;  %v4116_v0 = vsub.f32 %v20_v36, %v4080_v55 }
  0x17   :  { %376 = vmatpush.msra.mxu2 %v3967_v42  ;;  %438 = vmatpush.msra.mxu3 %v3962_v40  ;;  %7205 = vst [vmem:[#allocation6_spill] sm:$0xff] %v4105_v18  ;;  %v4122_v48 = vsub.f32 %v74_v44, %v4087_v57  ;;  %v307_v49 = vand.u32 4294901760, %v306_v62  ;;  %v7084_v50 = vand.u32 4294901760, %v4098_v8  ;;  %v4137_v34 = vsub.f32 %v73_v56, %v4105_v18  ;;  %v70_v56 = vld [vmem:[%s7066_s1 + $0xd0] sm:$0xff] }
  0x18   :  { %193 = vmatpush.msra.mxu0 %v3976_v46  ;;  %278 = vmatpush.msra.mxu1 %v277_v7  ;;  %v7076_v7 = vand.u32 4294901760, %v4064_v43  ;;  %v7083_v54 = vand.u32 4294901760, %v4090_v60  ;;  %v208_v44 = vand.u32 4294901760, %v207_v6  ;;  %v313_v62 = vand.u32 4294901760, %v312_v12 }
  0x19   :  { %379 = vmatpush.msra.mxu2 %v3991_v52  ;;  %440 = vmatpush.msra.mxu3 %v3976_v46  ;;  %v7085_v33 = vand.u32 4294901760, %v4116_v0  ;;  %v7086_v12 = vand.u32 4294901760, %v4122_v48  ;;  %v330_v26 = vsub.f32 %v4098_v8, %v7084_v50  ;;  %vm3676_vm0 = vcmask 261120  }
  0x1a   :  { %195 = vmatpush.msra.mxu0 %v3988_v51  ;;  %284 = vmatpush.msra.mxu1 %v283_v31  ;;  %v72_v31 = vld [vmem:[%s7066_s1 + $0xe0] sm:$0xff]  ;;  %v318_v36 = vsub.f32 %v4064_v43, %v7076_v7  ;;  %v324_v7 = vsub.f32 %v4078_v53, %v7078_v39 }
  0x1b   :  { %382 = vmatpush.msra.mxu2 %v4009_v59  ;;  %442 = vmatpush.msra.mxu3 %v3988_v51  ;;  %v4132_v41 = vand.u32 4294901760, %v72_v31 }
  0x1c   :  { %197 = vmatpush.msra.mxu0 %v4006_v58  ;;  %290 = vmatpush.msra.mxu1 %v289_v45  ;;  %v71_v45 = vld [vmem:[%s7066_s1 + $0xd8] sm:$0xff]  ;;  %v319_v39 = vand.u32 4294901760, %v318_v36  ;;  %v325_v36 = vand.u32 4294901760, %v324_v7  ;;  %v331_v7 = vand.u32 4294901760, %v330_v26 }
  0x1d   :  { %385 = vmatpush.msra.mxu2 %v4024_v1  ;;  %444 = vmatpush.msra.mxu3 %v4006_v58  ;;  %v4147_v6 = vand.u32 4294901760, %v71_v45  ;;  %v4163_v25 = vsub.f32 %v72_v31, %v4132_v41  ;;  %v215_v31 = vsub.f32 %v4116_v0, %v7085_v33 }
  0x1e   :  { %199 = vmatpush.msra.mxu0 %v4020_v63  ;;  %296 = vmatpush.msra.mxu1 %v295_v61  ;;  %v28_v61 = vld [vmem:[%s7065_s0 + $0x80] sm:$0xff] }
  0x1f   :  { %388 = vmatpush.msra.mxu2 %v4044_v29  ;;  %446 = vmatpush.msra.mxu3 %v4020_v63  ;;  %v4165_v47 = vand.u32 4294901760, %v28_v61  ;;  %v4180_v50 = vsub.f32 %v71_v45, %v4147_v6  ;;  %v7088_v45 = vand.u32 4294901760, %v4163_v25  ;;  %v216_v26 = vand.u32 4294901760, %v215_v31 }
  0x20   :  { %201 = vmatpush.msra.mxu0 %v4040_v13  ;;  %302 = vmatpush.msra.mxu1 %v301_v37  ;;  %v674_v37 = vsub.f32 %v4090_v60, %v7083_v54  ;;  %v4187_v54 = vand.u32 4294901760, %v69_v24 }
  0x21   :  { %391 = vmatpush.msra.mxu2 %v4064_v43  ;;  %448 = vmatpush.msra.mxu3 %v4040_v13  ;;  %v4196_v33 = vsub.f32 %v28_v61, %v4165_v47  ;;  %v7089_v61 = vand.u32 4294901760, %v4180_v50 }
  0x22   :  { %203 = vmatpush.msra.mxu0 %v4060_v38  ;;  %308 = vmatpush.msra.mxu1 %v307_v49  ;;  %v4172_v49 = vand.u32 4294901760, %v70_v56 }
  0x23   :  { %209 = vmatmul.f32.vlgmr.msra.gmra.mxu0 %v208_v44  ;;  %394 = vmatpush.msra.mxu2 %v4078_v53  ;;  %v675_v44 = vand.u32 4294901760, %v674_v37  ;;  %v7207_v37 = vand.u32 4294901760, %v4047_v30 }
  0x24   :  { %314 = vmatpush.msra.mxu1 %v313_v62  ;;  %479 = vmatpush.msrb.mxu0 %v239_v23  ;;  %v680_v62 = vsub.f32 %v4122_v48, %v7086_v12  ;;  %v7206_v23 = vand.u32 4294901760, %v3900_v15  ;;  %v7208_v12 = vand.u32 4294901760, %v4137_v34  ;;  %v67_v15 = vld [vmem:[%s7066_s1 + $0xb8] sm:$0xff] }
  0x25   :  { %397 = vmatpush.msra.mxu2 %v4098_v8  ;;  %450 = vmatpush.msra.mxu3 %v4060_v38 }
  0x26   :  { %320 = vmatpush.msra.mxu1 %v319_v39  ;;  %483 = vmatpush.msrb.mxu0 %v7206_v23  ;;  %v686_v38 = vsub.f32 %v4137_v34, %v7208_v12  ;;  %v4205_v39 = vsub.f32 %v70_v56, %v4172_v49  ;;  %v4212_v23 = vand.u32 4294901760, %v68_v14  ;;  %v681_v12 = vand.u32 4294901760, %v680_v62 }
  0x27   :  { %400 = vmatmul.f32.vlgmr.msra.gmra.mxu2 %v4047_v30  ;;  %454 = vmatmul.f32.vlgmr.msra.gmra.mxu3 %v7207_v37  ;;  %v7209_v30 = vand.u32 4294901760, %v3904_v16  ;;  %v4217_v56 = vsub.f32 %v69_v24, %v4187_v54  ;;  %v36_v37 = vld [vmem:[%s7065_s0 + $0xc0] sm:$0xff]  ;;  %v4227_v16 = vand.u32 4294901760, %v67_v15  ;;  %v66_v24 = vld [vmem:[%s7066_s1 + $0xb0] sm:$0xff] }
  0x28   :  { %607 = vmatpush.msrb.mxu2 %v4051_v32  ;;  %326 = vmatpush.msra.mxu1 %v325_v36  ;;  %v692_v36 = vsub.f32 %v4163_v25, %v7088_v45  ;;  %v687_v62 = vand.u32 4294901760, %v686_v38  ;;  %v4241_v45 = vsub.f32 %v68_v14, %v4212_v23  ;;  %v4243_v31 = vand.u32 4294901760, %v36_v37 }
  0x29   :  { %487 = vmatpush.msrb.mxu0 %v7209_v30  ;;  %676 = vmatpush.msrb.mxu3 %v675_v44  ;;  %v7210_v44 = vand.u32 4294901760, %v3912_v19  ;;  %v698_v30 = vsub.f32 %v4180_v50, %v7089_v61  ;;  %v65_v19 = vld [vmem:[%s7066_s1 + $0xa8] sm:$0xff] }
  0x2a   :  { %609 = vmatpush.msrb.mxu2 %v4087_v57  ;;  %332 = vmatpush.msra.mxu1 %v331_v7  ;;  %v693_v14 = vand.u32 4294901760, %v692_v36  ;;  %v4259_v7 = vsub.f32 %v67_v15, %v4227_v16  ;;  %v7217_v36 = vand.u32 4294901760, %v4116_v0 }
  0x2b   :  { %491 = vmatpush.msrb.mxu0 %v7210_v44  ;;  %334 = vmatmul.f32.vlgmr.msra.gmra.mxu1 %v4026_v2  ;;  %v7212_v44 = vand.u32 4294901760, %v4196_v33  ;;  %v699_v15 = vand.u32 4294901760, %v698_v30  ;;  %v7216_v30 = vand.u32 4294901760, %v3932_v28  ;;  %v7218_v28 = vand.u32 4294901760, %v4241_v45 }
  0x2c   :  { %217 = vmatmul.f32.gmra.mxu0 %v216_v26  ;;  %558 = vmatpush.msrb.mxu1 %v3868_v3  ;;  %v4250_v26 = vand.u32 4294901760, %v66_v24  ;;  %v7211_v3 = vand.u32 4294901760, %v3915_v20  ;;  %v7214_v20 = vand.u32 4294901760, %v3920_v22  ;;  %v63_v22 = vld [vmem:[%s7066_s1 + $0x98] sm:$0xff] }
  0x2d   :  { %611 = vmatpush.msrb.mxu2 %v4105_v18  ;;  %682 = vmatpush.msrb.mxu3 %v681_v12  ;;  %v223_v61 = vsub.f32 %v4196_v33, %v7212_v44  ;;  %v7213_v12 = vand.u32 4294901760, %v4205_v39  ;;  %v4265_v18 = vand.u32 4294901760, %v65_v19 }
  0x2e   :  { %495 = vmatpush.msrb.mxu0 %v7211_v3  ;;  %560 = vmatpush.msrb.mxu1 %v3870_v4  ;;  %v64_v4 = vld [vmem:[%s7066_s1 + $0xa0] sm:$0xff]  ;;  %v7215_v3 = vand.u32 4294901760, %v4217_v56 }
  0x2f   :  { %613 = vmatpush.msrb.mxu2 %v4132_v41  ;;  %688 = vmatpush.msrb.mxu3 %v687_v62  ;;  %v704_v38 = vsub.f32 %v4205_v39, %v7213_v12  ;;  %v4275_v62 = vsub.f32 %v36_v37, %v4243_v31  ;;  %v4283_v12 = vsub.f32 %v66_v24, %v4250_v26  ;;  %v224_v37 = vand.u32 4294901760, %v223_v61 }
  0x30   :  { %499 = vmatpush.msrb.mxu0 %v7214_v20  ;;  %405 = vmatmul.f32.gmra.mxu2 %v4116_v0  ;;  %v710_v44 = vsub.f32 %v4217_v56, %v7215_v3  ;;  %v4291_v20 = vand.u32 4294901760, %v64_v4  ;;  %v4297_v3 = vsub.f32 %v65_v19, %v4265_v18  ;;  %v716_v61 = vsub.f32 %v4241_v45, %v7218_v28  ;;  %v62_v0 = vld [vmem:[%s7066_s1 + $0x90] sm:$0xff] }
  0x31   :  { %562 = vmatpush.msrb.mxu1 %v3872_v5  ;;  %615 = vmatpush.msrb.mxu2 %v4147_v6  ;;  %v7092_v5 = vand.u32 4294901760, %v4259_v7  ;;  %v705_v24 = vand.u32 4294901760, %v704_v38  ;;  %v7093_v38 = vand.u32 4294901760, %v4283_v12  ;;  %v4325_v28 = vand.u32 4294901760, %v62_v0 }
  0x32   :  { %694 = vmatpush.msrb.mxu3 %v693_v14  ;;  %503 = vmatpush.msrb.mxu0 %v7216_v30  ;;  %v7094_v14 = vand.u32 4294901760, %v4275_v62  ;;  %v4304_v30 = vand.u32 4294901760, %v63_v22  ;;  %v711_v19 = vand.u32 4294901760, %v710_v44  ;;  %v7095_v44 = vand.u32 4294901760, %v4297_v3 }
  0x33   :  { %460 = vmatmul.f32.gmra.mxu3 %v7217_v36  ;;  %564 = vmatpush.msrb.mxu1 %v3883_v9  ;;  %v7219_v9 = vand.u32 4294901760, %v3952_v35  ;;  %v4318_v36 = vsub.f32 %v64_v4, %v4291_v20  ;;  %v61_v35 = vld [vmem:[%s7066_s1 + $0x88] sm:$0xff] }
  0x34   :  { %617 = vmatpush.msrb.mxu2 %v4172_v49  ;;  %700 = vmatpush.msrb.mxu3 %v699_v15  ;;  %v722_v15 = vsub.f32 %v4259_v7, %v7092_v5  ;;  %v231_v4 = vsub.f32 %v4275_v62, %v7094_v14  ;;  %v13_v5 = vld [vmem:[%s7065_s0 + $0x8] sm:$0xff] }
  0x35   :  { %507 = vmatpush.msrb.mxu0 %v7219_v9  ;;  %338 = vmatmul.f32.gmra.mxu1 %v4080_v55  ;;  %v4334_v9 = vsub.f32 %v63_v22, %v4304_v30  ;;  %v7221_v22 = vand.u32 4294901760, %v3991_v52  ;;  %v4362_v52 = vand.u32 4294901760, %v13_v5 }
  0x36   :  { %225 = vmatmul.f32.gmra.mxu0 %v224_v37  ;;  %566 = vmatpush.msrb.mxu1 %v3885_v10  ;;  %v7220_v10 = vand.u32 4294901760, %v3967_v42  ;;  %v717_v37 = vand.u32 4294901760, %v716_v61  ;;  %v4346_v42 = vand.u32 4294901760, %v61_v35  ;;  %v723_v61 = vand.u32 4294901760, %v722_v15 }
  0x37   :  { %619 = vmatpush.msrb.mxu2 %v4187_v54  ;;  %706 = vmatpush.msrb.mxu3 %v705_v24  ;;  %v60_v24 = vld [vmem:[%s7066_s1 + $0x80] sm:$0xff]  ;;  %v7222_v15 = vand.u32 4294901760, %v4009_v59 }
  0x38   :  { %511 = vmatpush.msrb.mxu0 %v7220_v10  ;;  %568 = vmatpush.msrb.mxu1 %v3887_v11  ;;  %v728_v11 = vsub.f32 %v4283_v12, %v7093_v38  ;;  %v4358_v38 = vsub.f32 %v62_v0, %v4325_v28  ;;  %v4360_v14 = vand.u32 4294901760, %v60_v24  ;;  %v7223_v10 = vand.u32 4294901760, %v4196_v33 }
  0x39   :  { %621 = vmatpush.msrb.mxu2 %v4212_v23  ;;  %712 = vmatpush.msrb.mxu3 %v711_v19  ;;  %v734_v19 = vsub.f32 %v4297_v3, %v7095_v44  ;;  %v4371_v0 = vsub.f32 %v61_v35, %v4346_v42 }
  0x3a   :  { %515 = vmatpush.msrb.mxu0 %v7221_v22  ;;  %410 = vmatmul.f32.gmra.mxu2 %v4196_v33  ;;  %v232_v22 = vand.u32 4294901760, %v231_v4  ;;  %v729_v44 = vand.u32 4294901760, %v728_v11  ;;  %v7225_v4 = vand.u32 4294901760, %v4024_v1  ;;  %v4385_v35 = vsub.f32 %v60_v24, %v4360_v14 }
  0x3b   :  { %570 = vmatpush.msrb.mxu1 %v3906_v17  ;;  %623 = vmatpush.msrb.mxu2 %v4227_v16  ;;  %v745_v17 = vand.u32 4294901760, %v4334_v9  ;;  %v735_v33 = vand.u32 4294901760, %v734_v19  ;;  %v757_v1 = vand.u32 4294901760, %v4371_v0 }
  0x3c   :  { %718 = vmatpush.msrb.mxu3 %v717_v37  ;;  %519 = vmatpush.msrb.mxu0 %v7222_v15  ;;  %v7224_v37 = vand.u32 4294901760, %v4318_v36  ;;  %v763_v19 = vand.u32 4294901760, %v4385_v35  ;;  %v7227_v15 = vand.u32 4294901760, %v4064_v43  ;;  %v7229_v43 = vand.u32 4294901760, %v4275_v62 }
  0x3d   :  { %466 = vmatmul.f32.gmra.mxu3 %v7223_v10  ;;  %572 = vmatpush.msrb.mxu1 %v3917_v21  ;;  %v751_v10 = vand.u32 4294901760, %v4358_v38  ;;  %v4382_v21 = vsub.f32 %v13_v5, %v4362_v52  ;;  %v746_v11 = vsub.f32 %v4334_v9, %v745_v17  ;;  %v21_v5 = vld [vmem:[%s7065_s0 + $0x48] sm:$0xff] }
  0x3e   :  { %625 = vmatpush.msrb.mxu2 %v4250_v26  ;;  %724 = vmatpush.msrb.mxu3 %v723_v61  ;;  %v740_v59 = vsub.f32 %v4318_v36, %v7224_v37  ;;  %v7226_v61 = vand.u32 4294901760, %v4044_v29  ;;  %v7228_v37 = vand.u32 4294901760, %v4078_v53 }
  0x3f   :  { %523 = vmatpush.msrb.mxu0 %v7225_v4  ;;  %342 = vmatmul.f32.gmra.mxu1 %v4165_v47  ;;  %v747_v29 = vand.u32 4294901760, %v746_v11  ;;  %v764_v4 = vsub.f32 %v4385_v35, %v763_v19 }
  0x40   :  { %233 = vmatmul.f32.gmra.mxu0 %v232_v22  ;;  %574 = vmatpush.msrb.mxu1 %v3929_v27  ;;  %v741_v24 = vand.u32 4294901760, %v740_v59  ;;  %v752_v27 = vsub.f32 %v4358_v38, %v751_v10  ;;  %v4408_v22 = vand.u32 4294901760, %v21_v5 }
  0x41   :  { %627 = vmatpush.msrb.mxu2 %v4265_v18  ;;  %730 = vmatpush.msrb.mxu3 %v729_v44  ;;  %v640_v44 = vand.u32 4294901760, %v4382_v21  ;;  %v765_v11 = vand.u32 4294901760, %v764_v4 }
  0x42   :  { %527 = vmatpush.msrb.mxu0 %v7226_v61  ;;  %576 = vmatpush.msrb.mxu1 %v3962_v40  ;;  %v758_v40 = vsub.f32 %v4371_v0, %v757_v1  ;;  %v753_v59 = vand.u32 4294901760, %v752_v27  ;;  %v4428_v53 = vsub.f32 %v21_v5, %v4408_v22  ;;  %v29_v5 = vld [vmem:[%s7065_s0 + $0x88] sm:$0xff]  ;;  %v7231_v61 = vand.u32 4294901760, %v4090_v60 }
  0x43   :  { %629 = vmatpush.msrb.mxu2 %v4291_v20  ;;  %736 = vmatpush.msrb.mxu3 %v735_v33  ;;  %v7233_v27 = vand.u32 4294901760, %v4122_v48 }
  0x44   :  { %531 = vmatpush.msrb.mxu0 %v7227_v15  ;;  %415 = vmatmul.f32.gmra.mxu2 %v4275_v62  ;;  %v7230_v62 = vand.u32 4294901760, %v4098_v8  ;;  %v648_v8 = vand.u32 4294901760, %v4428_v53  ;;  %v7234_v15 = vand.u32 4294901760, %v4137_v34 }
  0x45   :  { %578 = vmatpush.msrb.mxu1 %v3976_v46  ;;  %631 = vmatpush.msrb.mxu2 %v4304_v30  ;;  %v641_v46 = vsub.f32 %v4382_v21, %v640_v44 }
  0x46   :  { %742 = vmatpush.msrb.mxu3 %v741_v24  ;;  %535 = vmatpush.msrb.mxu0 %v7228_v37  ;;  %v7232_v24 = vld [vmem:[#allocation5_spill] sm:$0xff] }
  0x47   :  { %472 = vmatmul.f32.gmra.mxu3 %v7229_v43  ;;  %580 = vmatpush.msrb.mxu1 %v3988_v51  ;;  %v759_v51 = vand.u32 4294901760, %v758_v40  ;;  %v642_v33 = vand.u32 4294901760, %v641_v46  ;;  %v7237_v40 = vand.u32 4294901760, %v4180_v50  ;;  %v7239_v43 = vand.u32 4294901760, %v4217_v56 }
  0x48   :  { %633 = vmatpush.msrb.mxu2 %v4325_v28  ;;  %748 = vmatpush.msrb.mxu3 %v747_v29  ;;  %v7235_v29 = vand.u32 4294901760, %v4163_v25 }
  0x49   :  { %539 = vmatpush.msrb.mxu0 %v7230_v62  ;;  %346 = vmatmul.f32.gmra.mxu1 %v4243_v31 }
  0x4a   :  { %541 = vmatmul.f32.vlgmr.msrb.gmra.mxu0 %v4026_v2  ;;  %582 = vmatpush.msrb.mxu1 %v4006_v58  ;;  %v4445_v58 = vand.u32 4294901760, %v29_v5 }
  0x4b   :  { %635 = vmatpush.msrb.mxu2 %v4346_v42  ;;  %754 = vmatpush.msrb.mxu3 %v753_v59 }
  0x4c   :  { %786 = vmatpush.msra.mxu0 %v4090_v60  ;;  %584 = vmatpush.msrb.mxu1 %v4020_v63  ;;  %v649_v63 = vsub.f32 %v4428_v53, %v648_v8 }
  0x4d   :  { %637 = vmatpush.msrb.mxu2 %v4360_v14  ;;  %760 = vmatpush.msrb.mxu3 %v759_v51 }
  0x4e   :  { %789 = vmatpush.msra.mxu0 %v4122_v48  ;;  %586 = vmatpush.msrb.mxu1 %v4040_v13  ;;  %v4459_v13 = vsub.f32 %v29_v5, %v4445_v58  ;;  %v650_v60 = vand.u32 4294901760, %v649_v63  ;;  %v37_v48 = vld [vmem:[%s7065_s0 + $0xc8] sm:$0xff] }
  0x4f   :  { %643 = vmatmul.f32.vlgmr.msrb.gmra.mxu2 %v642_v33  ;;  %766 = vmatpush.msrb.mxu3 %v765_v11 }
  0x50   :  { %913 = vmatpush.msra.mxu2 %v7231_v61  ;;  %792 = vmatpush.msra.mxu0 %v4137_v34  ;;  %v4478_v34 = vand.u32 4294901760, %v37_v48  ;;  %v83_v61 = vld [vmem:[%s7066_s1 + $0x138] sm:$0xff] }
  0x51   :  { %588 = vmatpush.msrb.mxu1 %v7232_v24  ;;  %768 = vmatmul.f32.vlgmr.msrb.gmra.mxu3 %v4362_v52 }
  0x52   :  { %917 = vmatpush.msra.mxu2 %v7233_v27  ;;  %992 = vmatpush.msra.mxu3 %v4051_v32  ;;  %v82_v27 = vld [vmem:[%s7066_s1 + $0x130] sm:$0xff] }
  0x53   :  { %795 = vmatpush.msra.mxu0 %v4163_v25  ;;  %590 = vmatmul.f32.vlgmr.msrb.gmra.mxu1 %v4026_v2  ;;  %v656_v2 = vand.u32 4294901760, %v4459_v13 }
  0x54   :  { %545 = vmatmul.f32.gmra.mxu0 %v4080_v55  ;;  %854 = vmatpush.msra.mxu1 %v4051_v32  ;;  %v7236_v32 = vld [vmem:[#allocation6_spill] sm:$0xff] }
  0x55   :  { %921 = vmatpush.msra.mxu2 %v7234_v15  ;;  %994 = vmatpush.msra.mxu3 %v4087_v57  ;;  %v657_v25 = vsub.f32 %v4459_v13, %v656_v2 }
  0x56   :  { %798 = vmatpush.msra.mxu0 %v4180_v50  ;;  %856 = vmatpush.msra.mxu1 %v4087_v57  ;;  %v7238_v57 = vand.u32 4294901760, %v4205_v39  ;;  %v4494_v50 = vsub.f32 %v37_v48, %v4478_v34 }
  0x57   :  { %925 = vmatpush.msra.mxu2 %v7235_v29  ;;  %996 = vmatpush.msra.mxu3 %v7236_v32  ;;  %v658_v37 = vand.u32 4294901760, %v657_v25  ;;  %v4668_v29 = vand.u32 4294901760, %v82_v27 }
  0x58   :  { %801 = vmatpush.msra.mxu0 %v4205_v39  ;;  %651 = vmatmul.f32.gmra.mxu2 %v650_v60  ;;  %v7240_v39 = vand.u32 4294901760, %v4241_v45  ;;  %v4656_v60 = vand.u32 4294901760, %v83_v61 }
  0x59   :  { %858 = vmatpush.msra.mxu1 %v7236_v32  ;;  %929 = vmatpush.msra.mxu2 %v7237_v40  ;;  %v81_v32 = vld [vmem:[%s7066_s1 + $0x128] sm:$0xff] }
  0x5a   :  { %998 = vmatpush.msra.mxu3 %v4132_v41  ;;  %804 = vmatpush.msra.mxu0 %v4217_v56 }
  0x5b   :  { %772 = vmatmul.f32.gmra.mxu3 %v4408_v22  ;;  %860 = vmatpush.msra.mxu1 %v4132_v41  ;;  %v664_v41 = vand.u32 4294901760, %v4494_v50 }
  0x5c   :  { %933 = vmatpush.msra.mxu2 %v7238_v57  ;;  %1000 = vmatpush.msra.mxu3 %v4147_v6 }
  0x5d   :  { %807 = vmatpush.msra.mxu0 %v4241_v45  ;;  %594 = vmatmul.f32.gmra.mxu1 %v4080_v55  ;;  %v7241_v55 = vand.u32 4294901760, %v4259_v7  ;;  %v90_v45 = vld [vmem:[%s7066_s1 + $0x170] sm:$0xff] }
  0x5e   :  { %549 = vmatmul.f32.gmra.mxu0 %v4165_v47  ;;  %862 = vmatpush.msra.mxu1 %v4147_v6  ;;  %v665_v6 = vsub.f32 %v4494_v50, %v664_v41 }
  0x5f   :  { %937 = vmatpush.msra.mxu2 %v7239_v43  ;;  %1002 = vmatpush.msra.mxu3 %v4172_v49  ;;  %v80_v43 = vld [vmem:[%s7066_s1 + $0x120] sm:$0xff] }
  0x60   :  { %810 = vmatpush.msra.mxu0 %v4259_v7  ;;  %864 = vmatpush.msra.mxu1 %v4172_v49  ;;  %v91_v49 = vld [vmem:[%s7066_s1 + $0x178] sm:$0xff]  ;;  %v7243_v7 = vand.u32 4294901760, %v4297_v3 }
  0x61   :  { %941 = vmatpush.msra.mxu2 %v7240_v39  ;;  %1004 = vmatpush.msra.mxu3 %v4187_v54  ;;  %v4533_v56 = vand.u32 4294901760, %v91_v49  ;;  %v4688_v39 = vand.u32 4294901760, %v81_v32 }
  0x62   :  { %813 = vmatpush.msra.mxu0 %v4283_v12  ;;  %659 = vmatmul.f32.gmra.mxu2 %v658_v37  ;;  %v4682_v37 = vsub.f32 %v83_v61, %v4656_v60 }
  0x63   :  { %866 = vmatpush.msra.mxu1 %v4187_v54  ;;  %945 = vmatpush.msra.mxu2 %v7241_v55  ;;  %v7242_v54 = vand.u32 4294901760, %v4283_v12  ;;  %v89_v12 = vld [vmem:[%s7066_s1 + $0x168] sm:$0xff] }
  0x64   :  { %1006 = vmatpush.msra.mxu3 %v4212_v23  ;;  %816 = vmatpush.msra.mxu0 %v4297_v3  ;;  %v4550_v3 = vsub.f32 %v91_v49, %v4533_v56  ;;  %v4558_v59 = vand.u32 4294901760, %v89_v12  ;;  %v4694_v49 = vsub.f32 %v82_v27, %v4668_v29 }
  0x65   :  { %776 = vmatmul.f32.gmra.mxu3 %v4445_v58  ;;  %868 = vmatpush.msra.mxu1 %v4212_v23  ;;  %v666_v23 = vand.u32 4294901760, %v665_v6 }
  0x66   :  { %949 = vmatpush.msra.mxu2 %v7242_v54  ;;  %1008 = vmatpush.msra.mxu3 %v4227_v16  ;;  %v14_v54 = vld [vmem:[%s7065_s0 + $0x10] sm:$0xff] }
  0x67   :  { %819 = vmatpush.msra.mxu0 %v4318_v36  ;;  %598 = vmatmul.f32.gmra.mxu1 %v4165_v47  ;;  %v4540_v47 = vand.u32 4294901760, %v90_v45 }
  0x68   :  { %553 = vmatmul.f32.gmra.mxu0 %v4243_v31  ;;  %870 = vmatpush.msra.mxu1 %v4227_v16  ;;  %v7244_v16 = vand.u32 4294901760, %v4318_v36 }
  0x69   :  { %953 = vmatpush.msra.mxu2 %v7243_v7  ;;  %1010 = vmatpush.msra.mxu3 %v4250_v26  ;;  %v4563_v36 = vsub.f32 %v90_v45, %v4540_v47  ;;  %v79_v7 = vld [vmem:[%s7066_s1 + $0x118] sm:$0xff] }
  0x6a   :  { %822 = vmatpush.msra.mxu0 %v4334_v9  ;;  %872 = vmatpush.msra.mxu1 %v4250_v26  ;;  %v88_v26 = vld [vmem:[%s7066_s1 + $0x160] sm:$0xff]  ;;  %v1107_v9 = vand.u32 4294901760, %v4550_v3 }
  0x6b   :  { %957 = vmatpush.msra.mxu2 %v7244_v16  ;;  %1012 = vmatpush.msra.mxu3 %v4265_v18  ;;  %v4567_v46 = vand.u32 4294901760, %v88_v26  ;;  %v7099_v16 = vand.u32 4294901760, %v4682_v37 }
  0x6c   :  { %825 = vmatpush.msra.mxu0 %v4358_v38  ;;  %667 = vmatmul.f32.gmra.mxu2 %v666_v23  ;;  %v4703_v23 = vand.u32 4294901760, %v80_v43 }
  0x6d   :  { %874 = vmatpush.msra.mxu1 %v4265_v18  ;;  %961 = vmatpush.msra.mxu2 %v745_v17  ;;  %v87_v18 = vld [vmem:[%s7066_s1 + $0x158] sm:$0xff]  ;;  %v4579_v17 = vsub.f32 %v89_v12, %v4558_v59 }
  0x6e   :  { %1014 = vmatpush.msra.mxu3 %v4291_v20  ;;  %828 = vmatpush.msra.mxu0 %v4371_v0  ;;  %v4586_v38 = vand.u32 4294901760, %v87_v18  ;;  %v85_v0 = vld [vmem:[%s7066_s1 + $0x148] sm:$0xff] }
  0x6f   :  { %780 = vmatmul.f32.gmra.mxu3 %v4478_v34  ;;  %876 = vmatpush.msra.mxu1 %v4291_v20  ;;  %v86_v20 = vld [vmem:[%s7066_s1 + $0x150] sm:$0xff] }
  0x70   :  { %965 = vmatpush.msra.mxu2 %v751_v10  ;;  %1016 = vmatpush.msra.mxu3 %v4304_v30  ;;  %v7110_v10 = vand.u32 4294901760, %v4563_v36  ;;  %v4600_v4 = vand.u32 4294901760, %v86_v20  ;;  %v4615_v62 = vsub.f32 %v87_v18, %v4586_v38  ;;  %v78_v18 = vld [vmem:[%s7066_s1 + $0x110] sm:$0xff] }
  0x71   :  { %831 = vmatpush.msra.mxu0 %v4385_v35  ;;  %602 = vmatmul.f32.gmra.mxu1 %v4243_v31  ;;  %v4593_v31 = vsub.f32 %v88_v26, %v4567_v46  ;;  %v84_v35 = vld [vmem:[%s7066_s1 + $0x140] sm:$0xff]  ;;  %v4718_v26 = vsub.f32 %v81_v32, %v4688_v39 }
  0x72   :  { %834 = vmatmul.f32.vlgmr.msra.gmra.mxu0 %v4382_v21  ;;  %878 = vmatpush.msra.mxu1 %v4304_v30  ;;  %v1108_v30 = vsub.f32 %v4550_v3, %v1107_v9  ;;  %v4628_v33 = vsub.f32 %v86_v20, %v4600_v4  ;;  %v4635_v5 = vand.u32 4294901760, %v84_v35  ;;  %v7105_v24 = vand.u32 4294901760, %v4615_v62 }
  0x73   :  { %969 = vmatpush.msra.mxu2 %v757_v1  ;;  %1018 = vmatpush.msra.mxu3 %v4325_v28  ;;  %v7109_v1 = vand.u32 4294901760, %v4579_v17  ;;  %v7107_v51 = vand.u32 4294901760, %v4593_v31  ;;  %v4723_v20 = vand.u32 4294901760, %v14_v54  ;;  %v7097_v61 = vand.u32 4294901760, %v4718_v26 }
  0x74   :  { %1041 = vmatpush.msrb.mxu0 %v4533_v56  ;;  %880 = vmatpush.msra.mxu1 %v4325_v28  ;;  %v1114_v28 = vsub.f32 %v4563_v36, %v7110_v10  ;;  %v7103_v15 = vand.u32 4294901760, %v4628_v33  ;;  %v1132_v48 = vsub.f32 %v4615_v62, %v7105_v24  ;;  %v30_v24 = vld [vmem:[%s7065_s0 + $0x90] sm:$0xff] }
  0x75   :  { %973 = vmatpush.msra.mxu2 %v763_v19  ;;  %1020 = vmatpush.msra.mxu3 %v4346_v42  ;;  %v4622_v19 = vand.u32 4294901760, %v85_v0  ;;  %v1120_v11 = vsub.f32 %v4579_v17, %v7109_v1  ;;  %v4883_v10 = vand.u32 4294901760, %v30_v24 }
  0x76   :  { %1043 = vmatpush.msrb.mxu0 %v4540_v47  ;;  %882 = vmatpush.msra.mxu1 %v4346_v42  ;;  %v1109_v42 = vand.u32 4294901760, %v1108_v30  ;;  %v1115_v63 = vand.u32 4294901760, %v1114_v28  ;;  %v1138_v57 = vsub.f32 %v4628_v33, %v7103_v15  ;;  %v1133_v6 = vand.u32 4294901760, %v1132_v48  ;;  %v77_v28 = vld [vmem:[%s7066_s1 + $0x108] sm:$0xff]  ;;  %v76_v48 = vld [vmem:[%s7066_s1 + $0x100] sm:$0xff]  ;;  %v103_v15 = vld [vmem:[%s7066_s1 + $0x1d8] sm:$0xff] }
  0x77   :  { %975 = vmatmul.f32.vlgmr.msra.gmra.mxu2 %v4362_v52  ;;  %1022 = vmatpush.msra.mxu3 %v4360_v14  ;;  %v1121_v21 = vand.u32 4294901760, %v1120_v11  ;;  %v4726_v30 = vand.u32 4294901760, %v79_v7 }
  0x78   :  { %1220 = vmatpush.msrb.mxu2 %v4550_v3  ;;  %1045 = vmatpush.msrb.mxu0 %v4558_v59  ;;  %v1139_v12 = vand.u32 4294901760, %v1138_v57  ;;  %v100_v3 = vld [vmem:[%s7066_s1 + $0x1c0] sm:$0xff] }
  0x79   :  { %884 = vmatpush.msra.mxu1 %v4360_v14  ;;  %1024 = vmatmul.f32.vlgmr.msra.gmra.mxu3 %v4362_v52  ;;  %v1126_v14 = vsub.f32 %v4593_v31, %v7107_v51  ;;  %v4650_v52 = vsub.f32 %v85_v0, %v4622_v19  ;;  %v4732_v0 = vsub.f32 %v80_v43, %v4703_v23  ;;  %v4865_v51 = vand.u32 4294901760, %v103_v15 }
  0x7a   :  { %1223 = vmatpush.msrb.mxu2 %v4563_v36  ;;  %1288 = vmatpush.msrb.mxu3 %v4533_v56  ;;  %v4755_v27 = vsub.f32 %v79_v7, %v4726_v30  ;;  %v22_v7 = vld [vmem:[%s7065_s0 + $0x50] sm:$0xff] }
  0x7b   :  { %1047 = vmatpush.msrb.mxu0 %v4567_v46  ;;  %888 = vmatmul.f32.vlgmr.msra.gmra.mxu1 %v640_v44  ;;  %v4662_v44 = vsub.f32 %v84_v35, %v4635_v5  ;;  %v1127_v40 = vand.u32 4294901760, %v1126_v14  ;;  %v7102_v25 = vand.u32 4294901760, %v4650_v52  ;;  %v1156_v35 = vsub.f32 %v4682_v37, %v7099_v16  ;;  %7247 = vst [vmem:[#allocation7_spill] sm:$0xff] %v4865_v51 }
  0x7c   :  { %839 = vmatmul.f32.gmra.mxu0 %v4428_v53  ;;  %1110 = vmatpush.msrb.mxu1 %v1109_v42  ;;  %v7098_v53 = vand.u32 4294901760, %v4694_v49  ;;  %v4741_v42 = vand.u32 4294901760, %v78_v18  ;;  %v7096_v32 = vand.u32 4294901760, %v4732_v0 }
  0x7d   :  { %1226 = vmatpush.msrb.mxu2 %v4579_v17  ;;  %1290 = vmatpush.msrb.mxu3 %v4540_v47  ;;  %v7101_v55 = vand.u32 4294901760, %v4662_v44  ;;  %v1144_v45 = vsub.f32 %v4650_v52, %v7102_v25  ;;  %v1157_v57 = vand.u32 4294901760, %v1156_v35 }
  0x7e   :  { %1049 = vmatpush.msrb.mxu0 %v4586_v38  ;;  %1116 = vmatpush.msrb.mxu1 %v1115_v63  ;;  %v4747_v63 = vsub.f32 %v14_v54, %v4723_v20  ;;  %v1162_v14 = vsub.f32 %v4694_v49, %v7098_v53  ;;  %v4770_v43 = vsub.f32 %v78_v18, %v4741_v42  ;;  %v4776_v54 = vand.u32 4294901760, %v76_v48 }
  0x7f   :  { %1229 = vmatpush.msrb.mxu2 %v4593_v31  ;;  %1292 = vmatpush.msrb.mxu3 %v4558_v59  ;;  %v1174_v35 = vsub.f32 %v4732_v0, %v7096_v32 }
  0x80   :  { %1051 = vmatpush.msrb.mxu0 %v4600_v4  ;;  %979 = vmatmul.f32.gmra.mxu2 %v4408_v22  ;;  %7245 = vst [vmem:[#allocation5_spill] sm:$0xff] %v4776_v54  ;;  %v4812_v32 = vsub.f32 %v76_v48, %v4776_v54 }
  0x81   :  { %1122 = vmatpush.msrb.mxu1 %v1121_v21  ;;  %1232 = vmatpush.msrb.mxu2 %v4615_v62  ;;  %v4757_v21 = vand.u32 4294901760, %v77_v28  ;;  %v1175_v48 = vand.u32 4294901760, %v1174_v35 }
  0x82   :  { %1294 = vmatpush.msrb.mxu3 %v4567_v46  ;;  %1053 = vmatpush.msrb.mxu0 %v4622_v19 }
  0x83   :  { %1028 = vmatmul.f32.gmra.mxu3 %v4408_v22  ;;  %1128 = vmatpush.msrb.mxu1 %v1127_v40  ;;  %v1150_v22 = vsub.f32 %v4662_v44, %v7101_v55  ;;  %v107_v40 = vld [vmem:[%s7066_s1 + $0x1f8] sm:$0xff]  ;;  %v7112_v55 = vand.u32 4294901760, %v4812_v32 }
  0x84   :  { %1235 = vmatpush.msrb.mxu2 %v4628_v33  ;;  %1296 = vmatpush.msrb.mxu3 %v4586_v38  ;;  %v4788_v18 = vand.u32 4294901760, %v107_v40 }
  0x85   :  { %1055 = vmatpush.msrb.mxu0 %v4635_v5  ;;  %894 = vmatmul.f32.gmra.mxu1 %v648_v8  ;;  %v1145_v8 = vand.u32 4294901760, %v1144_v45  ;;  %v1151_v11 = vand.u32 4294901760, %v1150_v22  ;;  %v7108_v45 = vand.u32 4294901760, %v4747_v63  ;;  %v4786_v22 = vsub.f32 %v77_v28, %v4757_v21 }
  0x86   :  { %844 = vmatmul.f32.gmra.mxu0 %v4459_v13  ;;  %1134 = vmatpush.msrb.mxu1 %v1133_v6  ;;  %v1168_v6 = vsub.f32 %v4718_v26, %v7097_v61  ;;  %v7104_v28 = vand.u32 4294901760, %v4770_v43 }
  0x87   :  { %1238 = vmatpush.msrb.mxu2 %v4650_v52  ;;  %1298 = vmatpush.msrb.mxu3 %v4600_v4  ;;  %v7106_v53 = vand.u32 4294901760, %v4786_v22 }
  0x88   :  { %1057 = vmatpush.msrb.mxu0 %v4656_v60  ;;  %1140 = vmatpush.msrb.mxu1 %v1139_v12  ;;  %v1163_v12 = vand.u32 4294901760, %v1162_v14  ;;  %v105_v14 = vld [vmem:[%s7066_s1 + $0x1e8] sm:$0xff]  ;;  %v1169_v13 = vand.u32 4294901760, %v1168_v6  ;;  %v4822_v6 = vsub.f32 %v107_v40, %v4788_v18  ;;  %v1186_v40 = vsub.f32 %v4770_v43, %v7104_v28 }
  0x89   :  { %1241 = vmatpush.msrb.mxu2 %v4662_v44  ;;  %1300 = vmatpush.msrb.mxu3 %v4622_v19  ;;  %v4826_v16 = vand.u32 4294901760, %v105_v14 }
  0x8a   :  { %1059 = vmatpush.msrb.mxu0 %v4668_v29  ;;  %983 = vmatmul.f32.gmra.mxu2 %v4445_v58 }
  0x8b   :  { %1146 = vmatpush.msrb.mxu1 %v1145_v8  ;;  %1244 = vmatpush.msrb.mxu2 %v4682_v37  ;;  %v106_v8 = vld [vmem:[%s7066_s1 + $0x1f0] sm:$0xff]  ;;  %7246 = vst [vmem:[#allocation6_spill] sm:$0xff] %v4826_v16 }
  0x8c   :  { %1302 = vmatpush.msrb.mxu3 %v4635_v5  ;;  %1061 = vmatpush.msrb.mxu0 %v4688_v39 }
  0x8d   :  { %1032 = vmatmul.f32.gmra.mxu3 %v4445_v58  ;;  %1152 = vmatpush.msrb.mxu1 %v1151_v11  ;;  %v7100_v58 = vand.u32 4294901760, %v4755_v27  ;;  %v4801_v11 = vand.u32 4294901760, %v22_v7 }
  0x8e   :  { %1247 = vmatpush.msrb.mxu2 %v4694_v49  ;;  %1304 = vmatpush.msrb.mxu3 %v4656_v60 }
  0x8f   :  { %1063 = vmatpush.msrb.mxu0 %v4703_v23  ;;  %900 = vmatmul.f32.gmra.mxu1 %v656_v2  ;;  %v1075_v2 = vsub.f32 %v4747_v63, %v7108_v45  ;;  %v1180_v61 = vsub.f32 %v4755_v27, %v7100_v58  ;;  %v4837_v58 = vsub.f32 %v22_v7, %v4801_v11 }
  0x90   :  { %849 = vmatmul.f32.gmra.mxu0 %v4494_v50  ;;  %1158 = vmatpush.msrb.mxu1 %v1157_v57  ;;  %v4814_v57 = vand.u32 4294901760, %v106_v8  ;;  %v1192_v7 = vsub.f32 %v4786_v22, %v7106_v53  ;;  %v101_v50 = vld [vmem:[%s7066_s1 + $0x1c8] sm:$0xff] }
  0x91   :  { %1250 = vmatpush.msrb.mxu2 %v4718_v26  ;;  %1306 = vmatpush.msrb.mxu3 %v4668_v29  ;;  %v1076_v35 = vand.u32 4294901760, %v1075_v2  ;;  %v1181_v28 = vand.u32 4294901760, %v1180_v61  ;;  %v1187_v61 = vand.u32 4294901760, %v1186_v40  ;;  %v7113_v53 = vand.u32 4294901760, %v4837_v58 }
  0x92   :  { %1065 = vmatpush.msrb.mxu0 %v4726_v30  ;;  %1164 = vmatpush.msrb.mxu1 %v1163_v12  ;;  %v104_v12 = vld [vmem:[%s7066_s1 + $0x1e0] sm:$0xff]  ;;  %v4842_v25 = vsub.f32 %v106_v8, %v4814_v57  ;;  %v4857_v8 = vsub.f32 %v105_v14, %v4826_v16  ;;  %v1198_v14 = vsub.f32 %v4812_v32, %v7112_v55  ;;  %v1193_v40 = vand.u32 4294901760, %v1192_v7 }
  0x93   :  { %1253 = vmatpush.msrb.mxu2 %v4732_v0  ;;  %1308 = vmatpush.msrb.mxu3 %v4688_v39  ;;  %v4853_v2 = vand.u32 4294901760, %v104_v12  ;;  %v4906_v55 = vand.u32 4294901760, %v101_v50 }
  0x94   :  { %1067 = vmatpush.msrb.mxu0 %v4741_v42  ;;  %987 = vmatmul.f32.gmra.mxu2 %v4478_v34  ;;  %v1199_v7 = vand.u32 4294901760, %v1198_v14 }
  0x95   :  { %1170 = vmatpush.msrb.mxu1 %v1169_v13  ;;  %1256 = vmatpush.msrb.mxu2 %v4755_v27  ;;  %v7111_v13 = vand.u32 4294901760, %v4822_v6  ;;  %v4881_v1 = vsub.f32 %v104_v12, %v4853_v2  ;;  %v1083_v12 = vsub.f32 %v4837_v58, %v7113_v53  ;;  %v4915_v53 = vsub.f32 %v30_v24, %v4883_v10 }
  0x96   :  { %1310 = vmatpush.msrb.mxu3 %v4703_v23  ;;  %1069 = vmatpush.msrb.mxu0 %v4757_v21  ;;  %v7249_v24 = vand.u32 4294901760, %v4579_v17  ;;  %v38_v17 = vld [vmem:[%s7065_s0 + $0xd0] sm:$0xff] }
  0x97   :  { %1036 = vmatmul.f32.gmra.mxu3 %v4478_v34  ;;  %1176 = vmatpush.msrb.mxu1 %v1175_v48  ;;  %v102_v34 = vld [vmem:[%s7066_s1 + $0x1d0] sm:$0xff]  ;;  %v7114_v48 = vand.u32 4294901760, %v4842_v25  ;;  %v1542_v45 = vsub.f32 %v4822_v6, %v7111_v13 }
  0x98   :  { %1259 = vmatpush.msrb.mxu2 %v4770_v43  ;;  %1312 = vmatpush.msrb.mxu3 %v4726_v30 }
  0x99   :  { %1071 = vmatpush.msrb.mxu0 %v4776_v54  ;;  %906 = vmatmul.f32.gmra.mxu1 %v664_v41  ;;  %v7115_v41 = vand.u32 4294901760, %v4857_v8  ;;  %v1548_v13 = vsub.f32 %v4842_v25, %v7114_v48 }
  0x9a   :  { %1077 = vmatmul.f32.vlgmr.msrb.gmra.mxu0 %v1076_v35  ;;  %1182 = vmatpush.msrb.mxu1 %v1181_v28  ;;  %v4891_v28 = vand.u32 4294901760, %v102_v34  ;;  %v4899_v35 = vsub.f32 %v103_v15, %v4865_v51  ;;  %v1543_v15 = vand.u32 4294901760, %v1542_v45  ;;  %v1084_v45 = vand.u32 4294901760, %v1083_v12 }
  0x9b   :  { %1262 = vmatpush.msrb.mxu2 %v4786_v22  ;;  %1314 = vmatpush.msrb.mxu3 %v4741_v42  ;;  %v1554_v14 = vsub.f32 %v4857_v8, %v7115_v41  ;;  %v1549_v41 = vand.u32 4294901760, %v1548_v13  ;;  %v7253_v12 = vand.u32 4294901760, %v4881_v1  ;;  %v7254_v13 = vand.u32 4294901760, %v4593_v31  ;;  %v97_v31 = vld [vmem:[%s7066_s1 + $0x1a8] sm:$0xff] }
  0x9c   :  { %1347 = vmatpush.msra.mxu0 %v1107_v9  ;;  %1188 = vmatpush.msrb.mxu1 %v1187_v61  ;;  %v7248_v9 = vand.u32 4294901760, %v4563_v36  ;;  %v4923_v48 = vsub.f32 %v102_v34, %v4891_v28  ;;  %v99_v36 = vld [vmem:[%s7066_s1 + $0x1b8] sm:$0xff]  ;;  %v7251_v34 = vand.u32 4294901760, %v4747_v63 }
  0x9d   :  { %1265 = vmatpush.msrb.mxu2 %v4812_v32  ;;  %1316 = vmatpush.msrb.mxu3 %v4757_v21 }
  0x9e   :  { %1351 = vmatpush.msra.mxu0 %v7248_v9  ;;  %1194 = vmatpush.msrb.mxu1 %v1193_v40  ;;  %v4932_v9 = vand.u32 4294901760, %v100_v3  ;;  %v4949_v40 = vand.u32 4294901760, %v99_v36 }
  0x9f   :  { %1268 = vmatmul.f32.vlgmr.msrb.gmra.mxu2 %v4747_v63  ;;  %1318 = vmatpush.msrb.mxu3 %v4776_v54  ;;  %v4939_v54 = vsub.f32 %v101_v50, %v4906_v55  ;;  %v98_v63 = vld [vmem:[%s7066_s1 + $0x1b0] sm:$0xff]  ;;  %v1555_v50 = vand.u32 4294901760, %v1554_v14 }
  0xa0   :  { %1475 = vmatpush.msra.mxu2 %v4788_v18  ;;  %1355 = vmatpush.msra.mxu0 %v7249_v24  ;;  %v4934_v61 = vpop.f32.mrf.mxu0  ;;  %v1560_v24 = vsub.f32 %v4881_v1, %v7253_v12 }
  0xa1   :  { %7250 = vst [vmem:[#allocation8_spill] sm:$0xff] %v4934_v61  ;;  %1200 = vmatpush.msrb.mxu1 %v1199_v7  ;;  %1322 = vmatmul.f32.vlgmr.msrb.gmra.mxu3 %v7251_v34  ;;  %v7255_v34 = vand.u32 4294901760, %v4899_v35  ;;  %v4963_v7 = vsub.f32 %v100_v3, %v4932_v9  ;;  %v4965_v61 = vand.u32 4294901760, %v38_v17 }
  0xa2   :  { %7252 = vst [vmem:[#allocation9_spill] sm:$0xff] %v4939_v54  ;;  %1477 = vmatpush.msra.mxu2 %v4814_v57  ;;  %1544 = vmatpush.msra.mxu3 %v1543_v15  ;;  %v1561_v3 = vand.u32 4294901760, %v1560_v24  ;;  %v4981_v15 = vsub.f32 %v99_v36, %v4949_v40 }
  0xa3   :  { %1359 = vmatpush.msra.mxu0 %v7254_v13  ;;  %1202 = vmatmul.f32.vlgmr.msrb.gmra.mxu1 %v4723_v20  ;;  %v1566_v12 = vsub.f32 %v4899_v35, %v7255_v34  ;;  %v7257_v13 = vand.u32 4294901760, %v4915_v53 }
  0xa4   :  { %1085 = vmatmul.f32.gmra.mxu0 %v1084_v45  ;;  %1426 = vmatpush.msra.mxu1 %v4533_v56  ;;  %v4972_v45 = vand.u32 4294901760, %v98_v63  ;;  %v7256_v56 = vand.u32 4294901760, %v4615_v62  ;;  %v7259_v62 = vand.u32 4294901760, %v4628_v33  ;;  %v7123_v24 = vand.u32 4294901760, %v4981_v15 }
  0xa5   :  { %1479 = vmatpush.msra.mxu2 %v4826_v16  ;;  %1550 = vmatpush.msra.mxu3 %v1549_v41  ;;  %v1091_v34 = vsub.f32 %v4915_v53, %v7257_v13  ;;  %v7258_v41 = vand.u32 4294901760, %v4923_v48  ;;  %v4987_v16 = vand.u32 4294901760, %v97_v31  ;;  %v1567_v36 = vand.u32 4294901760, %v1566_v12  ;;  %v95_v12 = vld [vmem:[%s7066_s1 + $0x198] sm:$0xff] }
  0xa6   :  { %1363 = vmatpush.msra.mxu0 %v7256_v56  ;;  %1428 = vmatpush.msra.mxu1 %v4540_v47  ;;  %v96_v47 = vld [vmem:[%s7066_s1 + $0x1a0] sm:$0xff]  ;;  %v7261_v13 = vand.u32 4294901760, %v4939_v54  ;;  %v5007_v33 = vsub.f32 %v98_v63, %v4972_v45  ;;  %v7265_v63 = vand.u32 4294901760, %v4837_v58 }
  0xa7   :  { %1481 = vmatpush.msra.mxu2 %v4853_v2  ;;  %1556 = vmatpush.msra.mxu3 %v1555_v50  ;;  %v1572_v14 = vsub.f32 %v4923_v48, %v7258_v41  ;;  %v4997_v50 = vsub.f32 %v38_v17, %v4965_v61  ;;  %v7263_v17 = vand.u32 4294901760, %v4650_v52  ;;  %v7266_v52 = vand.u32 4294901760, %v4963_v7 }
  0xa8   :  { %1367 = vmatpush.msra.mxu0 %v7259_v62  ;;  %1273 = vmatmul.f32.gmra.mxu2 %v4837_v58  ;;  %v4999_v56 = vpop.f32.mrf.mxu1  ;;  %v1578_v41 = vsub.f32 %v4939_v54, %v7261_v13  ;;  %v5025_v54 = vsub.f32 %v97_v31, %v4987_v16  ;;  %v94_v58 = vld [vmem:[%s7066_s1 + $0x190] sm:$0xff] }
  0xa9   :  { %7260 = vst [vmem:[#allocation10_spill] sm:$0xff] %v4999_v56  ;;  %1430 = vmatpush.msra.mxu1 %v4558_v59  ;;  %1483 = vmatpush.msra.mxu2 %v4865_v51  ;;  %v5012_v62 = vpop.f32.mrf.mxu0  ;;  %v1092_v59 = vand.u32 4294901760, %v1091_v34  ;;  %v5017_v56 = vand.u32 4294901760, %v96_v47  ;;  %v1573_v13 = vand.u32 4294901760, %v1572_v14  ;;  %v7124_v34 = vand.u32 4294901760, %v4997_v50 }
  0xaa   :  { %7262 = vst [vmem:[#allocation11_spill] sm:$0xff] %v5012_v62  ;;  %1562 = vmatpush.msra.mxu3 %v1561_v3  ;;  %1371 = vmatpush.msra.mxu0 %v7263_v17  ;;  %v5019_v51 = vpop.f32.mrf.mxu2  ;;  %v1584_v3 = vsub.f32 %v4963_v7, %v7266_v52  ;;  %v5032_v17 = vand.u32 4294901760, %v95_v12  ;;  %v1579_v31 = vand.u32 4294901760, %v1578_v41  ;;  %v7125_v14 = vand.u32 4294901760, %v5007_v33  ;;  %v15_v41 = vld [vmem:[%s7065_s0 + $0x18] sm:$0xff] }
  0xab   :  { %7264 = vst [vmem:[#allocation12_spill] sm:$0xff] %v5019_v51  ;;  %1328 = vmatmul.f32.gmra.mxu3 %v7265_v63  ;;  %1432 = vmatpush.msra.mxu1 %v4567_v46  ;;  %v7267_v46 = vand.u32 4294901760, %v4662_v44  ;;  %v1590_v63 = vsub.f32 %v4981_v15, %v7123_v24  ;;  %v5048_v52 = vsub.f32 %v96_v47, %v5017_v56  ;;  %v93_v44 = vld [vmem:[%s7066_s1 + $0x188] sm:$0xff] }
  0xac   :  { %1485 = vmatpush.msra.mxu2 %v4891_v28  ;;  %1568 = vmatpush.msra.mxu3 %v1567_v36  ;;  %v5041_v36 = vpop.f32.mrf.mxu3  ;;  %v1099_v47 = vsub.f32 %v4997_v50, %v7124_v34  ;;  %v5064_v24 = vsub.f32 %v95_v12, %v5032_v17  ;;  %v7270_v12 = vand.u32 4294901760, %v4694_v49 }
  0xad   :  { %1375 = vmatpush.msra.mxu0 %v7267_v46  ;;  %1206 = vmatmul.f32.gmra.mxu1 %v4801_v11  ;;  %7268 = vst [vmem:[#allocation13_spill] sm:$0xff] %v5041_v36  ;;  %v5055_v46 = vand.u32 4294901760, %v94_v58 }
  0xae   :  { %1093 = vmatmul.f32.gmra.mxu0 %v1092_v59  ;;  %1434 = vmatpush.msra.mxu1 %v4586_v38  ;;  %v7269_v38 = vand.u32 4294901760, %v4682_v37  ;;  %v1585_v59 = vand.u32 4294901760, %v1584_v3  ;;  %v5076_v37 = vand.u32 4294901760, %v93_v44  ;;  %v1591_v3 = vand.u32 4294901760, %v1590_v63 }
  0xaf   :  { %1487 = vmatpush.msra.mxu2 %v4906_v55  ;;  %1574 = vmatpush.msra.mxu3 %v1573_v13  ;;  %v92_v13 = vld [vmem:[%s7066_s1 + $0x180] sm:$0xff]  ;;  %v5090_v62 = vsub.f32 %v94_v58, %v5055_v46 }
  0xb0   :  { %1379 = vmatpush.msra.mxu0 %v7269_v38  ;;  %1436 = vmatpush.msra.mxu1 %v4600_v4  ;;  %v1596_v4 = vsub.f32 %v5007_v33, %v7125_v14  ;;  %v5092_v49 = vand.u32 4294901760, %v92_v13  ;;  %v7274_v38 = vand.u32 4294901760, %v4718_v26  ;;  %v5107_v51 = vsub.f32 %v93_v44, %v5076_v37 }
  0xb1   :  { %1489 = vmatpush.msra.mxu2 %v4932_v9  ;;  %1580 = vmatpush.msra.mxu3 %v1579_v31  ;;  %v7272_v31 = vand.u32 4294901760, %v5025_v54  ;;  %v7277_v26 = vand.u32 4294901760, %v5048_v52 }
  0xb2   :  { %1383 = vmatpush.msra.mxu0 %v7270_v12  ;;  %1278 = vmatmul.f32.gmra.mxu2 %v4915_v53  ;;  %v5082_v34 = vpop.f32.mrf.mxu1  ;;  %v5094_v12 = vand.u32 4294901760, %v15_v41  ;;  %v1597_v58 = vand.u32 4294901760, %v1596_v4  ;;  %v5121_v44 = vsub.f32 %v92_v13, %v5092_v49  ;;  %v7280_v13 = vand.u32 4294901760, %v4755_v27 }
  0xb3   :  { %7271 = vst [vmem:[#allocation14_spill] sm:$0xff] %v5082_v34  ;;  %1438 = vmatpush.msra.mxu1 %v4622_v19  ;;  %1491 = vmatpush.msra.mxu2 %v4949_v40  ;;  %v1602_v14 = vsub.f32 %v5025_v54, %v7272_v31  ;;  %v5096_v63 = vpop.f32.mrf.mxu0  ;;  %v1100_v19 = vand.u32 4294901760, %v1099_v47  ;;  %v1613_v34 = vand.u32 4294901760, %v5064_v24  ;;  %v5101_v36 = vpop.f32.mrf.mxu2  ;;  %v7276_v31 = vand.u32 4294901760, %v4915_v53 }
  0xb4   :  { %7273 = vst [vmem:[#allocation15_spill] sm:$0xff] %v5096_v63  ;;  %1586 = vmatpush.msra.mxu3 %v1585_v59  ;;  %1387 = vmatpush.msra.mxu0 %v7274_v38  ;;  %v1608_v59 = vsub.f32 %v5048_v52, %v7277_v26  ;;  %v7278_v47 = vand.u32 4294901760, %v4732_v0  ;;  %v1619_v38 = vand.u32 4294901760, %v5090_v62 }
  0xb5   :  { %7275 = vst [vmem:[#allocation16_spill] sm:$0xff] %v5101_v36  ;;  %1334 = vmatmul.f32.gmra.mxu3 %v7276_v31  ;;  %1440 = vmatpush.msra.mxu1 %v4635_v5  ;;  %v1603_v53 = vand.u32 4294901760, %v1602_v14  ;;  %v5118_v5 = vsub.f32 %v15_v41, %v5094_v12  ;;  %v1614_v0 = vsub.f32 %v5064_v24, %v1613_v34  ;;  %v1625_v14 = vand.u32 4294901760, %v5107_v51  ;;  %v23_v41 = vld [vmem:[%s7065_s0 + $0x58] sm:$0xff] }
  0xb6   :  { %1493 = vmatpush.msra.mxu2 %v4972_v45  ;;  %1592 = vmatpush.msra.mxu3 %v1591_v3  ;;  %v5123_v4 = vpop.f32.mrf.mxu3  ;;  %v1609_v3 = vand.u32 4294901760, %v1608_v59  ;;  %v1631_v31 = vand.u32 4294901760, %v5121_v44  ;;  %v5146_v26 = vand.u32 4294901760, %v23_v41 }
  0xb7   :  { %1391 = vmatpush.msra.mxu0 %v7278_v47  ;;  %1210 = vmatmul.f32.gmra.mxu1 %v4883_v10  ;;  %7279 = vst [vmem:[#allocation17_spill] sm:$0xff] %v5123_v4  ;;  %v1615_v27 = vand.u32 4294901760, %v1614_v0  ;;  %v1626_v59 = vsub.f32 %v5107_v51, %v1625_v14  ;;  %v7286_v0 = vand.u32 4294901760, %v4997_v50 }
  0xb8   :  { %1101 = vmatmul.f32.gmra.mxu0 %v1100_v19  ;;  %1442 = vmatpush.msra.mxu1 %v4656_v60  ;;  %v1620_v60 = vsub.f32 %v5090_v62, %v1619_v38  ;;  %v1508_v19 = vand.u32 4294901760, %v5118_v5 }
  0xb9   :  { %1495 = vmatpush.msra.mxu2 %v4987_v16  ;;  %1598 = vmatpush.msra.mxu3 %v1597_v58  ;;  %v7281_v58 = vand.u32 4294901760, %v4770_v43  ;;  %v7284_v43 = vand.u32 4294901760, %v4786_v22  ;;  %v5172_v22 = vsub.f32 %v23_v41, %v5146_v26  ;;  %v31_v41 = vld [vmem:[%s7065_s0 + $0x98] sm:$0xff] }
  0xba   :  { %1395 = vmatpush.msra.mxu0 %v7280_v13  ;;  %1444 = vmatpush.msra.mxu1 %v4668_v29  ;;  %v1509_v13 = vsub.f32 %v5118_v5, %v1508_v19 }
  0xbb   :  { %1497 = vmatpush.msra.mxu2 %v5017_v56  ;;  %1604 = vmatpush.msra.mxu3 %v1603_v53 }
  0xbc   :  { %1399 = vmatpush.msra.mxu0 %v7281_v58  ;;  %1283 = vmatmul.f32.gmra.mxu2 %v4997_v50  ;;  %v5148_v29 = vpop.f32.mrf.mxu1  ;;  %v1632_v58 = vsub.f32 %v5121_v44, %v1631_v31  ;;  %v7287_v50 = vand.u32 4294901760, %v4812_v32  ;;  %v7133_v32 = vand.u32 4294901760, %v5172_v22 }
  0xbd   :  { %7282 = vst [vmem:[#allocation18_spill] sm:$0xff] %v5148_v29  ;;  %1446 = vmatpush.msra.mxu1 %v4688_v39  ;;  %1499 = vmatpush.msra.mxu2 %v5032_v17  ;;  %v5155_v47 = vpop.f32.mrf.mxu0  ;;  %v5159_v53 = vpop.f32.mrf.mxu2  ;;  %v1621_v39 = vand.u32 4294901760, %v1620_v60  ;;  %v1510_v60 = vand.u32 4294901760, %v1509_v13  ;;  %v7294_v13 = vand.u32 4294901760, %v4842_v25 }
  0xbe   :  { %7283 = vst [vmem:[#allocation19_spill] sm:$0xff] %v5155_v47  ;;  %1610 = vmatpush.msra.mxu3 %v1609_v3  ;;  %1403 = vmatpush.msra.mxu0 %v7284_v43 }
  0xbf   :  { %7285 = vst [vmem:[#allocation20_spill] sm:$0xff] %v5159_v53  ;;  %1340 = vmatmul.f32.gmra.mxu3 %v7286_v0  ;;  %1448 = vmatpush.msra.mxu1 %v4703_v23  ;;  %v1627_v23 = vand.u32 4294901760, %v1626_v59  ;;  %v7291_v0 = vand.u32 4294901760, %v4822_v6 }
  0xc0   :  { %1501 = vmatpush.msra.mxu2 %v5055_v46  ;;  %1616 = vmatpush.msra.mxu3 %v1615_v27  ;;  %v5177_v3 = vpop.f32.mrf.mxu3  ;;  %v1633_v27 = vand.u32 4294901760, %v1632_v58 }
  0xc1   :  { %1407 = vmatpush.msra.mxu0 %v7287_v50  ;;  %1214 = vmatmul.f32.gmra.mxu1 %v4965_v61  ;;  %7288 = vst [vmem:[#allocation21_spill] sm:$0xff] %v5177_v3  ;;  %v137_v3 = vld [vmem:[%s7066_s1 + $0x2e8] sm:$0xff] }
  0xc2   :  { %1409 = vmatmul.f32.vlgmr.msra.gmra.mxu0 %v4723_v20  ;;  %1450 = vmatpush.msra.mxu1 %v4726_v30  ;;  %v5191_v30 = vand.u32 4294901760, %v31_v41 }
  0xc3   :  { %1503 = vmatpush.msra.mxu2 %v5076_v37  ;;  %1622 = vmatpush.msra.mxu3 %v1621_v39 }
  0xc4   :  { %1654 = vmatpush.msrb.mxu0 %v4822_v6  ;;  %1452 = vmatpush.msra.mxu1 %v4741_v42  ;;  %v1517_v42 = vsub.f32 %v5172_v22, %v7133_v32  ;;  %v5211_v6 = vsub.f32 %v31_v41, %v5191_v30  ;;  %v7300_v41 = vand.u32 4294901760, %v4899_v35 }
  0xc5   :  { %1505 = vmatpush.msra.mxu2 %v5092_v49  ;;  %1628 = vmatpush.msra.mxu3 %v1627_v23  ;;  %v7296_v23 = vand.u32 4294901760, %v4857_v8 }
  0xc6   :  { %1657 = vmatpush.msrb.mxu0 %v4842_v25  ;;  %1454 = vmatpush.msra.mxu1 %v4757_v21  ;;  %v5193_v59 = vpop.f32.mrf.mxu1  ;;  %v7293_v21 = vld [vmem:[#allocation5_spill] sm:$0xff]  ;;  %v1518_v50 = vand.u32 4294901760, %v1517_v42  ;;  %v39_v25 = vld [vmem:[%s7065_s0 + $0xd8] sm:$0xff] }
  0xc7   :  { %7289 = vst [vmem:[#allocation22_spill] sm:$0xff] %v5193_v59  ;;  %1511 = vmatmul.f32.vlgmr.msra.gmra.mxu2 %v1510_v60  ;;  %1634 = vmatpush.msra.mxu3 %v1633_v27  ;;  %v5195_v43 = vpop.f32.mrf.mxu0  ;;  %v5203_v39 = vpop.f32.mrf.mxu2  ;;  %v7297_v60 = vand.u32 4294901760, %v4881_v1 }
  0xc8   :  { %7290 = vst [vmem:[#allocation23_spill] sm:$0xff] %v5195_v43  ;;  %1781 = vmatpush.msrb.mxu2 %v7291_v0  ;;  %1660 = vmatpush.msrb.mxu0 %v4857_v8  ;;  %v5232_v8 = vand.u32 4294901760, %v39_v25 }
  0xc9   :  { %7292 = vst [vmem:[#allocation24_spill] sm:$0xff] %v5203_v39  ;;  %1456 = vmatpush.msra.mxu1 %v7293_v21  ;;  %1636 = vmatmul.f32.vlgmr.msra.gmra.mxu3 %v5094_v12  ;;  %v7304_v21 = vand.u32 4294901760, %v4923_v48 }
  0xca   :  { %1785 = vmatpush.msrb.mxu2 %v7294_v13  ;;  %1860 = vmatpush.msrb.mxu3 %v4788_v18  ;;  %v5215_v58 = vpop.f32.mrf.mxu3  ;;  %v5254_v13 = vsub.f32 %v39_v25, %v5232_v8 }
  0xcb   :  { %1663 = vmatpush.msrb.mxu0 %v4881_v1  ;;  %1458 = vmatmul.f32.vlgmr.msra.gmra.mxu1 %v4723_v20  ;;  %7295 = vst [vmem:[#allocation5_spill] sm:$0xff] %v5215_v58  ;;  %v7132_v20 = vand.u32 4294901760, %v5211_v6  ;;  %v7302_v1 = vld [vmem:[#allocation9_spill] sm:$0xff] }
  0xcc   :  { %1413 = vmatmul.f32.gmra.mxu0 %v4801_v11  ;;  %1722 = vmatpush.msrb.mxu1 %v4788_v18  ;;  %v7298_v18 = vld [vmem:[#allocation6_spill] sm:$0xff] }
  0xcd   :  { %1789 = vmatpush.msrb.mxu2 %v7296_v23  ;;  %1862 = vmatpush.msrb.mxu3 %v4814_v57  ;;  %v1525_v0 = vsub.f32 %v5211_v6, %v7132_v20  ;;  %v112_v20 = vld [vmem:[%s7066_s1 + $0x220] sm:$0xff] }
  0xce   :  { %1666 = vmatpush.msrb.mxu0 %v4899_v35  ;;  %1724 = vmatpush.msrb.mxu1 %v4814_v57  ;;  %v7305_v35 = vld [vmem:[#allocation7_spill] sm:$0xff] }
  0xcf   :  { %1793 = vmatpush.msrb.mxu2 %v7297_v60  ;;  %1864 = vmatpush.msrb.mxu3 %v7298_v18  ;;  %v1526_v23 = vand.u32 4294901760, %v1525_v0  ;;  %v7310_v60 = vand.u32 4294901760, %v4981_v15 }
  0xd0   :  { %1669 = vmatpush.msrb.mxu0 %v4923_v48  ;;  %1519 = vmatmul.f32.gmra.mxu2 %v1518_v50  ;;  %v5234_v27 = vpop.f32.mrf.mxu1  ;;  %v7130_v48 = vand.u32 4294901760, %v5254_v13 }
  0xd1   :  { %7299 = vst [vmem:[#allocation6_spill] sm:$0xff] %v5234_v27  ;;  %1726 = vmatpush.msrb.mxu1 %v7298_v18  ;;  %1797 = vmatpush.msrb.mxu2 %v7300_v41  ;;  %v5239_v57 = vpop.f32.mrf.mxu0  ;;  %v122_v41 = vld [vmem:[%s7066_s1 + $0x270] sm:$0xff] }
  0xd2   :  { %7301 = vst [vmem:[#allocation25_spill] sm:$0xff] %v5239_v57  ;;  %1866 = vmatpush.msrb.mxu3 %v4853_v2  ;;  %1672 = vmatpush.msrb.mxu0 %v7302_v1  ;;  %v5246_v42 = vpop.f32.mrf.mxu2 }
  0xd3   :  { %7303 = vst [vmem:[#allocation9_spill] sm:$0xff] %v5246_v42  ;;  %1640 = vmatmul.f32.gmra.mxu3 %v5146_v26  ;;  %1728 = vmatpush.msrb.mxu1 %v4853_v2  ;;  %v7307_v2 = vand.u32 4294901760, %v7302_v1  ;;  %v135_v42 = vld [vmem:[%s7066_s1 + $0x2d8] sm:$0xff] }
  0xd4   :  { %1801 = vmatpush.msrb.mxu2 %v7304_v21  ;;  %1868 = vmatpush.msrb.mxu3 %v7305_v35  ;;  %v5258_v50 = vpop.f32.mrf.mxu3  ;;  %v121_v21 = vld [vmem:[%s7066_s1 + $0x268] sm:$0xff] }
  0xd5   :  { %1675 = vmatpush.msrb.mxu0 %v4963_v7  ;;  %1462 = vmatmul.f32.gmra.mxu1 %v4801_v11  ;;  %7306 = vst [vmem:[#allocation7_spill] sm:$0xff] %v5258_v50  ;;  %v7308_v11 = vand.u32 4294901760, %v4963_v7 }
  0xd6   :  { %1417 = vmatmul.f32.gmra.mxu0 %v4883_v10  ;;  %1730 = vmatpush.msrb.mxu1 %v7305_v35 }
  0xd7   :  { %1805 = vmatpush.msrb.mxu2 %v7307_v2  ;;  %1870 = vmatpush.msrb.mxu3 %v4891_v28 }
  0xd8   :  { %1678 = vmatpush.msrb.mxu0 %v4981_v15  ;;  %1732 = vmatpush.msrb.mxu1 %v4891_v28  ;;  %v1533_v28 = vsub.f32 %v5254_v13, %v7130_v48  ;;  %v7313_v15 = vand.u32 4294901760, %v5007_v33  ;;  %v113_v48 = vld [vmem:[%s7066_s1 + $0x228] sm:$0xff] }
  0xd9   :  { %1809 = vmatpush.msrb.mxu2 %v7308_v11  ;;  %1872 = vmatpush.msrb.mxu3 %v4906_v55 }
  0xda   :  { %1681 = vmatpush.msrb.mxu0 %v5007_v33  ;;  %1527 = vmatmul.f32.gmra.mxu2 %v1526_v23  ;;  %v5272_v25 = vpop.f32.mrf.mxu1  ;;  %v7315_v33 = vand.u32 4294901760, %v5025_v54 }
  0xdb   :  { %7309 = vst [vmem:[#allocation26_spill] sm:$0xff] %v5272_v25  ;;  %1734 = vmatpush.msrb.mxu1 %v4906_v55  ;;  %1813 = vmatpush.msrb.mxu2 %v7310_v60  ;;  %v5277_v18 = vpop.f32.mrf.mxu0  ;;  %v5284_v7 = vpop.f32.mrf.mxu2  ;;  %v123_v55 = vld [vmem:[%s7066_s1 + $0x278] sm:$0xff] }
  0xdc   :  { %7311 = vst [vmem:[#allocation27_spill] sm:$0xff] %v5277_v18  ;;  %1874 = vmatpush.msrb.mxu3 %v4932_v9  ;;  %1684 = vmatpush.msrb.mxu0 %v5025_v54  ;;  %v5303_v0 = vand.u32 4294901760, %v123_v55 }
  0xdd   :  { %7312 = vst [vmem:[#allocation28_spill] sm:$0xff] %v5284_v7  ;;  %1644 = vmatmul.f32.gmra.mxu3 %v5191_v30  ;;  %1736 = vmatpush.msrb.mxu1 %v4932_v9  ;;  %v1534_v9 = vand.u32 4294901760, %v1533_v28 }
  0xde   :  { %1817 = vmatpush.msrb.mxu2 %v7313_v15  ;;  %1876 = vmatpush.msrb.mxu3 %v4949_v40  ;;  %v5299_v1 = vpop.f32.mrf.mxu3  ;;  %v5320_v54 = vsub.f32 %v123_v55, %v5303_v0 }
  0xdf   :  { %1687 = vmatpush.msrb.mxu0 %v5048_v52  ;;  %1466 = vmatmul.f32.gmra.mxu1 %v4883_v10  ;;  %7314 = vst [vmem:[#allocation29_spill] sm:$0xff] %v5299_v1  ;;  %v5310_v10 = vand.u32 4294901760, %v122_v41 }
  0xe0   :  { %1421 = vmatmul.f32.gmra.mxu0 %v4965_v61  ;;  %1738 = vmatpush.msrb.mxu1 %v4949_v40  ;;  %v7316_v40 = vand.u32 4294901760, %v5048_v52  ;;  %v5330_v52 = vand.u32 4294901760, %v121_v21 }
  0xe1   :  { %1821 = vmatpush.msrb.mxu2 %v7315_v33  ;;  %1878 = vmatpush.msrb.mxu3 %v4972_v45  ;;  %v5337_v2 = vsub.f32 %v122_v41, %v5310_v10 }
  0xe2   :  { %1690 = vmatpush.msrb.mxu0 %v5064_v24  ;;  %1740 = vmatpush.msrb.mxu1 %v4972_v45  ;;  %v120_v45 = vld [vmem:[%s7066_s1 + $0x260] sm:$0xff]  ;;  %v119_v24 = vld [vmem:[%s7066_s1 + $0x258] sm:$0xff]  ;;  %v5355_v60 = vsub.f32 %v121_v21, %v5330_v52 }
  0xe3   :  { %1825 = vmatpush.msrb.mxu2 %v7316_v40  ;;  %1880 = vmatpush.msrb.mxu3 %v4987_v16 }
  0xe4   :  { %1693 = vmatpush.msrb.mxu0 %v5090_v62  ;;  %1535 = vmatmul.f32.gmra.mxu2 %v1534_v9  ;;  %v5325_v35 = vpop.f32.mrf.mxu1  ;;  %v5364_v62 = vand.u32 4294901760, %v119_v24 }
  0xe5   :  { %7317 = vst [vmem:[#allocation30_spill] sm:$0xff] %v5325_v35  ;;  %1742 = vmatpush.msrb.mxu1 %v4987_v16  ;;  %1829 = vmatpush.msrb.mxu2 %v1613_v34  ;;  %v5332_v23 = vpop.f32.mrf.mxu0  ;;  %v5339_v11 = vpop.f32.mrf.mxu2  ;;  %v5343_v16 = vand.u32 4294901760, %v120_v45  ;;  %v7128_v34 = vand.u32 4294901760, %v5320_v54 }
  0xe6   :  { %7318 = vst [vmem:[#allocation31_spill] sm:$0xff] %v5332_v23  ;;  %1882 = vmatpush.msrb.mxu3 %v5017_v56  ;;  %1696 = vmatpush.msrb.mxu0 %v5107_v51  ;;  %v117_v51 = vld [vmem:[%s7066_s1 + $0x248] sm:$0xff]  ;;  %v5393_v15 = vsub.f32 %v119_v24, %v5364_v62 }
  0xe7   :  { %7319 = vst [vmem:[#allocation32_spill] sm:$0xff] %v5339_v11  ;;  %1648 = vmatmul.f32.gmra.mxu3 %v5232_v8  ;;  %1744 = vmatpush.msrb.mxu1 %v5017_v56  ;;  %v118_v56 = vld [vmem:[%s7066_s1 + $0x250] sm:$0xff]  ;;  %v5402_v41 = vand.u32 4294901760, %v117_v51  ;;  %v109_v11 = vld [vmem:[%s7066_s1 + $0x208] sm:$0xff] }
  0xe8   :  { %1833 = vmatpush.msrb.mxu2 %v1619_v38  ;;  %1884 = vmatpush.msrb.mxu3 %v5032_v17  ;;  %v5360_v28 = vpop.f32.mrf.mxu3  ;;  %v7126_v38 = vand.u32 4294901760, %v5337_v2  ;;  %v5378_v55 = vand.u32 4294901760, %v118_v56  ;;  %v5551_v23 = vand.u32 4294901760, %v109_v11 }
  0xe9   :  { %1699 = vmatpush.msrb.mxu0 %v5121_v44  ;;  %1470 = vmatmul.f32.gmra.mxu1 %v4965_v61  ;;  %7320 = vst [vmem:[#allocation33_spill] sm:$0xff] %v5360_v28  ;;  %v5371_v61 = vsub.f32 %v120_v45, %v5343_v16  ;;  %v116_v44 = vld [vmem:[%s7066_s1 + $0x240] sm:$0xff] }
  0xea   :  { %1702 = vmatmul.f32.vlgmr.msrb.gmra.mxu0 %v5118_v5  ;;  %1746 = vmatpush.msrb.mxu1 %v5032_v17  ;;  %v1976_v17 = vsub.f32 %v5320_v54, %v7128_v34  ;;  %v5410_v21 = vsub.f32 %v118_v56, %v5378_v55  ;;  %v5419_v24 = vand.u32 4294901760, %v116_v44 }
  0xeb   :  { %1837 = vmatpush.msrb.mxu2 %v1625_v14  ;;  %1886 = vmatpush.msrb.mxu3 %v5055_v46  ;;  %v7127_v14 = vand.u32 4294901760, %v5355_v60 }
  0xec   :  { %1909 = vmatpush.msra.mxu0 %v5303_v0  ;;  %1748 = vmatpush.msrb.mxu1 %v5055_v46  ;;  %v1982_v46 = vsub.f32 %v5337_v2, %v7126_v38  ;;  %v1977_v33 = vand.u32 4294901760, %v1976_v17  ;;  %v115_v38 = vld [vmem:[%s7066_s1 + $0x238] sm:$0xff]  ;;  %v7131_v17 = vand.u32 4294901760, %v5393_v15  ;;  %v7134_v5 = vand.u32 4294901760, %v5410_v21 }
  0xed   :  { %1841 = vmatpush.msrb.mxu2 %v1631_v31  ;;  %1888 = vmatpush.msrb.mxu3 %v5076_v37  ;;  %v1988_v45 = vsub.f32 %v5355_v60, %v7127_v14  ;;  %v114_v14 = vld [vmem:[%s7066_s1 + $0x230] sm:$0xff] }
  0xee   :  { %1911 = vmatpush.msra.mxu0 %v5310_v10  ;;  %1750 = vmatpush.msrb.mxu1 %v5076_v37  ;;  %v5398_v31 = vpop.f32.mrf.mxu1  ;;  %v7129_v37 = vand.u32 4294901760, %v5371_v61  ;;  %v1983_v56 = vand.u32 4294901760, %v1982_v46  ;;  %v5442_v46 = vand.u32 4294901760, %v115_v38 }
  0xef   :  { %7321 = vst [vmem:[#allocation34_spill] sm:$0xff] %v5398_v31  ;;  %1843 = vmatmul.f32.vlgmr.msrb.gmra.mxu2 %v5094_v12  ;;  %1890 = vmatpush.msrb.mxu3 %v5092_v49  ;;  %v5405_v9 = vpop.f32.mrf.mxu0  ;;  %v5412_v40 = vpop.f32.mrf.mxu2 }
  0xf0   :  { %7322 = vst [vmem:[#allocation35_spill] sm:$0xff] %v5405_v9  ;;  %2088 = vmatpush.msra.mxu2 %v5320_v54  ;;  %1913 = vmatpush.msra.mxu0 %v5330_v52 }
  0xf1   :  { %7323 = vst [vmem:[#allocation36_spill] sm:$0xff] %v5412_v40  ;;  %1752 = vmatpush.msrb.mxu1 %v5092_v49  ;;  %1892 = vmatmul.f32.vlgmr.msrb.gmra.mxu3 %v5094_v12  ;;  %v1994_v49 = vsub.f32 %v5371_v61, %v7129_v37  ;;  %v5434_v12 = vsub.f32 %v117_v51, %v5402_v41  ;;  %v5495_v40 = vand.u32 4294901760, %v112_v20 }
  0xf2   :  { %2091 = vmatpush.msra.mxu2 %v5337_v2  ;;  %2156 = vmatpush.msra.mxu3 %v5303_v0  ;;  %v5439_v34 = vpop.f32.mrf.mxu3  ;;  %v5448_v51 = vsub.f32 %v116_v44, %v5419_v24  ;;  %v2000_v37 = vsub.f32 %v5393_v15, %v7131_v17  ;;  %v5468_v17 = vsub.f32 %v115_v38, %v5442_v46 }
  0xf3   :  { %1915 = vmatpush.msra.mxu0 %v5343_v16  ;;  %1756 = vmatmul.f32.vlgmr.msrb.gmra.mxu1 %v1508_v19  ;;  %7324 = vst [vmem:[#allocation37_spill] sm:$0xff] %v5439_v34  ;;  %v1989_v19 = vand.u32 4294901760, %v1988_v45  ;;  %v1995_v45 = vand.u32 4294901760, %v1994_v49  ;;  %v5476_v49 = vand.u32 4294901760, %v113_v48  ;;  %v7328_v44 = vand.u32 4294901760, %v5434_v12 }
  0xf4   :  { %1707 = vmatmul.f32.gmra.mxu0 %v5172_v22  ;;  %1978 = vmatpush.msra.mxu1 %v1977_v33  ;;  %v5454_v33 = vand.u32 4294901760, %v114_v14  ;;  %v2001_v38 = vand.u32 4294901760, %v2000_v37 }
  0xf5   :  { %2094 = vmatpush.msra.mxu2 %v5355_v60  ;;  %2158 = vmatpush.msra.mxu3 %v5310_v10  ;;  %v5510_v1 = vsub.f32 %v113_v48, %v5476_v49 }
  0xf6   :  { %1917 = vmatpush.msra.mxu0 %v5364_v62  ;;  %1984 = vmatpush.msra.mxu1 %v1983_v56  ;;  %v2006_v56 = vsub.f32 %v5410_v21, %v7134_v5  ;;  %v5484_v5 = vsub.f32 %v114_v14, %v5454_v33  ;;  %v111_v14 = vld [vmem:[%s7066_s1 + $0x218] sm:$0xff] }
  0xf7   :  { %2097 = vmatpush.msra.mxu2 %v5371_v61  ;;  %2160 = vmatpush.msra.mxu3 %v5330_v52 }
  0xf8   :  { %1919 = vmatpush.msra.mxu0 %v5378_v55  ;;  %1847 = vmatmul.f32.gmra.mxu2 %v5146_v26  ;;  %v5473_v32 = vpop.f32.mrf.mxu1  ;;  %v2007_v37 = vand.u32 4294901760, %v2006_v56 }
  0xf9   :  { %7325 = vst [vmem:[#allocation38_spill] sm:$0xff] %v5473_v32  ;;  %1990 = vmatpush.msra.mxu1 %v1989_v19  ;;  %2100 = vmatpush.msra.mxu2 %v5393_v15  ;;  %v5479_v34 = vpop.f32.mrf.mxu0  ;;  %v16_v19 = vld [vmem:[%s7065_s0 + $0x20] sm:$0xff] }
  0xfa   :  { %7326 = vst [vmem:[#allocation39_spill] sm:$0xff] %v5479_v34  ;;  %2162 = vmatpush.msra.mxu3 %v5343_v16  ;;  %1921 = vmatpush.msra.mxu0 %v5402_v41  ;;  %v5489_v28 = vpop.f32.mrf.mxu2  ;;  %v2012_v34 = vsub.f32 %v5434_v12, %v7328_v44  ;;  %v5515_v31 = vand.u32 4294901760, %v16_v19 }
  0xfb   :  { %7327 = vst [vmem:[#allocation40_spill] sm:$0xff] %v5489_v28  ;;  %1896 = vmatmul.f32.gmra.mxu3 %v5146_v26  ;;  %1996 = vmatpush.msra.mxu1 %v1995_v45  ;;  %v7329_v26 = vand.u32 4294901760, %v5172_v22  ;;  %v7330_v45 = vand.u32 4294901760, %v5448_v51  ;;  %v110_v28 = vld [vmem:[%s7066_s1 + $0x210] sm:$0xff]  ;;  %v5520_v22 = vand.u32 4294901760, %v111_v14 }
  0xfc   :  { %2103 = vmatpush.msra.mxu2 %v5410_v21  ;;  %2164 = vmatpush.msra.mxu3 %v5364_v62  ;;  %v5517_v56 = vpop.f32.mrf.mxu3  ;;  %v2013_v48 = vand.u32 4294901760, %v2012_v34  ;;  %v5541_v35 = vsub.f32 %v16_v19, %v5515_v31 }
  0xfd   :  { %1923 = vmatpush.msra.mxu0 %v5419_v24  ;;  %1762 = vmatmul.f32.gmra.mxu1 %v7329_v26  ;;  %v2018_v44 = vsub.f32 %v5448_v51, %v7330_v45  ;;  %7331 = vst [vmem:[#allocation41_spill] sm:$0xff] %v5517_v56  ;;  %v5526_v45 = vsub.f32 %v112_v20, %v5495_v40  ;;  %v5535_v26 = vand.u32 4294901760, %v110_v28 }
  0xfe   :  { %1712 = vmatmul.f32.gmra.mxu0 %v5211_v6  ;;  %2002 = vmatpush.msra.mxu1 %v2001_v38  ;;  %v7332_v38 = vand.u32 4294901760, %v5468_v17  ;;  %v5549_v7 = vsub.f32 %v111_v14, %v5520_v22 }
  0xff   :  { %2106 = vmatpush.msra.mxu2 %v5434_v12  ;;  %2166 = vmatpush.msra.mxu3 %v5378_v55  ;;  %v2019_v34 = vand.u32 4294901760, %v2018_v44  ;;  %v108_v44 = vld [vmem:[%s7066_s1 + $0x200] sm:$0xff]  ;;  %v5568_v32 = vsub.f32 %v110_v28, %v5535_v26  ;;  %v7340_v9 = vand.u32 4294901760, %v5526_v45 }
 0x100   :  { %1925 = vmatpush.msra.mxu0 %v5442_v46  ;;  %2008 = vmatpush.msra.mxu1 %v2007_v37  ;;  %v2024_v56 = vsub.f32 %v5468_v17, %v7332_v38  ;;  %v7333_v37 = vand.u32 4294901760, %v5484_v5  ;;  %v5576_v58 = vand.u32 4294901760, %v108_v44 }
 0x101   :  { %2109 = vmatpush.msra.mxu2 %v5448_v51  ;;  %2168 = vmatpush.msra.mxu3 %v5402_v41 }
 0x102   :  { %1927 = vmatpush.msra.mxu0 %v5454_v33  ;;  %1851 = vmatmul.f32.gmra.mxu2 %v5191_v30  ;;  %v2030_v38 = vsub.f32 %v5484_v5, %v7333_v37  ;;  %v5556_v20 = vpop.f32.mrf.mxu1  ;;  %v139_v37 = vld [vmem:[%s7066_s1 + $0x2f8] sm:$0xff]  ;;  %v2025_v14 = vand.u32 4294901760, %v2024_v56  ;;  %7338 = vst [vmem:[#allocation45_spill] sm:$0xff] %v5576_v58  ;;  %v24_v56 = vld [vmem:[%s7065_s0 + $0x60] sm:$0xff] }
 0x103   :  { %7334 = vst [vmem:[#allocation42_spill] sm:$0xff] %v5556_v20  ;;  %2014 = vmatpush.msra.mxu1 %v2013_v48  ;;  %2112 = vmatpush.msra.mxu2 %v5468_v17  ;;  %v5563_v18 = vpop.f32.mrf.mxu0  ;;  %v5570_v20 = vpop.f32.mrf.mxu2  ;;  %v7337_v48 = vand.u32 4294901760, %v5510_v1 }
 0x104   :  { %7335 = vst [vmem:[#allocation43_spill] sm:$0xff] %v5563_v18  ;;  %2170 = vmatpush.msra.mxu3 %v5419_v24  ;;  %1929 = vmatpush.msra.mxu0 %v5476_v49  ;;  %v2031_v28 = vand.u32 4294901760, %v2030_v38  ;;  %v7339_v18 = vand.u32 4294901760, %v5211_v6  ;;  %v2042_v38 = vsub.f32 %v5526_v45, %v7340_v9 }
 0x105   :  { %7336 = vst [vmem:[#allocation44_spill] sm:$0xff] %v5570_v20  ;;  %1900 = vmatmul.f32.gmra.mxu3 %v5191_v30  ;;  %2020 = vmatpush.msra.mxu1 %v2019_v34  ;;  %v2036_v19 = vsub.f32 %v5510_v1, %v7337_v48  ;;  %v5586_v34 = vsub.f32 %v109_v11, %v5551_v23  ;;  %v5588_v20 = vand.u32 4294901760, %v139_v37  ;;  %v138_v48 = vld [vmem:[%s7066_s1 + $0x2f0] sm:$0xff]  ;;  %v5603_v30 = vand.u32 4294901760, %v24_v56 }
 0x106   :  { %2115 = vmatpush.msra.mxu2 %v5484_v5  ;;  %2172 = vmatpush.msra.mxu3 %v5442_v46  ;;  %v5599_v25 = vpop.f32.mrf.mxu3  ;;  %v7343_v11 = vand.u32 4294901760, %v5549_v7 }
 0x107   :  { %1931 = vmatpush.msra.mxu0 %v5495_v40  ;;  %1768 = vmatmul.f32.gmra.mxu1 %v7339_v18  ;;  %7341 = vst [vmem:[#allocation46_spill] sm:$0xff] %v5599_v25  ;;  %v2037_v6 = vand.u32 4294901760, %v2036_v19  ;;  %v7342_v18 = vand.u32 4294901760, %v5541_v35  ;;  %v5614_v25 = vsub.f32 %v108_v44, %v5576_v58  ;;  %v5624_v19 = vsub.f32 %v139_v37, %v5588_v20 }
 0x108   :  { %1717 = vmatmul.f32.gmra.mxu0 %v5254_v13  ;;  %2026 = vmatpush.msra.mxu1 %v2025_v14  ;;  %v5616_v14 = vand.u32 4294901760, %v138_v48  ;;  %v2048_v50 = vsub.f32 %v5549_v7, %v7343_v11  ;;  %v2043_v44 = vand.u32 4294901760, %v2042_v38  ;;  %v7344_v11 = vand.u32 4294901760, %v5568_v32 }
 0x109   :  { %2118 = vmatpush.msra.mxu2 %v5510_v1  ;;  %2174 = vmatpush.msra.mxu3 %v5454_v33  ;;  %v1943_v9 = vsub.f32 %v5541_v35, %v7342_v18  ;;  %v5628_v18 = vand.u32 4294901760, %v137_v3  ;;  %v5639_v57 = vsub.f32 %v24_v56, %v5603_v30  ;;  %v7354_v29 = vand.u32 4294901760, %v5624_v19 }
 0x10a   :  { %1933 = vmatpush.msra.mxu0 %v5520_v22  ;;  %2032 = vmatpush.msra.mxu1 %v2031_v28  ;;  %v136_v28 = vld [vmem:[%s7066_s1 + $0x2e0] sm:$0xff]  ;;  %v2054_v37 = vsub.f32 %v5568_v32, %v7344_v11  ;;  %v5646_v4 = vsub.f32 %v138_v48, %v5616_v14  ;;  %v2049_v56 = vand.u32 4294901760, %v2048_v50 }
 0x10b   :  { %2121 = vmatpush.msra.mxu2 %v5526_v45  ;;  %2176 = vmatpush.msra.mxu3 %v5476_v49  ;;  %v1944_v38 = vand.u32 4294901760, %v1943_v9  ;;  %v5659_v53 = vand.u32 4294901760, %v136_v28  ;;  %v32_v50 = vld [vmem:[%s7065_s0 + $0xa0] sm:$0xff]  ;;  %v2410_v63 = vsub.f32 %v5624_v19, %v7354_v29  ;;  %v7356_v29 = vand.u32 4294901760, %v5639_v57 }
 0x10c   :  { %1935 = vmatpush.msra.mxu0 %v5535_v26  ;;  %1855 = vmatmul.f32.gmra.mxu2 %v5232_v8  ;;  %v5641_v39 = vpop.f32.mrf.mxu1 }
 0x10d   :  { %7345 = vst [vmem:[#allocation47_spill] sm:$0xff] %v5641_v39  ;;  %2038 = vmatpush.msra.mxu1 %v2037_v6  ;;  %2124 = vmatpush.msra.mxu2 %v5549_v7  ;;  %v5651_v59 = vpop.f32.mrf.mxu0  ;;  %v7347_v6 = vand.u32 4294901760, %v5586_v34  ;;  %v5661_v48 = vpop.f32.mrf.mxu2  ;;  %v5665_v39 = vsub.f32 %v137_v3, %v5628_v18  ;;  %v7351_v3 = vand.u32 4294901760, %v5254_v13  ;;  %v5691_v36 = vsub.f32 %v136_v28, %v5659_v53 }
 0x10e   :  { %7346 = vst [vmem:[#allocation48_spill] sm:$0xff] %v5651_v59  ;;  %2178 = vmatpush.msra.mxu3 %v5495_v40  ;;  %1937 = vmatpush.msra.mxu0 %v5551_v23  ;;  %v5673_v59 = vand.u32 4294901760, %v135_v42  ;;  %v5693_v13 = vand.u32 4294901760, %v32_v50  ;;  %v1951_v28 = vsub.f32 %v5639_v57, %v7356_v29 }
 0x10f   :  { %v2060_v9 = vsub.f32 %v5586_v34, %v7347_v6  ;;  %7348 = vst [vmem:[#allocation49_spill] sm:$0xff] %v5661_v48  ;;  %1904 = vmatmul.f32.gmra.mxu3 %v5232_v8  ;;  %2044 = vmatpush.msra.mxu1 %v2043_v44  ;;  %v2055_v6 = vand.u32 4294901760, %v2054_v37  ;;  %v134_v8 = vld [vmem:[%s7066_s1 + $0x2d0] sm:$0xff]  ;;  %v7352_v44 = vand.u32 4294901760, %v5614_v25 }
 0x110   :  { %7349 = vst [vmem:[#allocation50_spill] sm:$0xff] %v5665_v39  ;;  %2127 = vmatpush.msra.mxu2 %v5568_v32  ;;  %2180 = vmatpush.msra.mxu3 %v5520_v22  ;;  %v5685_v37 = vpop.f32.mrf.mxu3  ;;  %v5725_v29 = vsub.f32 %v32_v50, %v5693_v13  ;;  %v7362_v50 = vand.u32 4294901760, %v5355_v60  ;;  %v40_v60 = vld [vmem:[%s7065_s0 + $0xe0] sm:$0xff] }
 0x111   :  { %7350 = vst [vmem:[#allocation51_spill] sm:$0xff] %v5673_v59  ;;  %1939 = vmatpush.msra.mxu0 %v5576_v58  ;;  %1774 = vmatmul.f32.gmra.mxu1 %v7351_v3  ;;  %v2066_v48 = vsub.f32 %v5614_v25, %v7352_v44  ;;  %v2061_v11 = vand.u32 4294901760, %v2060_v9  ;;  %v133_v3 = vld [vmem:[%s7066_s1 + $0x2c8] sm:$0xff]  ;;  %v7355_v9 = vand.u32 4294901760, %v5320_v54  ;;  %v5709_v44 = vsub.f32 %v135_v42, %v5673_v59  ;;  %v132_v54 = vld [vmem:[%s7066_s1 + $0x2c0] sm:$0xff] }
 0x112   :  { %7353 = vst [vmem:[#allocation52_spill] sm:$0xff] %v5685_v37  ;;  %1945 = vmatmul.f32.vlgmr.msra.gmra.mxu0 %v1944_v38  ;;  %2050 = vmatpush.msra.mxu1 %v2049_v56  ;;  %v5701_v56 = vand.u32 4294901760, %v134_v8  ;;  %v7357_v38 = vand.u32 4294901760, %v5646_v4  ;;  %v5716_v27 = vand.u32 4294901760, %v133_v3  ;;  %v2411_v42 = vand.u32 4294901760, %v2410_v63  ;;  %v131_v63 = vld [vmem:[%s7066_s1 + $0x2b8] sm:$0xff] }
 0x113   :  { %2130 = vmatpush.msra.mxu2 %v5586_v34  ;;  %2182 = vmatpush.msra.mxu3 %v5535_v26  ;;  %v2067_v47 = vand.u32 4294901760, %v2066_v48 }
 0x114   :  { %2215 = vmatpush.msrb.mxu0 %v7355_v9  ;;  %2056 = vmatpush.msra.mxu1 %v2055_v6  ;;  %v2416_v37 = vsub.f32 %v5646_v4, %v7357_v38  ;;  %v7358_v6 = vand.u32 4294901760, %v5337_v2  ;;  %v7360_v38 = vand.u32 4294901760, %v5665_v39  ;;  %v5735_v2 = vsub.f32 %v134_v8, %v5701_v56 }
 0x115   :  { %2133 = vmatpush.msra.mxu2 %v5614_v25  ;;  %2184 = vmatpush.msra.mxu3 %v5551_v23  ;;  %v7364_v8 = vand.u32 4294901760, %v5541_v35  ;;  %v5763_v9 = vand.u32 4294901760, %v131_v63 }
 0x116   :  { %2219 = vmatpush.msrb.mxu0 %v7358_v6  ;;  %2062 = vmatpush.msra.mxu1 %v2061_v11  ;;  %v5727_v48 = vpop.f32.mrf.mxu1  ;;  %v2422_v43 = vsub.f32 %v5665_v39, %v7360_v38  ;;  %v1952_v6 = vand.u32 4294901760, %v1951_v28  ;;  %v5753_v39 = vsub.f32 %v133_v3, %v5716_v27  ;;  %v7366_v28 = vand.u32 4294901760, %v5691_v36 }
 0x117   :  { %7359 = vst [vmem:[#allocation53_spill] sm:$0xff] %v5727_v48  ;;  %2136 = vmatmul.f32.vlgmr.msra.gmra.mxu2 %v5541_v35  ;;  %2186 = vmatpush.msra.mxu3 %v5576_v58  ;;  %v5740_v11 = vpop.f32.mrf.mxu0  ;;  %v5746_v48 = vand.u32 4294901760, %v132_v54  ;;  %v5748_v38 = vpop.f32.mrf.mxu2  ;;  %v2417_v58 = vand.u32 4294901760, %v2416_v37  ;;  %v130_v35 = vld [vmem:[%s7066_s1 + $0x2b0] sm:$0xff]  ;;  %v7367_v37 = vand.u32 4294901760, %v5371_v61 }
 0x118   :  { %7361 = vst [vmem:[#allocation54_spill] sm:$0xff] %v5740_v11  ;;  %2343 = vmatpush.msrb.mxu2 %v5588_v20  ;;  %2223 = vmatpush.msrb.mxu0 %v7362_v50  ;;  %v2428_v50 = vsub.f32 %v5691_v36, %v7366_v28  ;;  %v2423_v3 = vand.u32 4294901760, %v2422_v43  ;;  %v7369_v28 = vand.u32 4294901760, %v5709_v44  ;;  %v5781_v11 = vand.u32 4294901760, %v40_v60  ;;  %v129_v43 = vld [vmem:[%s7066_s1 + $0x2a8] sm:$0xff] }
 0x119   :  { %7363 = vst [vmem:[#allocation55_spill] sm:$0xff] %v5748_v38  ;;  %2068 = vmatpush.msra.mxu1 %v2067_v47  ;;  %2190 = vmatmul.f32.vlgmr.msra.gmra.mxu3 %v7364_v8  ;;  %v5779_v38 = vsub.f32 %v132_v54, %v5746_v48 }
 0x11a   :  { %7365 = vst [vmem:[#allocation56_spill] sm:$0xff] %v5753_v39  ;;  %2345 = vmatpush.msrb.mxu2 %v5616_v14  ;;  %2412 = vmatpush.msrb.mxu3 %v2411_v42  ;;  %v5772_v8 = vpop.f32.mrf.mxu3  ;;  %v2434_v47 = vsub.f32 %v5709_v44, %v7369_v28  ;;  %v2429_v54 = vand.u32 4294901760, %v2428_v50  ;;  %v5797_v42 = vsub.f32 %v131_v63, %v5763_v9 }
 0x11b   :  { %2227 = vmatpush.msrb.mxu0 %v7367_v37  ;;  %2070 = vmatmul.f32.vlgmr.msra.gmra.mxu1 %v5515_v31  ;;  %7368 = vst [vmem:[#allocation57_spill] sm:$0xff] %v5772_v8  ;;  %v7371_v37 = vand.u32 4294901760, %v5725_v29  ;;  %v5803_v8 = vand.u32 4294901760, %v129_v43 }
 0x11c   :  { %1953 = vmatmul.f32.gmra.mxu0 %v1952_v6  ;;  %2294 = vmatpush.msrb.mxu1 %v5303_v0  ;;  %v5788_v6 = vand.u32 4294901760, %v130_v35  ;;  %v7370_v0 = vand.u32 4294901760, %v5393_v15  ;;  %v7373_v15 = vand.u32 4294901760, %v5410_v21  ;;  %v2435_v63 = vand.u32 4294901760, %v2434_v47  ;;  %v127_v47 = vld [vmem:[%s7066_s1 + $0x298] sm:$0xff] }
 0x11d   :  { %2347 = vmatpush.msrb.mxu2 %v5628_v18  ;;  %2418 = vmatpush.msrb.mxu3 %v2417_v58  ;;  %v1959_v28 = vsub.f32 %v5725_v29, %v7371_v37  ;;  %v7372_v58 = vand.u32 4294901760, %v5735_v2  ;;  %v7375_v37 = vand.u32 4294901760, %v5753_v39  ;;  %v7142_v50 = vand.u32 4294901760, %v5797_v42 }
 0x11e   :  { %2231 = vmatpush.msrb.mxu0 %v7370_v0  ;;  %2296 = vmatpush.msrb.mxu1 %v5310_v10  ;;  %v128_v10 = vld [vmem:[%s7066_s1 + $0x2a0] sm:$0xff]  ;;  %v5823_v21 = vsub.f32 %v130_v35, %v5788_v6  ;;  %v7379_v35 = vand.u32 4294901760, %v5639_v57 }
 0x11f   :  { %2349 = vmatpush.msrb.mxu2 %v5659_v53  ;;  %2424 = vmatpush.msrb.mxu3 %v2423_v3  ;;  %v2440_v61 = vsub.f32 %v5735_v2, %v7372_v58  ;;  %v5813_v3 = vsub.f32 %v40_v60, %v5781_v11  ;;  %v2446_v58 = vsub.f32 %v5753_v39, %v7375_v37  ;;  %v7377_v60 = vand.u32 4294901760, %v5434_v12 }
 0x120   :  { %2235 = vmatpush.msrb.mxu0 %v7373_v15  ;;  %2141 = vmatmul.f32.gmra.mxu2 %v5639_v57  ;;  %v5815_v0 = vpop.f32.mrf.mxu1  ;;  %v5841_v39 = vsub.f32 %v129_v43, %v5803_v8  ;;  %v7380_v12 = vand.u32 4294901760, %v5779_v38  ;;  %v126_v57 = vld [vmem:[%s7066_s1 + $0x290] sm:$0xff] }
 0x121   :  { %7374 = vst [vmem:[#allocation58_spill] sm:$0xff] %v5815_v0  ;;  %2298 = vmatpush.msrb.mxu1 %v5330_v52  ;;  %2351 = vmatpush.msrb.mxu2 %v5673_v59  ;;  %v5828_v15 = vpop.f32.mrf.mxu0  ;;  %v1960_v52 = vand.u32 4294901760, %v1959_v28  ;;  %v5833_v0 = vand.u32 4294901760, %v128_v10  ;;  %v2441_v37 = vand.u32 4294901760, %v2440_v61  ;;  %v7143_v28 = vand.u32 4294901760, %v5813_v3 }
 0x122   :  { %7376 = vst [vmem:[#allocation59_spill] sm:$0xff] %v5828_v15  ;;  %2430 = vmatpush.msrb.mxu3 %v2429_v54  ;;  %2239 = vmatpush.msrb.mxu0 %v7377_v60  ;;  %v5835_v59 = vpop.f32.mrf.mxu2  ;;  %v2452_v54 = vsub.f32 %v5779_v38, %v7380_v12  ;;  %v5848_v60 = vand.u32 4294901760, %v127_v47  ;;  %v2447_v43 = vand.u32 4294901760, %v2446_v58  ;;  %v7144_v61 = vand.u32 4294901760, %v5823_v21  ;;  %v17_v58 = vld [vmem:[%s7065_s0 + $0x28] sm:$0xff] }
 0x123   :  { %7378 = vst [vmem:[#allocation60_spill] sm:$0xff] %v5835_v59  ;;  %2196 = vmatmul.f32.gmra.mxu3 %v7379_v35  ;;  %2300 = vmatpush.msrb.mxu1 %v5343_v16  ;;  %v7381_v16 = vand.u32 4294901760, %v5448_v51  ;;  %v2458_v35 = vsub.f32 %v5797_v42, %v7142_v50  ;;  %v5864_v12 = vsub.f32 %v128_v10, %v5833_v0  ;;  %v125_v51 = vld [vmem:[%s7066_s1 + $0x288] sm:$0xff] }
 0x124   :  { %2353 = vmatpush.msrb.mxu2 %v5701_v56  ;;  %2436 = vmatpush.msrb.mxu3 %v2435_v63  ;;  %v5857_v63 = vpop.f32.mrf.mxu3  ;;  %v1967_v10 = vsub.f32 %v5813_v3, %v7143_v28  ;;  %v5880_v50 = vsub.f32 %v127_v47, %v5848_v60  ;;  %v7384_v47 = vand.u32 4294901760, %v5484_v5 }
 0x125   :  { %2243 = vmatpush.msrb.mxu0 %v7381_v16  ;;  %2074 = vmatmul.f32.gmra.mxu1 %v5603_v30  ;;  %7382 = vst [vmem:[#allocation61_spill] sm:$0xff] %v5857_v63  ;;  %v5871_v16 = vand.u32 4294901760, %v126_v57 }
 0x126   :  { %1961 = vmatmul.f32.gmra.mxu0 %v1960_v52  ;;  %2302 = vmatpush.msrb.mxu1 %v5364_v62  ;;  %v7383_v62 = vand.u32 4294901760, %v5468_v17  ;;  %v2453_v52 = vand.u32 4294901760, %v2452_v54  ;;  %v5892_v17 = vand.u32 4294901760, %v125_v51  ;;  %v2459_v54 = vand.u32 4294901760, %v2458_v35 }
 0x127   :  { %2355 = vmatpush.msrb.mxu2 %v5716_v27  ;;  %2442 = vmatpush.msrb.mxu3 %v2441_v37  ;;  %v124_v37 = vld [vmem:[%s7066_s1 + $0x280] sm:$0xff]  ;;  %v5906_v15 = vsub.f32 %v126_v57, %v5871_v16 }
 0x128   :  { %2247 = vmatpush.msrb.mxu0 %v7383_v62  ;;  %2304 = vmatpush.msrb.mxu1 %v5378_v55  ;;  %v2464_v55 = vsub.f32 %v5823_v21, %v7144_v61  ;;  %v5908_v5 = vand.u32 4294901760, %v124_v37  ;;  %v7387_v62 = vand.u32 4294901760, %v5510_v1  ;;  %v5923_v59 = vsub.f32 %v125_v51, %v5892_v17 }
 0x129   :  { %2357 = vmatpush.msrb.mxu2 %v5746_v48  ;;  %2448 = vmatpush.msrb.mxu3 %v2447_v43  ;;  %v7386_v43 = vand.u32 4294901760, %v5841_v39  ;;  %v7389_v1 = vand.u32 4294901760, %v5864_v12 }
 0x12a   :  { %2251 = vmatpush.msrb.mxu0 %v7384_v47  ;;  %2146 = vmatmul.f32.gmra.mxu2 %v5725_v29  ;;  %v5898_v28 = vpop.f32.mrf.mxu1  ;;  %v5910_v47 = vand.u32 4294901760, %v17_v58  ;;  %v2465_v57 = vand.u32 4294901760, %v2464_v55  ;;  %v5937_v51 = vsub.f32 %v124_v37, %v5908_v5  ;;  %v7391_v37 = vand.u32 4294901760, %v5549_v7 }
 0x12b   :  { %7385 = vst [vmem:[#allocation62_spill] sm:$0xff] %v5898_v28  ;;  %2306 = vmatpush.msrb.mxu1 %v5402_v41  ;;  %2359 = vmatpush.msrb.mxu2 %v5763_v9  ;;  %v2470_v61 = vsub.f32 %v5841_v39, %v7386_v43  ;;  %v5912_v35 = vpop.f32.mrf.mxu0  ;;  %v1968_v41 = vand.u32 4294901760, %v1967_v10  ;;  %v2481_v28 = vand.u32 4294901760, %v5880_v50  ;;  %v5917_v63 = vpop.f32.mrf.mxu2  ;;  %v7388_v43 = vand.u32 4294901760, %v5725_v29 }
 0x12c   :  { %2454 = vmatpush.msrb.mxu3 %v2453_v52  ;;  %2255 = vmatpush.msrb.mxu0 %v7387_v62  ;;  %v2476_v52 = vsub.f32 %v5864_v12, %v7389_v1  ;;  %v7390_v10 = vand.u32 4294901760, %v5526_v45  ;;  %v2487_v62 = vand.u32 4294901760, %v5906_v15 }
 0x12d   :  { %2202 = vmatmul.f32.gmra.mxu3 %v7388_v43  ;;  %2308 = vmatpush.msrb.mxu1 %v5419_v24  ;;  %v2471_v29 = vand.u32 4294901760, %v2470_v61  ;;  %v5934_v24 = vsub.f32 %v17_v58, %v5910_v47  ;;  %v2482_v45 = vsub.f32 %v5880_v50, %v2481_v28  ;;  %v2493_v61 = vand.u32 4294901760, %v5923_v59  ;;  %v25_v58 = vld [vmem:[%s7065_s0 + $0x68] sm:$0xff] }
 0x12e   :  { %2361 = vmatpush.msrb.mxu2 %v5788_v6  ;;  %2460 = vmatpush.msrb.mxu3 %v2459_v54  ;;  %v5939_v55 = vpop.f32.mrf.mxu3  ;;  %v2477_v54 = vand.u32 4294901760, %v2476_v52  ;;  %v2499_v43 = vand.u32 4294901760, %v5937_v51  ;;  %v5962_v1 = vand.u32 4294901760, %v25_v58 }
 0x12f   :  { %2259 = vmatpush.msrb.mxu0 %v7390_v10  ;;  %2078 = vmatmul.f32.gmra.mxu1 %v5693_v13  ;;  %v2483_v7 = vand.u32 4294901760, %v2482_v45  ;;  %v2494_v52 = vsub.f32 %v5923_v59, %v2493_v61  ;;  %v7394_v45 = vand.u32 4294901760, %v5813_v3 }
 0x130   :  { %1969 = vmatmul.f32.gmra.mxu0 %v1968_v41  ;;  %2310 = vmatpush.msrb.mxu1 %v5442_v46  ;;  %v2488_v46 = vsub.f32 %v5906_v15, %v2487_v62  ;;  %v7150_v41 = vand.u32 4294901760, %v5934_v24 }
 0x131   :  { %2363 = vmatpush.msrb.mxu2 %v5803_v8  ;;  %2466 = vmatpush.msrb.mxu3 %v2465_v57  ;;  %v7392_v57 = vand.u32 4294901760, %v5568_v32  ;;  %v7393_v32 = vand.u32 4294901760, %v5586_v34  ;;  %v5988_v34 = vsub.f32 %v25_v58, %v5962_v1  ;;  %v33_v58 = vld [vmem:[%s7065_s0 + $0xa8] sm:$0xff] }
 0x132   :  { %2263 = vmatpush.msrb.mxu0 %v7391_v37  ;;  %2312 = vmatpush.msrb.mxu1 %v5454_v33  ;;  %v2377_v37 = vsub.f32 %v5934_v24, %v7150_v41 }
 0x133   :  { %2365 = vmatpush.msrb.mxu2 %v5833_v0  ;;  %2472 = vmatpush.msrb.mxu3 %v2471_v29 }
 0x134   :  { %2267 = vmatpush.msrb.mxu0 %v7392_v57  ;;  %2151 = vmatmul.f32.gmra.mxu2 %v5813_v3  ;;  %v5964_v33 = vpop.f32.mrf.mxu1  ;;  %v2500_v57 = vsub.f32 %v5937_v51, %v2499_v43  ;;  %v7395_v3 = vand.u32 4294901760, %v5614_v25  ;;  %v7147_v25 = vand.u32 4294901760, %v5988_v34 }
 0x135   :  { %2314 = vmatpush.msrb.mxu1 %v5476_v49  ;;  %2367 = vmatpush.msrb.mxu2 %v5848_v60  ;;  %v5971_v10 = vpop.f32.mrf.mxu0  ;;  %v5975_v29 = vpop.f32.mrf.mxu2  ;;  %v2489_v49 = vand.u32 4294901760, %v2488_v46  ;;  %v2378_v46 = vand.u32 4294901760, %v2377_v37 }
 0x136   :  { %2478 = vmatpush.msrb.mxu3 %v2477_v54  ;;  %2271 = vmatpush.msrb.mxu0 %v7393_v32 }
 0x137   :  { %2208 = vmatmul.f32.gmra.mxu3 %v7394_v45  ;;  %2316 = vmatpush.msrb.mxu1 %v5495_v40  ;;  %v2495_v40 = vand.u32 4294901760, %v2494_v52  ;;  %v7396_v45 = vand.u32 4294901760, %v5624_v19 }
 0x138   :  { %2369 = vmatpush.msrb.mxu2 %v5871_v16  ;;  %2484 = vmatpush.msrb.mxu3 %v2483_v7  ;;  %v5993_v54 = vpop.f32.mrf.mxu3  ;;  %v2501_v7 = vand.u32 4294901760, %v2500_v57  ;;  %v7399_v57 = vand.u32 4294901760, %v5646_v4 }
 0x139   :  { %2275 = vmatpush.msrb.mxu0 %v7395_v3  ;;  %2082 = vmatmul.f32.gmra.mxu1 %v5781_v11 }
 0x13a   :  { %2277 = vmatmul.f32.vlgmr.msrb.gmra.mxu0 %v5515_v31  ;;  %2318 = vmatpush.msrb.mxu1 %v5520_v22  ;;  %v6007_v22 = vand.u32 4294901760, %v33_v58 }
 0x13b   :  { %2371 = vmatpush.msrb.mxu2 %v5892_v17  ;;  %2490 = vmatpush.msrb.mxu3 %v2489_v49  ;;  %v2385_v49 = vsub.f32 %v5988_v34, %v7147_v25 }
 0x13c   :  { %2522 = vmatpush.msra.mxu0 %v5624_v19  ;;  %2320 = vmatpush.msrb.mxu1 %v5535_v26  ;;  %v7397_v26 = vld [vmem:[#allocation50_spill] sm:$0xff]  ;;  %v6027_v19 = vsub.f32 %v33_v58, %v6007_v22 }
 0x13d   :  { %2373 = vmatpush.msrb.mxu2 %v5908_v5  ;;  %2496 = vmatpush.msrb.mxu3 %v2495_v40  ;;  %v2386_v40 = vand.u32 4294901760, %v2385_v49 }
 0x13e   :  { %2525 = vmatpush.msra.mxu0 %v5646_v4  ;;  %2322 = vmatpush.msrb.mxu1 %v5551_v23  ;;  %v6009_v52 = vpop.f32.mrf.mxu1  ;;  %v7398_v23 = vld [vmem:[#allocation45_spill] sm:$0xff]  ;;  %v41_v4 = vld [vmem:[%s7065_s0 + $0xe8] sm:$0xff] }
 0x13f   :  { %2379 = vmatmul.f32.vlgmr.msrb.gmra.mxu2 %v2378_v46  ;;  %2502 = vmatpush.msrb.mxu3 %v2501_v7  ;;  %v6011_v32 = vpop.f32.mrf.mxu0  ;;  %v6019_v37 = vpop.f32.mrf.mxu2  ;;  %v7401_v46 = vand.u32 4294901760, %v7397_v26  ;;  %v7402_v7 = vand.u32 4294901760, %v5691_v36 }
 0x140   :  { %2649 = vmatpush.msra.mxu2 %v7396_v45  ;;  %2528 = vmatpush.msra.mxu0 %v7397_v26  ;;  %v7403_v45 = vand.u32 4294901760, %v5709_v44 }
 0x141   :  { %2324 = vmatpush.msrb.mxu1 %v7398_v23  ;;  %2504 = vmatmul.f32.vlgmr.msrb.gmra.mxu3 %v5910_v47 }
 0x142   :  { %2653 = vmatpush.msra.mxu2 %v7399_v57  ;;  %2728 = vmatpush.msra.mxu3 %v5588_v20  ;;  %v6031_v3 = vpop.f32.mrf.mxu3 }
 0x143   :  { %2531 = vmatpush.msra.mxu0 %v5691_v36  ;;  %2326 = vmatmul.f32.vlgmr.msrb.gmra.mxu1 %v5515_v31  ;;  %7400 = vst [vmem:[#allocation50_spill] sm:$0xff] %v6031_v3  ;;  %v7146_v31 = vand.u32 4294901760, %v6027_v19  ;;  %v7404_v36 = vld [vmem:[#allocation56_spill] sm:$0xff] }
 0x144   :  { %2281 = vmatmul.f32.gmra.mxu0 %v5603_v30  ;;  %2590 = vmatpush.msra.mxu1 %v5588_v20  ;;  %v6048_v20 = vand.u32 4294901760, %v41_v4 }
 0x145   :  { %2657 = vmatpush.msra.mxu2 %v7401_v46  ;;  %2730 = vmatpush.msra.mxu3 %v5616_v14  ;;  %v2393_v26 = vsub.f32 %v6027_v19, %v7146_v31  ;;  %v7408_v46 = vld [vmem:[#allocation10_spill] sm:$0xff] }
 0x146   :  { %2534 = vmatpush.msra.mxu0 %v5709_v44  ;;  %2592 = vmatpush.msra.mxu1 %v5616_v14  ;;  %v7406_v44 = vld [vmem:[#allocation51_spill] sm:$0xff]  ;;  %v6070_v23 = vsub.f32 %v41_v4, %v6048_v20  ;;  %v7410_v4 = vand.u32 4294901760, %v5779_v38 }
 0x147   :  { %2661 = vmatpush.msra.mxu2 %v7402_v7  ;;  %2732 = vmatpush.msra.mxu3 %v5628_v18  ;;  %v7409_v7 = vand.u32 4294901760, %v7404_v36 }
 0x148   :  { %2537 = vmatpush.msra.mxu0 %v5735_v2  ;;  %2387 = vmatmul.f32.gmra.mxu2 %v2386_v40  ;;  %v6050_v58 = vpop.f32.mrf.mxu1  ;;  %v2394_v40 = vand.u32 4294901760, %v2393_v26 }
 0x149   :  { %2594 = vmatpush.msra.mxu1 %v5628_v18  ;;  %2665 = vmatpush.msra.mxu2 %v7403_v45  ;;  %v6055_v14 = vpop.f32.mrf.mxu0  ;;  %v7405_v18 = vand.u32 4294901760, %v5735_v2 }
 0x14a   :  { %2734 = vmatpush.msra.mxu3 %v5659_v53  ;;  %2540 = vmatpush.msra.mxu0 %v7404_v36  ;;  %v6062_v49 = vpop.f32.mrf.mxu2  ;;  %v7411_v36 = vld [vmem:[#allocation12_spill] sm:$0xff] }
 0x14b   :  { %2508 = vmatmul.f32.gmra.mxu3 %v5962_v1  ;;  %2596 = vmatpush.msra.mxu1 %v5659_v53  ;;  %v7407_v53 = vld [vmem:[#allocation8_spill] sm:$0xff] }
 0x14c   :  { %2669 = vmatpush.msra.mxu2 %v7405_v18  ;;  %2736 = vmatpush.msra.mxu3 %v7406_v44  ;;  %v6074_v57 = vpop.f32.mrf.mxu3  ;;  %v336_v2 = vadd.f32 %v7408_v46, %v7407_v53  ;;  %v7412_v18 = vand.u32 4294901760, %v5797_v42  ;;  %v154_v46 = vld [vmem:[%s7066_s1 + $0x370] sm:$0xff] }
 0x14d   :  { %2543 = vmatpush.msra.mxu0 %v5779_v38  ;;  %2330 = vmatmul.f32.gmra.mxu1 %v5603_v30  ;;  %v7145_v30 = vand.u32 4294901760, %v6070_v23 }
 0x14e   :  { %2285 = vmatmul.f32.gmra.mxu0 %v5693_v13  ;;  %2598 = vmatpush.msra.mxu1 %v7406_v44  ;;  %v402_v26 = vadd.f32 %v7411_v36, %v336_v2 }
 0x14f   :  { %2673 = vmatpush.msra.mxu2 %v7409_v7  ;;  %2738 = vmatpush.msra.mxu3 %v5701_v56  ;;  %v2401_v38 = vsub.f32 %v6070_v23, %v7145_v30  ;;  %v7417_v7 = vld [vmem:[#allocation11_spill] sm:$0xff] }
 0x150   :  { %2546 = vmatpush.msra.mxu0 %v5797_v42  ;;  %2600 = vmatpush.msra.mxu1 %v5701_v56  ;;  %v7413_v42 = vand.u32 4294901760, %v5823_v21 }
 0x151   :  { %2677 = vmatpush.msra.mxu2 %v7410_v4  ;;  %2740 = vmatpush.msra.mxu3 %v5716_v27  ;;  %v7418_v4 = vld [vmem:[#allocation14_spill] sm:$0xff] }
 0x152   :  { %2549 = vmatpush.msra.mxu0 %v5823_v21  ;;  %2395 = vmatmul.f32.gmra.mxu2 %v2394_v40  ;;  %v6090_v45 = vpop.f32.mrf.mxu1  ;;  %v7414_v40 = vld [vmem:[#allocation13_spill] sm:$0xff]  ;;  %v2402_v21 = vand.u32 4294901760, %v2401_v38  ;;  %v340_v36 = vadd.f32 %v7418_v4, %v7417_v7  ;;  %v7422_v38 = vld [vmem:[#allocation6_spill] sm:$0xff]  ;;  %v7423_v7 = vand.u32 4294901760, %v5864_v12  ;;  %v7425_v4 = vld [vmem:[#allocation16_spill] sm:$0xff] }
 0x153   :  { %2602 = vmatpush.msra.mxu1 %v5716_v27  ;;  %2681 = vmatpush.msra.mxu2 %v7412_v18  ;;  %v6096_v56 = vpop.f32.mrf.mxu0  ;;  %v6103_v44 = vpop.f32.mrf.mxu2  ;;  %v155_v27 = vld [vmem:[%s7066_s1 + $0x378] sm:$0xff]  ;;  %v456_v53 = vadd.f32 %v7414_v40, %v402_v26  ;;  %v7419_v26 = vld [vmem:[#allocation23_spill] sm:$0xff] }
 0x154   :  { %2742 = vmatpush.msra.mxu3 %v5746_v48  ;;  %2552 = vmatpush.msra.mxu0 %v5841_v39  ;;  %v6123_v2 = vand.u32 4294901760, %v155_v27 }
 0x155   :  { %2512 = vmatmul.f32.gmra.mxu3 %v6007_v22  ;;  %2604 = vmatpush.msra.mxu1 %v5746_v48  ;;  %v543_v18 = vadd.f32 %v7419_v26, %v456_v53  ;;  %v407_v26 = vadd.f32 %v7425_v4, %v340_v36 }
 0x156   :  { %2685 = vmatpush.msra.mxu2 %v7413_v42  ;;  %2744 = vmatpush.msra.mxu3 %v5763_v9  ;;  %v6119_v48 = vpop.f32.mrf.mxu3  ;;  %7416 = vst [vmem:[#allocation56_spill] sm:$0xff] %v6123_v2  ;;  %v6133_v42 = vand.u32 4294901760, %v154_v46 }
 0x157   :  { %2555 = vmatpush.msra.mxu0 %v5864_v12  ;;  %2334 = vmatmul.f32.gmra.mxu1 %v5693_v13  ;;  %7415 = vst [vmem:[#allocation45_spill] sm:$0xff] %v6119_v48  ;;  %v7420_v13 = vand.u32 4294901760, %v5841_v39  ;;  %v592_v40 = vadd.f32 %v7422_v38, %v543_v18  ;;  %v6144_v39 = vsub.f32 %v155_v27, %v6123_v2  ;;  %v7426_v18 = vld [vmem:[#allocation15_spill] sm:$0xff] }
 0x158   :  { %2289 = vmatmul.f32.gmra.mxu0 %v5781_v11  ;;  %2606 = vmatpush.msra.mxu1 %v5763_v9  ;;  %7421 = vst [vmem:[#allocation51_spill] sm:$0xff] %v6133_v42  ;;  %v153_v9 = vld [vmem:[%s7066_s1 + $0x368] sm:$0xff]  ;;  %v7430_v38 = vld [vmem:[#allocation19_spill] sm:$0xff]  ;;  %v6166_v36 = vsub.f32 %v154_v46, %v6133_v42 }
 0x159   :  { %2689 = vmatpush.msra.mxu2 %v7420_v13  ;;  %2746 = vmatpush.msra.mxu3 %v5788_v6  ;;  %v7427_v13 = vld [vmem:[#allocation18_spill] sm:$0xff]  ;;  %v7148_v46 = vand.u32 4294901760, %v6144_v39 }
 0x15a   :  { %2558 = vmatpush.msra.mxu0 %v5880_v50  ;;  %2608 = vmatpush.msra.mxu1 %v5788_v6  ;;  %v152_v6 = vld [vmem:[%s7066_s1 + $0x360] sm:$0xff]  ;;  %v344_v12 = vadd.f32 %v7427_v13, %v7426_v18 }
 0x15b   :  { %2693 = vmatpush.msra.mxu2 %v7423_v7  ;;  %2748 = vmatpush.msra.mxu3 %v5803_v8  ;;  %v7431_v7 = vld [vmem:[#allocation22_spill] sm:$0xff]  ;;  %v6173_v50 = vand.u32 4294901760, %v152_v6  ;;  %v7435_v13 = vld [vmem:[#allocation17_spill] sm:$0xff] }
 0x15c   :  { %2561 = vmatpush.msra.mxu0 %v5906_v15  ;;  %2403 = vmatmul.f32.gmra.mxu2 %v2402_v21  ;;  %v6149_v53 = vpop.f32.mrf.mxu1  ;;  %v6157_v21 = vand.u32 4294901760, %v153_v9  ;;  %v348_v30 = vadd.f32 %v7431_v7, %v7430_v38  ;;  %v462_v38 = vadd.f32 %v7435_v13, %v407_v26  ;;  %v150_v15 = vld [vmem:[%s7066_s1 + $0x350] sm:$0xff] }
 0x15d   :  { %7424 = vst [vmem:[#allocation8_spill] sm:$0xff] %v6149_v53  ;;  %2610 = vmatpush.msra.mxu1 %v5803_v8  ;;  %2697 = vmatpush.msra.mxu2 %v2481_v28  ;;  %v6159_v27 = vpop.f32.mrf.mxu0  ;;  %v6168_v4 = vpop.f32.mrf.mxu2  ;;  %v7433_v8 = vld [vmem:[#allocation9_spill] sm:$0xff]  ;;  %v151_v28 = vld [vmem:[%s7066_s1 + $0x358] sm:$0xff]  ;;  %v6206_v25 = vsub.f32 %v152_v6, %v6173_v50  ;;  %v7446_v6 = vld [vmem:[#allocation35_spill] sm:$0xff] }
 0x15e   :  { %7428 = vst [vmem:[#allocation10_spill] sm:$0xff] %v6157_v21  ;;  %2750 = vmatpush.msra.mxu3 %v5833_v0  ;;  %2564 = vmatpush.msra.mxu0 %v5923_v59  ;;  %v645_v18 = vadd.f32 %v7433_v8, %v592_v40  ;;  %v7436_v40 = vld [vmem:[#allocation20_spill] sm:$0xff]  ;;  %v6197_v26 = vand.u32 4294901760, %v151_v28  ;;  %v149_v59 = vld [vmem:[%s7066_s1 + $0x348] sm:$0xff] }
 0x15f   :  { %7429 = vst [vmem:[#allocation12_spill] sm:$0xff] %v6159_v27  ;;  %2516 = vmatmul.f32.gmra.mxu3 %v6048_v20  ;;  %2612 = vmatpush.msra.mxu1 %v5833_v0  ;;  %v412_v7 = vadd.f32 %v7436_v40, %v344_v12  ;;  %v6187_v0 = vsub.f32 %v153_v9, %v6157_v21  ;;  %v7438_v8 = vld [vmem:[#allocation24_spill] sm:$0xff]  ;;  %v7149_v12 = vand.u32 4294901760, %v6166_v36  ;;  %v7441_v9 = vld [vmem:[#allocation7_spill] sm:$0xff] }
 0x160   :  { %7432 = vst [vmem:[#allocation13_spill] sm:$0xff] %v6168_v4  ;;  %2701 = vmatpush.msra.mxu2 %v2487_v62  ;;  %2752 = vmatpush.msra.mxu3 %v5848_v60  ;;  %v6192_v62 = vpop.f32.mrf.mxu3  ;;  %v417_v31 = vadd.f32 %v7438_v8, %v348_v30  ;;  %v770_v40 = vadd.f32 %v7441_v9, %v645_v18  ;;  %v6213_v30 = vand.u32 4294901760, %v150_v15  ;;  %v7447_v9 = vld [vmem:[#allocation5_spill] sm:$0xff]  ;;  %v7472_v27 = vld [vmem:[#allocation36_spill] sm:$0xff] }
 0x161   :  { %7434 = vst [vmem:[#allocation11_spill] sm:$0xff] %v6173_v50  ;;  %2567 = vmatpush.msra.mxu0 %v5937_v51  ;;  %2338 = vmatmul.f32.gmra.mxu1 %v5781_v11  ;;  %v7440_v11 = vld [vmem:[#allocation25_spill] sm:$0xff] }
 0x162   :  { %7437 = vst [vmem:[#allocation14_spill] sm:$0xff] %v6192_v62  ;;  %2570 = vmatmul.f32.vlgmr.msra.gmra.mxu0 %v5934_v24  ;;  %2614 = vmatpush.msra.mxu1 %v5848_v60  ;;  %v547_v13 = vadd.f32 %v7440_v11, %v462_v38  ;;  %v2844_v60 = vsub.f32 %v6144_v39, %v7148_v46  ;;  %v7445_v38 = vld [vmem:[#allocation26_spill] sm:$0xff]  ;;  %v148_v51 = vld [vmem:[%s7066_s1 + $0x340] sm:$0xff]  ;;  %v7463_v62 = vand.u32 4294901760, %v6206_v25 }
 0x163   :  { %7439 = vst [vmem:[#allocation23_spill] sm:$0xff] %v6197_v26  ;;  %2705 = vmatpush.msra.mxu2 %v2493_v61  ;;  %2754 = vmatpush.msra.mxu3 %v5871_v16  ;;  %v7444_v61 = vld [vmem:[#allocation21_spill] sm:$0xff]  ;;  %v836_v11 = vadd.f32 %v7446_v6, %v770_v40  ;;  %v474_v46 = vadd.f32 %v7447_v9, %v417_v31  ;;  %v7450_v40 = vld [vmem:[#allocation38_spill] sm:$0xff]  ;;  %v7453_v9 = vld [vmem:[#allocation31_spill] sm:$0xff] }
 0x164   :  { %7442 = vst [vmem:[#allocation6_spill] sm:$0xff] %v6206_v25  ;;  %2777 = vmatpush.msrb.mxu0 %v6123_v2  ;;  %2616 = vmatpush.msra.mxu1 %v5871_v16  ;;  %v468_v18 = vadd.f32 %v7444_v61, %v412_v7  ;;  %v596_v8 = vadd.f32 %v7445_v38, %v547_v13  ;;  %v2845_v41 = vand.u32 4294901760, %v2844_v60  ;;  %v7456_v16 = vld [vmem:[#allocation28_spill] sm:$0xff]  ;;  %v7460_v31 = vld [vmem:[#allocation34_spill] sm:$0xff]  ;;  %v7473_v4 = vld [vmem:[#allocation41_spill] sm:$0xff] }
 0x165   :  { %7443 = vst [vmem:[#allocation16_spill] sm:$0xff] %v6213_v30  ;;  %2709 = vmatpush.msra.mxu2 %v2499_v43  ;;  %2756 = vmatpush.msra.mxu3 %v5892_v17  ;;  %v2850_v7 = vsub.f32 %v6166_v36, %v7149_v12  ;;  %v6232_v13 = vsub.f32 %v151_v28, %v6197_v26  ;;  %v7452_v28 = vld [vmem:[#allocation27_spill] sm:$0xff]  ;;  %v147_v60 = vld [vmem:[%s7066_s1 + $0x338] sm:$0xff] }
 0x166   :  { %2779 = vmatpush.msrb.mxu0 %v6133_v42  ;;  %2618 = vmatpush.msra.mxu1 %v5892_v17  ;;  %v6237_v43 = vpop.f32.mrf.mxu1  ;;  %v890_v61 = vadd.f32 %v7450_v40, %v836_v11  ;;  %v6242_v17 = vand.u32 4294901760, %v149_v59  ;;  %v551_v6 = vadd.f32 %v7452_v28, %v468_v18  ;;  %v555_v12 = vadd.f32 %v7453_v9, %v474_v46 }
 0x167   :  { %7448 = vst [vmem:[#allocation15_spill] sm:$0xff] %v6232_v13  ;;  %2711 = vmatmul.f32.vlgmr.msra.gmra.mxu2 %v5910_v47  ;;  %2758 = vmatpush.msra.mxu3 %v5908_v5  ;;  %v6245_v38 = vpop.f32.mrf.mxu0  ;;  %v6252_v11 = vsub.f32 %v150_v15, %v6213_v30  ;;  %v6254_v40 = vpop.f32.mrf.mxu2  ;;  %v7457_v18 = vand.u32 4294901760, %v6187_v0  ;;  %v6262_v28 = vand.u32 4294901760, %v148_v51  ;;  %v7459_v15 = vld [vmem:[#allocation30_spill] sm:$0xff] }
 0x168   :  { %7449 = vst [vmem:[#allocation18_spill] sm:$0xff] %v6237_v43  ;;  %2956 = vmatpush.msrb.mxu2 %v6144_v39  ;;  %2781 = vmatpush.msrb.mxu0 %v6157_v21  ;;  %v653_v43 = vadd.f32 %v7456_v16, %v596_v8  ;;  %v600_v9 = vadd.f32 %v7459_v15, %v551_v6  ;;  %v7461_v8 = vld [vmem:[#allocation40_spill] sm:$0xff]  ;;  %v7468_v15 = vld [vmem:[#allocation29_spill] sm:$0xff] }
 0x169   :  { %7451 = vst [vmem:[#allocation19_spill] sm:$0xff] %v6242_v17  ;;  %2620 = vmatpush.msra.mxu1 %v5908_v5  ;;  %2760 = vmatmul.f32.vlgmr.msra.gmra.mxu3 %v5910_v47  ;;  %v2856_v46 = vsub.f32 %v6187_v0, %v7457_v18  ;;  %v2851_v5 = vand.u32 4294901760, %v2850_v7  ;;  %v977_v16 = vadd.f32 %v7461_v8, %v890_v61  ;;  %v7462_v18 = vand.u32 4294901760, %v5934_v24  ;;  %v146_v7 = vld [vmem:[%s7066_s1 + $0x330] sm:$0xff] }
 0x16a   :  { %7454 = vst [vmem:[#allocation22_spill] sm:$0xff] %v6252_v11  ;;  %2959 = vmatpush.msrb.mxu2 %v6166_v36  ;;  %3024 = vmatpush.msrb.mxu3 %v6123_v2  ;;  %v2862_v6 = vsub.f32 %v6206_v25, %v7463_v62  ;;  %v6288_v61 = vand.u32 4294901760, %v147_v60  ;;  %v774_v8 = vadd.f32 %v7468_v15, %v653_v43  ;;  %v6302_v24 = vand.u32 4294901760, %v146_v7 }
 0x16b   :  { %7455 = vst [vmem:[#allocation9_spill] sm:$0xff] %v6254_v40  ;;  %v604_v40 = vadd.f32 %v7460_v31, %v555_v12  ;;  %2783 = vmatpush.msrb.mxu0 %v6173_v50  ;;  %2624 = vmatmul.f32.vlgmr.msra.gmra.mxu1 %v7462_v18  ;;  %v6280_v12 = vsub.f32 %v149_v59, %v6242_v17  ;;  %v6285_v31 = vpop.f32.mrf.mxu3  ;;  %v2857_v62 = vand.u32 4294901760, %v2856_v46  ;;  %v7469_v18 = vld [vmem:[#allocation32_spill] sm:$0xff]  ;;  %v145_v46 = vld [vmem:[%s7066_s1 + $0x328] sm:$0xff] }
 0x16c   :  { %7458 = vst [vmem:[#allocation17_spill] sm:$0xff] %v6262_v28  ;;  %2575 = vmatmul.f32.gmra.mxu0 %v5988_v34  ;;  %2846 = vmatpush.msrb.mxu1 %v2845_v41  ;;  %v6294_v59 = vsub.f32 %v148_v51, %v6262_v28  ;;  %v661_v47 = vadd.f32 %v7469_v18, %v600_v9  ;;  %v7470_v41 = vand.u32 4294901760, %v6232_v13  ;;  %v2863_v43 = vand.u32 4294901760, %v2862_v6 }
 0x16d   :  { %7464 = vst [vmem:[#allocation20_spill] sm:$0xff] %v6280_v12  ;;  %2962 = vmatpush.msrb.mxu2 %v6187_v0  ;;  %3026 = vmatpush.msrb.mxu3 %v6133_v42  ;;  %v669_v51 = vadd.f32 %v7472_v27, %v604_v40  ;;  %v1026_v42 = vadd.f32 %v7473_v4, %v977_v16  ;;  %v7475_v18 = vand.u32 4294901760, %v6252_v11  ;;  %v144_v4 = vld [vmem:[%s7066_s1 + $0x320] sm:$0xff]  ;;  %v7476_v16 = vld [vmem:[#allocation54_spill] sm:$0xff] }
 0x16e   :  { %7465 = vst [vmem:[#allocation24_spill] sm:$0xff] %v6285_v31  ;;  %2785 = vmatpush.msrb.mxu0 %v6197_v26  ;;  %2852 = vmatpush.msrb.mxu1 %v2851_v5  ;;  %v2868_v31 = vsub.f32 %v6232_v13, %v7470_v41  ;;  %v7474_v5 = vld [vmem:[#allocation39_spill] sm:$0xff]  ;;  %v6319_v27 = vsub.f32 %v147_v60, %v6288_v61 }
 0x16f   :  { %7466 = vst [vmem:[#allocation25_spill] sm:$0xff] %v6288_v61  ;;  %2965 = vmatpush.msrb.mxu2 %v6206_v25  ;;  %3028 = vmatpush.msrb.mxu3 %v6157_v21  ;;  %v841_v15 = vadd.f32 %v7474_v5, %v774_v8  ;;  %v2874_v41 = vsub.f32 %v6252_v11, %v7475_v18  ;;  %v6328_v8 = vand.u32 4294901760, %v145_v46  ;;  %v7479_v18 = vld [vmem:[#allocation42_spill] sm:$0xff]  ;;  %v7494_v25 = vld [vmem:[#allocation60_spill] sm:$0xff] }
 0x170   :  { %7467 = vst [vmem:[#allocation7_spill] sm:$0xff] %v6294_v59  ;;  %2787 = vmatpush.msrb.mxu0 %v6213_v30  ;;  %2715 = vmatmul.f32.gmra.mxu2 %v5962_v1  ;;  %v6324_v40 = vpop.f32.mrf.mxu1  ;;  %v1079_v6 = vadd.f32 %v7476_v16, %v1026_v42  ;;  %v2869_v21 = vand.u32 4294901760, %v2868_v31  ;;  %v6337_v2 = vsub.f32 %v146_v7, %v6302_v24  ;;  %v18_v42 = vld [vmem:[%s7065_s0 + $0x30] sm:$0xff]  ;;  %v7480_v16 = vld [vmem:[#allocation33_spill] sm:$0xff]  ;;  %v143_v7 = vld [vmem:[%s7066_s1 + $0x318] sm:$0xff] }
 0x171   :  { %7471 = vst [vmem:[#allocation21_spill] sm:$0xff] %v6302_v24  ;;  %2858 = vmatpush.msrb.mxu1 %v2857_v62  ;;  %2968 = vmatpush.msrb.mxu2 %v6232_v13  ;;  %v6331_v9 = vpop.f32.mrf.mxu0  ;;  %v896_v60 = vadd.f32 %v7479_v18, %v841_v15  ;;  %v778_v5 = vadd.f32 %v7480_v16, %v661_v47  ;;  %v7481_v13 = vld [vmem:[#allocation58_spill] sm:$0xff]  ;;  %v7482_v15 = vand.u32 4294901760, %v6280_v12  ;;  %v6350_v18 = vand.u32 4294901760, %v144_v4  ;;  %v7485_v47 = vld [vmem:[#allocation43_spill] sm:$0xff] }
 0x172   :  { %7477 = vst [vmem:[#allocation26_spill] sm:$0xff] %v6328_v8  ;;  %3030 = vmatpush.msrb.mxu3 %v6173_v50  ;;  %2789 = vmatpush.msrb.mxu0 %v6242_v17  ;;  %v6342_v62 = vpop.f32.mrf.mxu2  ;;  %v7484_v50 = vld [vmem:[#allocation37_spill] sm:$0xff]  ;;  %v7487_v16 = vand.u32 4294901760, %v6294_v59 }
 0x173   :  { %7478 = vst [vmem:[#allocation35_spill] sm:$0xff] %v6331_v9  ;;  %v1204_v9 = vadd.f32 %v7481_v13, %v1079_v6  ;;  %2764 = vmatmul.f32.gmra.mxu3 %v5962_v1  ;;  %2864 = vmatpush.msrb.mxu1 %v2863_v43  ;;  %v2880_v31 = vsub.f32 %v6280_v12, %v7482_v15  ;;  %v2875_v13 = vand.u32 4294901760, %v2874_v41  ;;  %v7486_v6 = vand.u32 4294901760, %v5988_v34 }
 0x174   :  { %7483 = vst [vmem:[#allocation5_spill] sm:$0xff] %v6350_v18  ;;  %v782_v53 = vadd.f32 %v7484_v50, %v669_v51  ;;  %2971 = vmatpush.msrb.mxu2 %v6252_v11  ;;  %3032 = vmatpush.msrb.mxu3 %v6197_v26  ;;  %v846_v43 = vadd.f32 %v7485_v47, %v778_v5  ;;  %v142_v51 = vld [vmem:[%s7066_s1 + $0x310] sm:$0xff]  ;;  %v6372_v41 = vand.u32 4294901760, %v18_v42  ;;  %v6374_v1 = vpop.f32.mrf.mxu3  ;;  %v7491_v5 = vld [vmem:[#allocation44_spill] sm:$0xff] }
 0x175   :  { %2791 = vmatpush.msrb.mxu0 %v6262_v28  ;;  %2630 = vmatmul.f32.gmra.mxu1 %v7486_v6  ;;  %v2886_v15 = vsub.f32 %v6294_v59, %v7487_v16  ;;  %v6367_v50 = vsub.f32 %v145_v46, %v6328_v8  ;;  %7490 = vst [vmem:[#allocation31_spill] sm:$0xff] %v6374_v1  ;;  %v7492_v26 = vld [vmem:[#allocation48_spill] sm:$0xff]  ;;  %v6379_v6 = vand.u32 4294901760, %v143_v7  ;;  %v7160_v46 = vand.u32 4294901760, %v6337_v2  ;;  %v7493_v16 = vld [vmem:[#allocation47_spill] sm:$0xff] }
 0x176   :  { %7489 = vst [vmem:[#allocation27_spill] sm:$0xff] %v6372_v41  ;;  %v981_v47 = vadd.f32 %v7491_v5, %v896_v60  ;;  %v851_v34 = vadd.f32 %v7492_v26, %v782_v53  ;;  %2580 = vmatmul.f32.gmra.mxu0 %v6027_v19  ;;  %2870 = vmatpush.msrb.mxu1 %v2869_v21  ;;  %v2881_v1 = vand.u32 4294901760, %v2880_v31  ;;  %v141_v53 = vld [vmem:[%s7066_s1 + $0x308] sm:$0xff]  ;;  %v7495_v21 = vld [vmem:[#allocation53_spill] sm:$0xff] }
 0x177   :  { %7488 = vst [vmem:[#allocation38_spill] sm:$0xff] %v6367_v50  ;;  %v902_v11 = vadd.f32 %v7493_v16, %v846_v43  ;;  %v1270_v48 = vadd.f32 %v7494_v25, %v1204_v9  ;;  %2974 = vmatpush.msrb.mxu2 %v6280_v12  ;;  %3034 = vmatpush.msrb.mxu3 %v6213_v30  ;;  %v7496_v43 = vand.u32 4294901760, %v6319_v27  ;;  %v6397_v9 = vand.u32 4294901760, %v142_v51  ;;  %v7499_v31 = vld [vmem:[#allocation61_spill] sm:$0xff] }
 0x178   :  { %v6387_v60 = vsub.f32 %v144_v4, %v6350_v18  ;;  %v908_v26 = vadd.f32 %v7495_v21, %v851_v34  ;;  %2793 = vmatpush.msrb.mxu0 %v6288_v61  ;;  %2876 = vmatpush.msrb.mxu1 %v2875_v13  ;;  %v2887_v4 = vand.u32 4294901760, %v2886_v15  ;;  %v6403_v5 = vsub.f32 %v18_v42, %v6372_v41  ;;  %v7497_v34 = vld [vmem:[#allocation46_spill] sm:$0xff]  ;;  %v140_v42 = vld [vmem:[%s7066_s1 + $0x300] sm:$0xff]  ;;  %v7501_v41 = vld [vmem:[#allocation59_spill] sm:$0xff] }
 0x179   :  { %v2892_v25 = vsub.f32 %v6319_v27, %v7496_v43  ;;  %2977 = vmatpush.msrb.mxu2 %v6294_v59  ;;  %3036 = vmatpush.msrb.mxu3 %v6242_v17  ;;  %v1030_v16 = vadd.f32 %v7497_v34, %v981_v47  ;;  %v2898_v13 = vsub.f32 %v6337_v2, %v7160_v46  ;;  %v6414_v43 = vand.u32 4294901760, %v141_v53  ;;  %v7498_v47 = vld [vmem:[#allocation49_spill] sm:$0xff]  ;;  %v7500_v59 = vld [vmem:[#allocation55_spill] sm:$0xff] }
 0x17a   :  { %2795 = vmatpush.msrb.mxu0 %v6302_v24  ;;  %2719 = vmatmul.f32.gmra.mxu2 %v6007_v22  ;;  %v6412_v21 = vsub.f32 %v143_v7, %v6379_v6  ;;  %v6419_v15 = vpop.f32.mrf.mxu1  ;;  %v985_v34 = vadd.f32 %v7498_v47, %v902_v11  ;;  %v1324_v17 = vadd.f32 %v7499_v31, %v1270_v48  ;;  %v7168_v46 = vand.u32 4294901760, %v6387_v60  ;;  %v171_v7 = vld [vmem:[%s7066_s1 + $0x3f8] sm:$0xff] }
 0x17b   :  { %2882 = vmatpush.msrb.mxu1 %v2881_v1  ;;  %2980 = vmatpush.msrb.mxu2 %v6319_v27  ;;  %v6428_v30 = vpop.f32.mrf.mxu0  ;;  %v989_v12 = vadd.f32 %v7500_v59, %v908_v26  ;;  %v1087_v3 = vadd.f32 %v7501_v41, %v1030_v16  ;;  %v2893_v48 = vand.u32 4294901760, %v2892_v25  ;;  %v6435_v11 = vsub.f32 %v142_v51, %v6397_v9  ;;  %v6437_v1 = vpop.f32.mrf.mxu2  ;;  %v26_v51 = vld [vmem:[%s7065_s0 + $0x70] sm:$0xff]  ;;  %v7505_v16 = vld [vmem:[#allocation62_spill] sm:$0xff] }
 0x17c   :  { %3038 = vmatpush.msrb.mxu3 %v6262_v28  ;;  %2797 = vmatpush.msrb.mxu0 %v6328_v8  ;;  %v1411_v31 = vadd.f32 %v6011_v32, %v1324_v17  ;;  %v7502_v47 = vand.u32 4294901760, %v6367_v50  ;;  %v6444_v41 = vand.u32 4294901760, %v140_v42  ;;  %v2899_v32 = vand.u32 4294901760, %v2898_v13 }
 0x17d   :  { %2768 = vmatmul.f32.gmra.mxu3 %v6007_v22  ;;  %2888 = vmatpush.msrb.mxu1 %v2887_v4  ;;  %v6454_v17 = vsub.f32 %v141_v53, %v6414_v43  ;;  %v6456_v25 = vand.u32 4294901760, %v171_v7  ;;  %v170_v4 = vld [vmem:[%s7066_s1 + $0x3f0] sm:$0xff]  ;;  %v7506_v26 = vand.u32 4294901760, %v6027_v19  ;;  %v2910_v13 = vsub.f32 %v6387_v60, %v7168_v46  ;;  %v7507_v53 = vld [vmem:[#allocation52_spill] sm:$0xff]  ;;  %v169_v19 = vld [vmem:[%s7066_s1 + $0x3e8] sm:$0xff] }
 0x17e   :  { %v2904_v59 = vsub.f32 %v6367_v50, %v7502_v47  ;;  %7503 = vst [vmem:[#allocation28_spill] sm:$0xff] %v6444_v41  ;;  %2983 = vmatpush.msrb.mxu2 %v6337_v2  ;;  %3040 = vmatpush.msrb.mxu3 %v6288_v61  ;;  %v1208_v47 = vadd.f32 %v7505_v16, %v1087_v3  ;;  %v6468_v22 = vpop.f32.mrf.mxu3  ;;  %v6474_v16 = vand.u32 4294901760, %v26_v51  ;;  %v7511_v3 = vand.u32 4294901760, %v6412_v21 }
 0x17f   :  { %7504 = vst [vmem:[#allocation30_spill] sm:$0xff] %v6456_v25  ;;  %2799 = vmatpush.msrb.mxu0 %v6350_v18  ;;  %2636 = vmatmul.f32.gmra.mxu1 %v7506_v26  ;;  %v1034_v61 = vadd.f32 %v7507_v53, %v985_v34  ;;  %v1460_v28 = vadd.f32 %v6050_v58, %v1411_v31  ;;  %v7508_v34 = vand.u32 4294901760, %v6403_v5  ;;  %v7510_v53 = vld [vmem:[#allocation57_spill] sm:$0xff] }
 0x180   :  { %2585 = vmatmul.f32.gmra.mxu0 %v6070_v23  ;;  %2894 = vmatpush.msrb.mxu1 %v2893_v48  ;;  %v2905_v26 = vand.u32 4294901760, %v2904_v59  ;;  %v6485_v31 = vsub.f32 %v140_v42, %v6444_v41  ;;  %v6487_v48 = vand.u32 4294901760, %v170_v4  ;;  %v1038_v46 = vadd.f32 %v7510_v53, %v989_v12 }
 0x181   :  { %2986 = vmatpush.msrb.mxu2 %v6367_v50  ;;  %3042 = vmatpush.msrb.mxu3 %v6302_v24  ;;  %v2811_v58 = vsub.f32 %v6403_v5, %v7508_v34  ;;  %v2916_v50 = vsub.f32 %v6412_v21, %v7511_v3  ;;  %v6496_v24 = vsub.f32 %v171_v7, %v6456_v25  ;;  %v2911_v12 = vand.u32 4294901760, %v2910_v13 }
 0x182   :  { %7509 = vst [vmem:[#allocation34_spill] sm:$0xff] %v6487_v48  ;;  %2801 = vmatpush.msrb.mxu0 %v6379_v6  ;;  %2900 = vmatpush.msrb.mxu1 %v2899_v32  ;;  %v1095_v34 = vadd.f32 %v5912_v35, %v1034_v61  ;;  %v1275_v42 = vadd.f32 %v5917_v63, %v1208_v47  ;;  %v6502_v53 = vand.u32 4294901760, %v169_v19  ;;  %v168_v32 = vld [vmem:[%s7066_s1 + $0x3e0] sm:$0xff]  ;;  %v7513_v35 = vand.u32 4294901760, %v6435_v11 }
 0x183   :  { %2989 = vmatpush.msrb.mxu2 %v6387_v60  ;;  %3044 = vmatpush.msrb.mxu3 %v6328_v8  ;;  %v1103_v3 = vadd.f32 %v5971_v10, %v1038_v46  ;;  %v6514_v61 = vsub.f32 %v26_v51, %v6474_v16  ;;  %v1513_v47 = vadd.f32 %v6062_v49, %v1460_v28  ;;  %v2812_v13 = vand.u32 4294901760, %v2811_v58 }
 0x184   :  { %7512 = vst [vmem:[#allocation40_spill] sm:$0xff] %v6502_v53  ;;  %2803 = vmatpush.msrb.mxu0 %v6397_v9  ;;  %2723 = vmatmul.f32.gmra.mxu2 %v6048_v20  ;;  %v2922_v63 = vsub.f32 %v6435_v11, %v7513_v35  ;;  %v6516_v7 = vpop.f32.mrf.mxu1  ;;  %v6522_v46 = vsub.f32 %v170_v4, %v6487_v48  ;;  %v167_v35 = vld [vmem:[%s7066_s1 + $0x3d8] sm:$0xff]  ;;  %v2917_v49 = vand.u32 4294901760, %v2916_v50  ;;  %v7514_v28 = vand.u32 4294901760, %v6454_v17  ;;  %v34_v50 = vld [vmem:[%s7065_s0 + $0xb0] sm:$0xff] }
 0x185   :  { %2906 = vmatpush.msrb.mxu1 %v2905_v26  ;;  %2992 = vmatpush.msrb.mxu2 %v6412_v21  ;;  %v6527_v59 = vpop.f32.mrf.mxu0  ;;  %v6535_v58 = vand.u32 4294901760, %v168_v32  ;;  %v6537_v4 = vpop.f32.mrf.mxu2  ;;  %v1330_v10 = vadd.f32 %v5939_v55, %v1275_v42  ;;  %v1212_v8 = vadd.f32 %v5964_v33, %v1095_v34  ;;  %v6552_v33 = vand.u32 4294901760, %v167_v35 }
 0x186   :  { %3046 = vmatpush.msrb.mxu3 %v6350_v18  ;;  %2805 = vmatpush.msrb.mxu0 %v6414_v43  ;;  %v2928_v51 = vsub.f32 %v6454_v17, %v7514_v28  ;;  %v6543_v18 = vsub.f32 %v169_v19, %v6502_v53  ;;  %v1216_v28 = vadd.f32 %v6009_v52, %v1103_v3  ;;  %v2923_v26 = vand.u32 4294901760, %v2922_v63 }
 0x187   :  { %7515 = vst [vmem:[#allocation29_spill] sm:$0xff] %v6535_v58  ;;  %2772 = vmatmul.f32.gmra.mxu3 %v6048_v20  ;;  %2912 = vmatpush.msrb.mxu1 %v2911_v12  ;;  %v166_v20 = vld [vmem:[%s7066_s1 + $0x3d0] sm:$0xff]  ;;  %v1415_v19 = vadd.f32 %v6055_v14, %v1330_v10  ;;  %v1638_v34 = vadd.f32 %v6074_v57, %v1513_v47  ;;  %v7518_v52 = vand.u32 4294901760, %v6070_v23  ;;  %v7519_v42 = vand.u32 4294901760, %v6485_v31  ;;  %v165_v10 = vld [vmem:[%s7066_s1 + $0x3c8] sm:$0xff] }
 0x188   :  { %7516 = vst [vmem:[#allocation32_spill] sm:$0xff] %v6543_v18  ;;  %2995 = vmatpush.msrb.mxu2 %v6435_v11  ;;  %3048 = vmatpush.msrb.mxu3 %v6379_v6  ;;  %v7174_v3 = vand.u32 4294901760, %v6522_v46  ;;  %v6566_v63 = vpop.f32.mrf.mxu3  ;;  %v2929_v55 = vand.u32 4294901760, %v2928_v51  ;;  %v7520_v14 = vand.u32 4294901760, %v6496_v24  ;;  %v6572_v47 = vsub.f32 %v168_v32, %v6535_v58 }
 0x189   :  { %7517 = vst [vmem:[#allocation36_spill] sm:$0xff] %v6552_v33  ;;  %2807 = vmatpush.msrb.mxu0 %v6444_v41  ;;  %2642 = vmatmul.f32.gmra.mxu1 %v7518_v52  ;;  %v2934_v12 = vsub.f32 %v6485_v31, %v7519_v42  ;;  %v6574_v23 = vand.u32 4294901760, %v34_v50  ;;  %v1464_v52 = vadd.f32 %v6090_v45, %v1415_v19  ;;  %v7522_v51 = vand.u32 4294901760, %v6144_v39 }
 0x18a   :  { %2813 = vmatmul.f32.vlgmr.msrb.gmra.mxu0 %v2812_v13  ;;  %2918 = vmatpush.msrb.mxu1 %v2917_v49  ;;  %v3278_v57 = vsub.f32 %v6496_v24, %v7520_v14  ;;  %7521 = vst [vmem:[#allocation41_spill] sm:$0xff] %v6572_v47  ;;  %v1704_v42 = vadd.f32 %v6245_v38, %v1638_v34  ;;  %v7173_v13 = vand.u32 4294901760, %v6543_v18  ;;  %v6584_v49 = vand.u32 4294901760, %v166_v20 }
 0x18b   :  { %2998 = vmatpush.msrb.mxu2 %v6454_v17  ;;  %3050 = vmatpush.msrb.mxu3 %v6397_v9  ;;  %v1280_v32 = vadd.f32 %v5975_v29, %v1212_v8  ;;  %v7523_v14 = vand.u32 4294901760, %v6514_v61  ;;  %v6593_v38 = vsub.f32 %v167_v35, %v6552_v33  ;;  %v2935_v34 = vand.u32 4294901760, %v2934_v12  ;;  %v164_v8 = vld [vmem:[%s7066_s1 + $0x3c0] sm:$0xff] }
 0x18c   :  { %3083 = vmatpush.msra.mxu0 %v7522_v51  ;;  %2924 = vmatpush.msrb.mxu1 %v2923_v26  ;;  %v1758_v19 = vadd.f32 %v6324_v40, %v1704_v42  ;;  %v3284_v29 = vsub.f32 %v6522_v46, %v7174_v3  ;;  %v6601_v39 = vand.u32 4294901760, %v165_v10  ;;  %v1285_v35 = vadd.f32 %v6019_v37, %v1216_v28 }
 0x18d   :  { %v2819_v45 = vsub.f32 %v6514_v61, %v7523_v14  ;;  %7524 = vst [vmem:[#allocation39_spill] sm:$0xff] %v6593_v38  ;;  %3001 = vmatpush.msrb.mxu2 %v6485_v31  ;;  %3052 = vmatpush.msrb.mxu3 %v6414_v43  ;;  %v7525_v26 = vand.u32 4294901760, %v6166_v36  ;;  %v3279_v51 = vand.u32 4294901760, %v3278_v57  ;;  %v6611_v12 = vsub.f32 %v34_v50, %v6574_v23  ;;  %v163_v50 = vld [vmem:[%s7066_s1 + $0x3b8] sm:$0xff] }
 0x18e   :  { %2930 = vmatpush.msrb.mxu1 %v2929_v55  ;;  %v6613_v42 = vpop.f32.mrf.mxu1  ;;  %v1521_v14 = vadd.f32 %v6103_v44, %v1464_v52  ;;  %3004 = vmatmul.f32.vlgmr.msrb.gmra.mxu2 %v6403_v5  ;;  %v3290_v37 = vsub.f32 %v6543_v18, %v7173_v13  ;;  %v6622_v36 = vsub.f32 %v166_v20, %v6584_v49  ;;  %v7527_v44 = vand.u32 4294901760, %v6187_v0  ;;  %v42_v0 = vld [vmem:[%s7065_s0 + $0xf0] sm:$0xff] }
 0x18f   :  { %3087 = vmatpush.msra.mxu0 %v7525_v26  ;;  %3054 = vmatpush.msrb.mxu3 %v6444_v41  ;;  %v1946_v28 = vpop.f32.mrf.mxu0  ;;  %v1336_v55 = vadd.f32 %v5993_v54, %v1280_v32  ;;  %v2820_v57 = vand.u32 4294901760, %v2819_v45  ;;  %v6632_v26 = vand.u32 4294901760, %v164_v8  ;;  %v6634_v13 = vpop.f32.mrf.mxu2  ;;  %v7528_v20 = vand.u32 4294901760, %v6403_v5 }
 0x190   :  { %7526 = vst [vmem:[#allocation54_spill] sm:$0xff] %v6622_v36  ;;  %3211 = vmatpush.msra.mxu2 %v6456_v25  ;;  %2936 = vmatpush.msrb.mxu1 %v2935_v34  ;;  %v1845_v3 = vadd.f32 %v6342_v62, %v1758_v19  ;;  %v3285_v40 = vand.u32 4294901760, %v3284_v29  ;;  %v6640_v54 = vsub.f32 %v165_v10, %v6601_v39  ;;  %v7530_v45 = vand.u32 4294901760, %v6572_v47  ;;  %v162_v10 = vld [vmem:[%s7066_s1 + $0x3b0] sm:$0xff]  ;;  %v7532_v19 = vld [vmem:[#allocation50_spill] sm:$0xff] }
 0x191   :  { %3091 = vmatpush.msra.mxu0 %v7527_v44  ;;  %3058 = vmatmul.f32.vlgmr.msrb.gmra.mxu3 %v7528_v20  ;;  %v1419_v32 = vadd.f32 %v6096_v56, %v1336_v55  ;;  %v6651_v62 = vand.u32 4294901760, %v163_v50  ;;  %v1342_v29 = vadd.f32 %v7532_v19, %v1285_v35  ;;  %v7533_v44 = vld [vmem:[#allocation45_spill] sm:$0xff]  ;;  %v7534_v56 = vld [vmem:[#allocation6_spill] sm:$0xff]  ;;  %v3291_v52 = vand.u32 4294901760, %v3290_v37  ;;  %v7538_v35 = vld [vmem:[#allocation56_spill] sm:$0xff] }
 0x192   :  { %7529 = vst [vmem:[#allocation42_spill] sm:$0xff] %v6640_v54  ;;  %3213 = vmatpush.msra.mxu2 %v6487_v48  ;;  %3280 = vmatpush.msra.mxu3 %v3279_v51  ;;  %v3296_v5 = vsub.f32 %v6572_v47, %v7530_v45  ;;  %v1642_v20 = vadd.f32 %v7533_v44, %v1521_v14  ;;  %v7535_v55 = vand.u32 4294901760, %v7534_v56  ;;  %v7536_v51 = vld [vmem:[#allocation27_spill] sm:$0xff]  ;;  %v161_v34 = vld [vmem:[%s7066_s1 + $0x3a8] sm:$0xff]  ;;  %v6665_v48 = vpop.f32.mrf.mxu3  ;;  %v7537_v47 = vld [vmem:[#allocation8_spill] sm:$0xff]  ;;  %v7539_v14 = vand.u32 4294901760, %v6593_v38 }
 0x193   :  { %7531 = vst [vmem:[#allocation33_spill] sm:$0xff] %v6651_v62  ;;  %2938 = vmatmul.f32.vlgmr.msrb.gmra.mxu1 %v7536_v51  ;;  %v1468_v25 = vadd.f32 %v7537_v47, %v1419_v32  ;;  %2821 = vmatmul.f32.gmra.mxu0 %v2820_v57  ;;  %v6673_v44 = vsub.f32 %v164_v8, %v6632_v26  ;;  %v6675_v37 = vand.u32 4294901760, %v42_v0  ;;  %v7540_v56 = vld [vmem:[#allocation35_spill] sm:$0xff]  ;;  %v6681_v57 = vand.u32 4294901760, %v162_v10 }
 0x194   :  { %3095 = vmatpush.msra.mxu0 %v7535_v55  ;;  %3162 = vmatpush.msra.mxu1 %v7538_v35  ;;  %v3302_v19 = vsub.f32 %v6593_v38, %v7539_v14  ;;  %v1709_v55 = vadd.f32 %v7540_v56, %v1642_v20  ;;  %v7541_v45 = vld [vmem:[#allocation31_spill] sm:$0xff]  ;;  %v3297_v8 = vand.u32 4294901760, %v3296_v5  ;;  %v7545_v38 = vand.u32 4294901760, %v6611_v12  ;;  %v160_v5 = vld [vmem:[%s7066_s1 + $0x3a0] sm:$0xff] }
 0x195   :  { %3215 = vmatpush.msra.mxu2 %v6502_v53  ;;  %3286 = vmatpush.msra.mxu3 %v3285_v40  ;;  %v1894_v41 = vadd.f32 %v7541_v45, %v1845_v3  ;;  %v7542_v32 = vld [vmem:[#allocation15_spill] sm:$0xff]  ;;  %v6690_v20 = vsub.f32 %v163_v50, %v6651_v62  ;;  %v6692_v40 = vand.u32 4294901760, %v161_v34  ;;  %v7546_v45 = vand.u32 4294901760, %v6622_v36  ;;  %v7548_v50 = vld [vmem:[#allocation22_spill] sm:$0xff] }
 0x196   :  { %v7543_v35 = vand.u32 4294901760, %v7542_v32  ;;  %v7544_v14 = vld [vmem:[#allocation51_spill] sm:$0xff]  ;;  %v2827_v18 = vsub.f32 %v6611_v12, %v7545_v38  ;;  %v1764_v3 = vadd.f32 %v6419_v15, %v1709_v55  ;;  %v7547_v38 = vld [vmem:[#allocation13_spill] sm:$0xff]  ;;  %3009 = vmatmul.f32.gmra.mxu2 %v6514_v61  ;;  %v3303_v47 = vand.u32 4294901760, %v3302_v19  ;;  %v159_v19 = vld [vmem:[%s7066_s1 + $0x398] sm:$0xff] }
 0x197   :  { %3164 = vmatpush.msra.mxu1 %v7544_v14  ;;  %3217 = vmatpush.msra.mxu2 %v6535_v58  ;;  %v3308_v56 = vsub.f32 %v6622_v36, %v7546_v45  ;;  %v1947_v32 = vadd.f32 %v1946_v28, %v1894_v41  ;;  %v7549_v14 = vand.u32 4294901760, %v7548_v50  ;;  %v6708_v15 = vsub.f32 %v42_v0, %v6675_v37  ;;  %v7550_v45 = vld [vmem:[#allocation10_spill] sm:$0xff]  ;;  %v7552_v0 = vld [vmem:[#allocation20_spill] sm:$0xff]  ;;  %v7557_v53 = vld [vmem:[#allocation11_spill] sm:$0xff] }
 0x198   :  { %3099 = vmatpush.msra.mxu0 %v7543_v35  ;;  %3292 = vmatpush.msra.mxu3 %v3291_v52  ;;  %v1529_v35 = vadd.f32 %v7547_v38, %v1468_v25  ;;  %v2071_v55 = vpop.f32.mrf.mxu1  ;;  %v7551_v41 = vand.u32 4294901760, %v6640_v54  ;;  %v6716_v28 = vsub.f32 %v162_v10, %v6681_v57  ;;  %v7196_v52 = vand.u32 4294901760, %v6690_v20 }
 0x199   :  { %3166 = vmatpush.msra.mxu1 %v7550_v45  ;;  %3219 = vmatpush.msra.mxu2 %v6552_v33  ;;  %v1954_v38 = vpop.f32.mrf.mxu0  ;;  %v2072_v50 = vadd.f32 %v2071_v55, %v1947_v32  ;;  %v2828_v45 = vand.u32 4294901760, %v2827_v18  ;;  %v6724_v33 = vand.u32 4294901760, %v160_v5  ;;  %v7556_v36 = vand.u32 4294901760, %v6514_v61  ;;  %v158_v61 = vld [vmem:[%s7066_s1 + $0x390] sm:$0xff] }
 0x19a   :  { %3103 = vmatpush.msra.mxu0 %v7549_v14  ;;  %v3314_v25 = vsub.f32 %v6640_v54, %v7551_v41  ;;  %3298 = vmatpush.msra.mxu3 %v3297_v8  ;;  %v7553_v14 = vand.u32 4294901760, %v7552_v0  ;;  %v6727_v41 = vsub.f32 %v161_v34, %v6692_v40  ;;  %v2137_v10 = vpop.f32.mrf.mxu2  ;;  %v7555_v54 = vld [vmem:[#allocation12_spill] sm:$0xff]  ;;  %v1849_v8 = vadd.f32 %v6437_v1, %v1764_v3  ;;  %v7560_v1 = vld [vmem:[#allocation18_spill] sm:$0xff] }
 0x19b   :  { %v1423_v58 = vadd.f32 %v7555_v54, %v1342_v29  ;;  %3064 = vmatmul.f32.gmra.mxu3 %v7556_v36  ;;  %3168 = vmatpush.msra.mxu1 %v7557_v53  ;;  %v3309_v32 = vand.u32 4294901760, %v3308_v56  ;;  %v2138_v55 = vadd.f32 %v2137_v10, %v2072_v50  ;;  %v7558_v18 = vand.u32 4294901760, %v6673_v44  ;;  %v7559_v53 = vld [vmem:[#allocation14_spill] sm:$0xff]  ;;  %v7561_v29 = vld [vmem:[#allocation7_spill] sm:$0xff] }
 0x19c   :  { %3107 = vmatpush.msra.mxu0 %v7553_v14  ;;  %7554 = vst [vmem:[#allocation58_spill] sm:$0xff] %v6727_v41  ;;  %3221 = vmatpush.msra.mxu2 %v6584_v49  ;;  %v7199_v0 = vand.u32 4294901760, %v6708_v15  ;;  %v6739_v14 = vand.u32 4294901760, %v159_v19  ;;  %v1646_v36 = vadd.f32 %v7559_v53, %v1529_v35  ;;  %v7562_v3 = vand.u32 4294901760, %v7561_v29  ;;  %v2191_v50 = vpop.f32.mrf.mxu3  ;;  %v7563_v10 = vld [vmem:[#allocation23_spill] sm:$0xff]  ;;  %v157_v53 = vld [vmem:[%s7066_s1 + $0x388] sm:$0xff] }
 0x19d   :  { %3304 = vmatpush.msra.mxu3 %v3303_v47  ;;  %v3320_v34 = vsub.f32 %v6673_v44, %v7558_v18  ;;  %v1472_v54 = vadd.f32 %v7560_v1, %v1423_v58  ;;  %2942 = vmatmul.f32.gmra.mxu1 %v6474_v16  ;;  %v3315_v47 = vand.u32 4294901760, %v3314_v25  ;;  %v7198_v56 = vand.u32 4294901760, %v6716_v28 }
 0x19e   :  { %3111 = vmatpush.msra.mxu0 %v7562_v3  ;;  %3170 = vmatpush.msra.mxu1 %v7563_v10  ;;  %v3326_v18 = vsub.f32 %v6690_v20, %v7196_v52  ;;  %v7197_v35 = vand.u32 4294901760, %v6727_v41  ;;  %v6756_v58 = vsub.f32 %v160_v5, %v6724_v33  ;;  %v6761_v25 = vadd.f32 %v2191_v50, %v2138_v55  ;;  %v7565_v5 = vld [vmem:[#allocation16_spill] sm:$0xff]  ;;  %v7568_v52 = vld [vmem:[#allocation19_spill] sm:$0xff] }
 0x19f   :  { %2829 = vmatmul.f32.gmra.mxu0 %v2828_v45  ;;  %v1714_v1 = vadd.f32 %v6428_v30, %v1646_v36  ;;  %3223 = vmatpush.msra.mxu2 %v6601_v39  ;;  %v1898_v45 = vadd.f32 %v6468_v22, %v1849_v8  ;;  %v6766_v29 = vand.u32 4294901760, %v158_v61  ;;  %v7564_v3 = vand.u32 4294901760, %v6319_v27  ;;  %v156_v30 = vld [vmem:[%s7066_s1 + $0x380] sm:$0xff]  ;;  %v19_v22 = vld [vmem:[%s7065_s0 + $0x38] sm:$0xff] }
 0x1a0   :  { %3310 = vmatpush.msra.mxu3 %v3309_v32  ;;  %3172 = vmatpush.msra.mxu1 %v7565_v5  ;;  %v3321_v10 = vand.u32 4294901760, %v3320_v34  ;;  %v2835_v55 = vsub.f32 %v6708_v15, %v7199_v0  ;;  %v6775_v50 = vsub.f32 %v159_v19, %v6739_v14  ;;  %v3332_v8 = vsub.f32 %v6716_v28, %v7198_v56  ;;  %v7566_v34 = vld [vmem:[#allocation9_spill] sm:$0xff] }
 0x1a1   :  { %3115 = vmatpush.msra.mxu0 %v7564_v3  ;;  %3225 = vmatpush.msra.mxu2 %v6632_v26  ;;  %v1770_v27 = vadd.f32 %v6516_v7, %v1714_v1  ;;  %v6788_v32 = vand.u32 4294901760, %v157_v53  ;;  %v1955_v19 = vadd.f32 %v1954_v38, %v1898_v45  ;;  %v1537_v36 = vadd.f32 %v7566_v34, %v1472_v54  ;;  %v7569_v34 = vld [vmem:[#allocation38_spill] sm:$0xff]  ;;  %v7572_v7 = vld [vmem:[#allocation17_spill] sm:$0xff] }
 0x1a2   :  { %3316 = vmatpush.msra.mxu3 %v3315_v47  ;;  %v7567_v3 = vand.u32 4294901760, %v6337_v2  ;;  %3014 = vmatmul.f32.gmra.mxu2 %v6611_v12  ;;  %v3327_v5 = vand.u32 4294901760, %v3326_v18  ;;  %v3338_v47 = vsub.f32 %v6727_v41, %v7197_v35  ;;  %v2075_v1 = vpop.f32.mrf.mxu1  ;;  %v6801_v38 = vsub.f32 %v158_v61, %v6766_v29 }
 0x1a3   :  { %3174 = vmatpush.msra.mxu1 %v7568_v52  ;;  %3227 = vmatpush.msra.mxu2 %v6651_v62  ;;  %v6803_v54 = vand.u32 4294901760, %v156_v30  ;;  %v6805_v2 = vand.u32 4294901760, %v19_v22  ;;  %v1962_v45 = vpop.f32.mrf.mxu0  ;;  %v2076_v18 = vadd.f32 %v2075_v1, %v1955_v19  ;;  %v2836_v35 = vand.u32 4294901760, %v2835_v55  ;;  %v2142_v0 = vpop.f32.mrf.mxu2 }
 0x1a4   :  { %3119 = vmatpush.msra.mxu0 %v7567_v3  ;;  %3322 = vmatpush.msra.mxu3 %v3321_v10  ;;  %v7570_v3 = vand.u32 4294901760, %v7569_v34  ;;  %v3349_v56 = vand.u32 4294901760, %v6775_v50  ;;  %v7571_v52 = vand.u32 4294901760, %v6611_v12  ;;  %v1853_v61 = vadd.f32 %v6537_v4, %v1770_v27  ;;  %v7573_v10 = vld [vmem:[#allocation24_spill] sm:$0xff] }
 0x1a5   :  { %3176 = vmatpush.msra.mxu1 %v7572_v7  ;;  %v3333_v62 = vand.u32 4294901760, %v3332_v8  ;;  %v6815_v41 = vsub.f32 %v157_v53, %v6788_v32  ;;  %v2143_v19 = vadd.f32 %v2142_v0, %v2076_v18  ;;  %v1650_v1 = vadd.f32 %v7573_v10, %v1537_v36  ;;  %3229 = vmatpush.msra.mxu2 %v6681_v57 }
 0x1a6   :  { %3123 = vmatpush.msra.mxu0 %v7570_v3  ;;  %3070 = vmatmul.f32.gmra.mxu3 %v7571_v52  ;;  %v7574_v55 = vand.u32 4294901760, %v6756_v58  ;;  %v7575_v12 = vand.u32 4294901760, %v6387_v60  ;;  %v3339_v4 = vand.u32 4294901760, %v3338_v47  ;;  %v3355_v27 = vand.u32 4294901760, %v6801_v38  ;;  %v2197_v8 = vpop.f32.mrf.mxu3  ;;  %v7578_v47 = vld [vmem:[#allocation21_spill] sm:$0xff] }
 0x1a7   :  { %3328 = vmatpush.msra.mxu3 %v3327_v5  ;;  %2946 = vmatmul.f32.gmra.mxu1 %v6574_v23  ;;  %v6827_v53 = vsub.f32 %v19_v22, %v6805_v2  ;;  %v6830_v0 = vsub.f32 %v156_v30, %v6803_v54  ;;  %v1719_v36 = vadd.f32 %v6527_v59, %v1650_v1  ;;  %v7576_v5 = vld [vmem:[#allocation25_spill] sm:$0xff]  ;;  %v3361_v30 = vand.u32 4294901760, %v6815_v41  ;;  %v27_v59 = vld [vmem:[%s7065_s0 + $0x78] sm:$0xff]  ;;  %v7580_v1 = vld [vmem:[#allocation26_spill] sm:$0xff] }
 0x1a8   :  { %v3344_v34 = vsub.f32 %v6756_v58, %v7574_v55  ;;  %3127 = vmatpush.msra.mxu0 %v7575_v12  ;;  %3178 = vmatpush.msra.mxu1 %v7576_v5  ;;  %v3350_v60 = vsub.f32 %v6775_v50, %v3349_v56  ;;  %v6837_v7 = vadd.f32 %v2197_v8, %v2143_v19  ;;  %v6858_v10 = vand.u32 4294901760, %v27_v59 }
 0x1a9   :  { %2837 = vmatmul.f32.gmra.mxu0 %v2836_v35  ;;  %3231 = vmatpush.msra.mxu2 %v6692_v40  ;;  %v1902_v22 = vadd.f32 %v6566_v63, %v1853_v61  ;;  %v7577_v35 = vand.u32 4294901760, %v6412_v21  ;;  %v1776_v3 = vadd.f32 %v6613_v42, %v1719_v36  ;;  %v3356_v63 = vsub.f32 %v6801_v38, %v3355_v27  ;;  %v7583_v36 = vld [vmem:[#allocation5_spill] sm:$0xff] }
 0x1aa   :  { %3334 = vmatpush.msra.mxu3 %v3333_v62  ;;  %3180 = vmatpush.msra.mxu1 %v7578_v47  ;;  %v3345_v18 = vand.u32 4294901760, %v3344_v34  ;;  %v3244_v62 = vand.u32 4294901760, %v6827_v53  ;;  %v3367_v52 = vand.u32 4294901760, %v6830_v0  ;;  %v7579_v21 = vand.u32 4294901760, %v6435_v11 }
 0x1ab   :  { %3131 = vmatpush.msra.mxu0 %v7577_v35  ;;  %3233 = vmatpush.msra.mxu2 %v6724_v33  ;;  %v1963_v61 = vadd.f32 %v1962_v45, %v1902_v22  ;;  %v3351_v19 = vand.u32 4294901760, %v3350_v60  ;;  %v3362_v55 = vsub.f32 %v6815_v41, %v3361_v30  ;;  %v7581_v11 = vand.u32 4294901760, %v6454_v17 }
 0x1ac   :  { %3340 = vmatpush.msra.mxu3 %v3339_v4  ;;  %3019 = vmatmul.f32.gmra.mxu2 %v6708_v15  ;;  %v2079_v42 = vpop.f32.mrf.mxu1  ;;  %v1857_v45 = vadd.f32 %v6634_v13, %v1776_v3  ;;  %v7582_v8 = vand.u32 4294901760, %v6708_v15  ;;  %v3357_v5 = vand.u32 4294901760, %v3356_v63  ;;  %v3245_v60 = vsub.f32 %v6827_v53, %v3244_v62 }
 0x1ad   :  { %3135 = vmatpush.msra.mxu0 %v7579_v21  ;;  %3182 = vmatpush.msra.mxu1 %v7580_v1  ;;  %v1970_v34 = vpop.f32.mrf.mxu0  ;;  %v2080_v12 = vadd.f32 %v2079_v42, %v1963_v61  ;;  %v2147_v4 = vpop.f32.mrf.mxu2  ;;  %v3368_v22 = vsub.f32 %v6830_v0, %v3367_v52  ;;  %v6879_v17 = vsub.f32 %v27_v59, %v6858_v10  ;;  %v7584_v13 = vand.u32 4294901760, %v6485_v31  ;;  %v35_v31 = vld [vmem:[%s7065_s0 + $0xb8] sm:$0xff] }
 0x1ae   :  { %3235 = vmatpush.msra.mxu2 %v6739_v14  ;;  %3346 = vmatpush.msra.mxu3 %v3345_v18  ;;  %v3363_v15 = vand.u32 4294901760, %v3362_v55  ;;  %v1906_v3 = vadd.f32 %v6665_v48, %v1857_v45  ;;  %v3246_v59 = vand.u32 4294901760, %v3245_v60  ;;  %v6899_v48 = vand.u32 4294901760, %v35_v31  ;;  %v7592_v60 = vld [vmem:[#allocation34_spill] sm:$0xff] }
 0x1af   :  { %3139 = vmatpush.msra.mxu0 %v7581_v11  ;;  %3076 = vmatmul.f32.gmra.mxu3 %v7582_v8  ;;  %v2148_v35 = vadd.f32 %v2147_v4, %v2080_v12  ;;  %v3369_v63 = vand.u32 4294901760, %v3368_v22  ;;  %v3252_v61 = vand.u32 4294901760, %v6879_v17  ;;  %v7585_v1 = vand.u32 4294901760, %v6496_v24  ;;  %v7589_v4 = vld [vmem:[#allocation30_spill] sm:$0xff]  ;;  %v7590_v8 = vld [vmem:[#allocation41_spill] sm:$0xff]  ;;  %v43_v22 = vld [vmem:[%s7065_s0 + $0xf8] sm:$0xff] }
 0x1b0   :  { %3184 = vmatpush.msra.mxu1 %v7583_v36  ;;  %3237 = vmatpush.msra.mxu2 %v6766_v29  ;;  %v2203_v47 = vpop.f32.mrf.mxu3  ;;  %v7588_v45 = vand.u32 4294901760, %v6522_v46  ;;  %s3841_s0 = smov [#allocation2]  }
 0x1b1   :  { %3352 = vmatpush.msra.mxu3 %v3351_v19  ;;  %3143 = vmatpush.msra.mxu0 %v7584_v13  ;;  %v6886_v18 = vadd.f32 %v2203_v47, %v2148_v35  ;;  %v3253_v55 = vsub.f32 %v6879_v17, %v3252_v61  ;;  %v7593_v35 = vld [vmem:[#allocation39_spill] sm:$0xff]  ;;  %v7594_v13 = vand.u32 4294901760, %v7590_v8  ;;  %v7596_v47 = vld [vmem:[#allocation54_spill] sm:$0xff]  ;;  %s3781_s20 = sshll.u32 %s3841_s0, 4  ;;  %s3782_s20 = int_to_ptr.vmem [resolvable:$true] %s3781_s20 }
 0x1b2   :  { %2950 = vmatmul.f32.gmra.mxu1 %v6675_v37  ;;  %3145 = vmatmul.f32.vlgmr.msra.gmra.mxu0 %v7536_v51 }
 0x1b3   :  { %3186 = vmatpush.msra.mxu1 %v6379_v6  ;;  %3239 = vmatpush.msra.mxu2 %v6788_v32  ;;  %v1971_v6 = vadd.f32 %v1970_v34, %v1906_v3  ;;  %v6935_v3 = vand.u32 4294901760, %v43_v22 }
 0x1b4   :  { %3358 = vmatpush.msra.mxu3 %v3357_v5  ;;  %3390 = vmatpush.msrb.mxu0 %v6496_v24  ;;  %v6914_v24 = vsub.f32 %v35_v31, %v6899_v48 }
 0x1b5   :  { %3188 = vmatpush.msra.mxu1 %v6397_v9  ;;  %3241 = vmatpush.msra.mxu2 %v6803_v54  ;;  %v7586_v9 = vld [vmem:[#allocation32_spill] sm:$0xff] }
 0x1b6   :  { %3364 = vmatpush.msra.mxu3 %v3363_v15  ;;  %3393 = vmatpush.msrb.mxu0 %v6522_v46  ;;  %v2083_v21 = vpop.f32.mrf.mxu1  ;;  %v7591_v46 = vand.u32 4294901760, %v7586_v9  ;;  %v7595_v15 = vld [vmem:[#allocation40_spill] sm:$0xff] }
 0x1b7   :  { %3190 = vmatpush.msra.mxu1 %v6414_v43  ;;  %3247 = vmatmul.f32.vlgmr.msra.gmra.mxu2 %v3246_v59  ;;  %v2084_v19 = vadd.f32 %v2083_v21, %v1971_v6  ;;  %v2278_v42 = vpop.f32.mrf.mxu0  ;;  %v2152_v12 = vpop.f32.mrf.mxu2  ;;  %v7587_v43 = vld [vmem:[#allocation28_spill] sm:$0xff]  ;;  %v7598_v21 = vld [vmem:[#allocation29_spill] sm:$0xff] }
 0x1b8   :  { %3370 = vmatpush.msra.mxu3 %v3369_v63  ;;  %3517 = vmatpush.msrb.mxu2 %v7585_v1  ;;  %v2279_v34 = vadd.f32 %v2278_v42, %v6761_v25  ;;  %v3254_v25 = vand.u32 4294901760, %v3253_v55  ;;  %v7597_v63 = vand.u32 4294901760, %v7593_v35 }
 0x1b9   :  { %3396 = vmatpush.msrb.mxu0 %v7586_v9  ;;  %3192 = vmatpush.msra.mxu1 %v7587_v43  ;;  %v2153_v11 = vadd.f32 %v2152_v12, %v2084_v19  ;;  %v7599_v19 = vld [vmem:[#allocation42_spill] sm:$0xff]  ;;  %v7600_v12 = vand.u32 4294901760, %v7596_v47  ;;  %v6952_v43 = vsub.f32 %v43_v22, %v6935_v3 }
 0x1ba   :  { %3372 = vmatmul.f32.vlgmr.msra.gmra.mxu3 %v6805_v2  ;;  %3521 = vmatpush.msrb.mxu2 %v7588_v45  ;;  %v2209_v36 = vpop.f32.mrf.mxu3 }
 0x1bb   :  { %3596 = vmatpush.msrb.mxu3 %v7589_v4  ;;  %3399 = vmatpush.msrb.mxu0 %v7590_v8  ;;  %v6920_v5 = vadd.f32 %v2209_v36, %v2153_v11  ;;  %v3268_v8 = vand.u32 4294901760, %v6952_v43 }
 0x1bc   :  { %3194 = vmatmul.f32.vlgmr.msra.gmra.mxu1 %v7536_v51  ;;  %3149 = vmatmul.f32.gmra.mxu0 %v6474_v16  ;;  %v3260_v51 = vand.u32 4294901760, %v6914_v24 }
 0x1bd   :  { %3458 = vmatpush.msrb.mxu1 %v7589_v4  ;;  %3525 = vmatpush.msrb.mxu2 %v7591_v46  ;;  %v7602_v4 = vand.u32 4294901760, %v7599_v19 }
 0x1be   :  { %3598 = vmatpush.msrb.mxu3 %v7592_v60  ;;  %3402 = vmatpush.msrb.mxu0 %v7593_v35  ;;  %v3261_v42 = vsub.f32 %v6914_v24, %v3260_v51 }
 0x1bf   :  { %3460 = vmatpush.msrb.mxu1 %v7592_v60  ;;  %3529 = vmatpush.msrb.mxu2 %v7594_v13  ;;  %v7607_v13 = vld [vmem:[#allocation33_spill] sm:$0xff] }
 0x1c0   :  { %3600 = vmatpush.msrb.mxu3 %v7595_v15  ;;  %3405 = vmatpush.msrb.mxu0 %v7596_v47  ;;  %v2327_v59 = vpop.f32.mrf.mxu1  ;;  %v3262_v45 = vand.u32 4294901760, %v3261_v42 }
 0x1c1   :  { %3255 = vmatmul.f32.gmra.mxu2 %v3254_v25  ;;  %3462 = vmatpush.msrb.mxu1 %v7595_v15  ;;  %v2282_v31 = vpop.f32.mrf.mxu0  ;;  %v2328_v6 = vadd.f32 %v2327_v59, %v2279_v34  ;;  %v7601_v34 = vld [vmem:[#allocation36_spill] sm:$0xff]  ;;  %v7604_v25 = vand.u32 4294901760, %v6690_v20 }
 0x1c2   :  { %3533 = vmatpush.msrb.mxu2 %v7597_v63  ;;  %3602 = vmatpush.msrb.mxu3 %v7598_v21  ;;  %v2283_v1 = vadd.f32 %v2282_v31, %v6837_v7  ;;  %v2380_v9 = vpop.f32.mrf.mxu2 }
 0x1c3   :  { %3408 = vmatpush.msrb.mxu0 %v7599_v19  ;;  %3376 = vmatmul.f32.gmra.mxu3 %v6858_v10  ;;  %v2381_v55 = vadd.f32 %v2380_v9, %v2328_v6 }
 0x1c4   :  { %3464 = vmatpush.msrb.mxu1 %v7598_v21  ;;  %3537 = vmatpush.msrb.mxu2 %v7600_v12  ;;  %v2505_v11 = vpop.f32.mrf.mxu3 }
 0x1c5   :  { %3604 = vmatpush.msrb.mxu3 %v7601_v34  ;;  %3411 = vmatpush.msrb.mxu0 %v6673_v44  ;;  %v6956_v7 = vadd.f32 %v2505_v11, %v2381_v55 }
 0x1c6   :  { %3198 = vmatmul.f32.gmra.mxu1 %v6474_v16  ;;  %3153 = vmatmul.f32.gmra.mxu0 %v6574_v23  ;;  %v7603_v16 = vand.u32 4294901760, %v6673_v44  ;;  %v3269_v44 = vsub.f32 %v6952_v43, %v3268_v8 }
 0x1c7   :  { %3466 = vmatpush.msrb.mxu1 %v7601_v34  ;;  %3541 = vmatpush.msrb.mxu2 %v7602_v4 }
 0x1c8   :  { %3606 = vmatpush.msrb.mxu3 %v6584_v49  ;;  %3414 = vmatpush.msrb.mxu0 %v6690_v20  ;;  %v7606_v20 = vand.u32 4294901760, %v6716_v28 }
 0x1c9   :  { %3468 = vmatpush.msrb.mxu1 %v6584_v49  ;;  %3545 = vmatpush.msrb.mxu2 %v7603_v16  ;;  %v7605_v49 = vld [vmem:[#allocation58_spill] sm:$0xff] }
 0x1ca   :  { %3608 = vmatpush.msrb.mxu3 %v6601_v39  ;;  %3417 = vmatpush.msrb.mxu0 %v6716_v28  ;;  %v2331_v36 = vpop.f32.mrf.mxu1  ;;  %v7608_v59 = vand.u32 4294901760, %v7605_v49 }
 0x1cb   :  { %3263 = vmatmul.f32.gmra.mxu2 %v3262_v45  ;;  %3470 = vmatpush.msrb.mxu1 %v6601_v39  ;;  %v2286_v46 = vpop.f32.mrf.mxu0  ;;  %v2332_v60 = vadd.f32 %v2331_v36, %v2283_v1  ;;  %v2388_v22 = vpop.f32.mrf.mxu2 }
 0x1cc   :  { %3549 = vmatpush.msrb.mxu2 %v7604_v25  ;;  %3610 = vmatpush.msrb.mxu3 %v6632_v26  ;;  %v2287_v35 = vadd.f32 %v2286_v46, %v6886_v18  ;;  %v3270_v18 = vand.u32 4294901760, %v3269_v44 }
 0x1cd   :  { %3420 = vmatpush.msrb.mxu0 %v7605_v49  ;;  %3380 = vmatmul.f32.gmra.mxu3 %v6899_v48  ;;  %v2389_v39 = vadd.f32 %v2388_v22, %v2332_v60 }
 0x1ce   :  { %3472 = vmatpush.msrb.mxu1 %v6632_v26  ;;  %3553 = vmatpush.msrb.mxu2 %v7606_v20  ;;  %v2509_v15 = vpop.f32.mrf.mxu3  ;;  %v7609_v26 = vand.u32 4294901760, %v6756_v58 }
 0x1cf   :  { %3612 = vmatpush.msrb.mxu3 %v7607_v13  ;;  %3423 = vmatpush.msrb.mxu0 %v6756_v58  ;;  %v2510_v47 = vadd.f32 %v2509_v15, %v2389_v39 }
 0x1d0   :  { %3202 = vmatmul.f32.gmra.mxu1 %v6574_v23  ;;  %3157 = vmatmul.f32.gmra.mxu0 %v6675_v37 }
 0x1d1   :  { %3474 = vmatpush.msrb.mxu1 %v7607_v13  ;;  %3557 = vmatpush.msrb.mxu2 %v7608_v59 }
 0x1d2   :  { %3614 = vmatpush.msrb.mxu3 %v6681_v57  ;;  %3426 = vmatpush.msrb.mxu0 %v6775_v50 }
 0x1d3   :  { %3476 = vmatpush.msrb.mxu1 %v6681_v57  ;;  %3561 = vmatpush.msrb.mxu2 %v7609_v26 }
 0x1d4   :  { %3616 = vmatpush.msrb.mxu3 %v6692_v40  ;;  %3429 = vmatpush.msrb.mxu0 %v6801_v38  ;;  %v2335_v23 = vpop.f32.mrf.mxu1 }
 0x1d5   :  { %3271 = vmatmul.f32.gmra.mxu2 %v3270_v18  ;;  %3478 = vmatpush.msrb.mxu1 %v6692_v40  ;;  %v2290_v28 = vpop.f32.mrf.mxu0  ;;  %v2336_v63 = vadd.f32 %v2335_v23, %v2287_v35  ;;  %v2396_v31 = vpop.f32.mrf.mxu2 }
 0x1d6   :  { %3565 = vmatpush.msrb.mxu2 %v3349_v56  ;;  %3618 = vmatpush.msrb.mxu3 %v6724_v33  ;;  %v2291_v57 = vadd.f32 %v2290_v28, %v6920_v5 }
 0x1d7   :  { %3432 = vmatpush.msrb.mxu0 %v6815_v41  ;;  %3384 = vmatmul.f32.gmra.mxu3 %v6935_v3  ;;  %v2397_v58 = vadd.f32 %v2396_v31, %v2336_v63 }
 0x1d8   :  { %3480 = vmatpush.msrb.mxu1 %v6724_v33  ;;  %3569 = vmatpush.msrb.mxu2 %v3355_v27  ;;  %v2513_v40 = vpop.f32.mrf.mxu3 }
 0x1d9   :  { %3620 = vmatpush.msrb.mxu3 %v6739_v14  ;;  %3435 = vmatpush.msrb.mxu0 %v6830_v0  ;;  %v2514_v56 = vadd.f32 %v2513_v40, %v2397_v58 }
 0x1da   :  { %3206 = vmatmul.f32.gmra.mxu1 %v6675_v37  ;;  %3438 = vmatmul.f32.vlgmr.msrb.gmra.mxu0 %v6827_v53 }
 0x1db   :  { %3482 = vmatpush.msrb.mxu1 %v6739_v14  ;;  %3573 = vmatpush.msrb.mxu2 %v3361_v30 }
 0x1dc   :  { %3622 = vmatpush.msrb.mxu3 %v6766_v29 }
 0x1dd   :  { %3484 = vmatpush.msrb.mxu1 %v6766_v29  ;;  %3577 = vmatpush.msrb.mxu2 %v3367_v52 }
 0x1de   :  { %3624 = vmatpush.msrb.mxu3 %v6788_v32  ;;  %3579 = vmatmul.f32.vlgmr.msrb.gmra.mxu2 %v6805_v2  ;;  %v2339_v33 = vpop.f32.mrf.mxu1 }
 0x1df   :  { %3486 = vmatpush.msrb.mxu1 %v6788_v32  ;;  %v2340_v37 = vadd.f32 %v2339_v33, %v2291_v57  ;;  %v2571_v14 = vpop.f32.mrf.mxu0  ;;  %v2404_v41 = vpop.f32.mrf.mxu2 }
 0x1e0   :  { %3626 = vmatpush.msrb.mxu3 %v6803_v54  ;;  %v2572_v29 = vadd.f32 %v2571_v14, %v6956_v7 }
 0x1e1   :  { %3488 = vmatpush.msrb.mxu1 %v6803_v54  ;;  %3628 = vmatmul.f32.vlgmr.msrb.gmra.mxu3 %v6805_v2  ;;  %v2405_v50 = vadd.f32 %v2404_v41, %v2340_v37 }
 0x1e2   :  { %3492 = vmatmul.f32.vlgmr.msrb.gmra.mxu1 %v3244_v62  ;;  %3443 = vmatmul.f32.gmra.mxu0 %v6879_v17  ;;  %v2517_v32 = vpop.f32.mrf.mxu3 }
 0x1e3   :  { %v2518_v38 = vadd.f32 %v2517_v32, %v2405_v50 }
 0x1e6   :  { %3583 = vmatmul.f32.gmra.mxu2 %v6858_v10 }
 0x1e8   :  { %v2625_v27 = vpop.f32.mrf.mxu1 }
 0x1e9   :  { %3632 = vmatmul.f32.gmra.mxu3 %v6858_v10  ;;  %v2576_v54 = vpop.f32.mrf.mxu0  ;;  %v2626_v2 = vadd.f32 %v2625_v27, %v2572_v29 }
 0x1ea   :  { %3498 = vmatmul.f32.gmra.mxu1 %v3252_v61  ;;  %3448 = vmatmul.f32.gmra.mxu0 %v6914_v24  ;;  %v2577_v0 = vadd.f32 %v2576_v54, %v2510_v47  ;;  %v2712_v53 = vpop.f32.mrf.mxu2 }
 0x1eb   :  { %v2713_v30 = vadd.f32 %v2712_v53, %v2626_v2 }
 0x1ec   :  { %v2761_v62 = vpop.f32.mrf.mxu3 }
 0x1ed   :  { %v2762_v52 = vadd.f32 %v2761_v62, %v2713_v30 }
 0x1ee   :  { %3587 = vmatmul.f32.gmra.mxu2 %v6899_v48 }
 0x1f1   :  { %3636 = vmatmul.f32.gmra.mxu3 %v6899_v48 }
 0x1f2   :  { %3504 = vmatmul.f32.gmra.mxu1 %v3260_v51  ;;  %3453 = vmatmul.f32.gmra.mxu0 %v6952_v43  ;;  %v2631_v10 = vpop.f32.mrf.mxu1 }
 0x1f3   :  { %v2581_v17 = vpop.f32.mrf.mxu0  ;;  %v2632_v61 = vadd.f32 %v2631_v10, %v2577_v0  ;;  %v2716_v5 = vpop.f32.mrf.mxu2 }
 0x1f4   :  { %v2582_v6 = vadd.f32 %v2581_v17, %v2514_v56 }
 0x1f5   :  { %v2717_v21 = vadd.f32 %v2716_v5, %v2632_v61 }
 0x1f6   :  { %3591 = vmatmul.f32.gmra.mxu2 %v6935_v3  ;;  %v2765_v19 = vpop.f32.mrf.mxu3 }
 0x1f7   :  { %v2766_v42 = vadd.f32 %v2765_v19, %v2717_v21 }
 0x1f9   :  { %3640 = vmatmul.f32.gmra.mxu3 %v6935_v3 }
 0x1fa   :  { %3510 = vmatmul.f32.gmra.mxu1 %v3268_v8 }
 0x1fc   :  { %v2637_v48 = vpop.f32.mrf.mxu1 }
 0x1fd   :  { %v2586_v24 = vpop.f32.mrf.mxu0  ;;  %v2638_v51 = vadd.f32 %v2637_v48, %v2582_v6  ;;  %v2720_v1 = vpop.f32.mrf.mxu2 }
 0x1fe   :  { %v2587_v9 = vadd.f32 %v2586_v24, %v2518_v38 }
 0x1ff   :  { %v2721_v55 = vadd.f32 %v2720_v1, %v2638_v51 }
 0x200   :  { %v2769_v12 = vpop.f32.mrf.mxu3 }
 0x201   :  { %v2770_v34 = vadd.f32 %v2769_v12, %v2721_v55 }
 0x206   :  { %v2643_v11 = vpop.f32.mrf.mxu1 }
 0x207   :  { %v2644_v7 = vadd.f32 %v2643_v11, %v2587_v9  ;;  %v2814_v45 = vpop.f32.mrf.mxu0  ;;  %v2724_v4 = vpop.f32.mrf.mxu2 }
 0x208   :  { %v2815_v40 = vadd.f32 %v2814_v45, %v2762_v52 }
 0x209   :  { %v2725_v16 = vadd.f32 %v2724_v4, %v2644_v7 }
 0x20a   :  { %v2773_v36 = vpop.f32.mrf.mxu3 }
 0x20b   :  { %v2774_v25 = vadd.f32 %v2773_v36, %v2725_v16 }
 0x210   :  { %v2939_v46 = vpop.f32.mrf.mxu1  ;;  %v2822_v3 = vpop.f32.mrf.mxu0 }
 0x211   :  { %v3005_v60 = vpop.f32.mrf.mxu2  ;;  %v2940_v33 = vadd.f32 %v2939_v46, %v2815_v40  ;;  %v2823_v41 = vadd.f32 %v2822_v3, %v2766_v42 }
 0x213   :  { %v3006_v37 = vadd.f32 %v3005_v60, %v2940_v33 }
 0x214   :  { %v3059_v43 = vpop.f32.mrf.mxu3 }
 0x215   :  { %v3060_v32 = vadd.f32 %v3059_v43, %v3006_v37 }
 0x219   :  { %v3010_v49 = vpop.f32.mrf.mxu2 }
 0x21a   :  { %v2943_v8 = vpop.f32.mrf.mxu1 }
 0x21b   :  { %v2944_v38 = vadd.f32 %v2943_v8, %v2823_v41 }
 0x21c   :  { %v2830_v22 = vpop.f32.mrf.mxu0 }
 0x21d   :  { %v3011_v2 = vadd.f32 %v3010_v49, %v2944_v38  ;;  %v2831_v53 = vadd.f32 %v2830_v22, %v2770_v34 }
 0x21e   :  { %v3065_v44 = vpop.f32.mrf.mxu3 }
 0x21f   :  { %v3066_v62 = vadd.f32 %v3065_v44, %v3011_v2 }
 0x224   :  { %v2947_v35 = vpop.f32.mrf.mxu1 }
 0x225   :  { %v3015_v20 = vpop.f32.mrf.mxu2  ;;  %v2948_v10 = vadd.f32 %v2947_v35, %v2831_v53 }
 0x226   :  { %v2838_v39 = vpop.f32.mrf.mxu0 }
 0x227   :  { %v3016_v21 = vadd.f32 %v3015_v20, %v2948_v10  ;;  %v2839_v48 = vadd.f32 %v2838_v39, %v2774_v25 }
 0x229   :  { %v3071_v13 = vpop.f32.mrf.mxu3 }
 0x22a   :  { %v3072_v1 = vadd.f32 %v3071_v13, %v3016_v21 }
 0x22f   :  { %v2951_v15 = vpop.f32.mrf.mxu1  ;;  %v3146_v47 = vpop.f32.mrf.mxu0 }
 0x230   :  { %v3020_v18 = vpop.f32.mrf.mxu2  ;;  %v3147_v54 = vadd.f32 %v3146_v47, %v3060_v32  ;;  %v2952_v9 = vadd.f32 %v2951_v15, %v2839_v48 }
 0x232   :  { %v3077_v59 = vpop.f32.mrf.mxu3  ;;  %v3021_v4 = vadd.f32 %v3020_v18, %v2952_v9 }
 0x234   :  { %v3078_v8 = vadd.f32 %v3077_v59, %v3021_v4 }
 0x239   :  { %v3195_v26 = vpop.f32.mrf.mxu1  ;;  %v3150_v23 = vpop.f32.mrf.mxu0 }
 0x23a   :  { %v3248_v28 = vpop.f32.mrf.mxu2  ;;  %v3196_v0 = vadd.f32 %v3195_v26, %v3147_v54  ;;  %v3151_v5 = vadd.f32 %v3150_v23, %v3066_v62 }
 0x23c   :  { %v3249_v17 = vadd.f32 %v3248_v28, %v3196_v0 }
 0x23d   :  { %v3373_v63 = vpop.f32.mrf.mxu3 }
 0x23e   :  { %v3374_v19 = vadd.f32 %v3373_v63, %v3249_v17 }
 0x243   :  { %v3199_v31 = vpop.f32.mrf.mxu1  ;;  %v3154_v57 = vpop.f32.mrf.mxu0 }
 0x244   :  { %v3256_v58 = vpop.f32.mrf.mxu2  ;;  %v3200_v42 = vadd.f32 %v3199_v31, %v3151_v5  ;;  %v3155_v34 = vadd.f32 %v3154_v57, %v3072_v1 }
 0x246   :  { %v3377_v56 = vpop.f32.mrf.mxu3  ;;  %v3257_v55 = vadd.f32 %v3256_v58, %v3200_v42 }
 0x248   :  { %v3378_v16 = vadd.f32 %v3377_v56, %v3257_v55 }
 0x24d   :  { %v3203_v14 = vpop.f32.mrf.mxu1  ;;  %v3158_v29 = vpop.f32.mrf.mxu0 }
 0x24e   :  { %v3264_v50 = vpop.f32.mrf.mxu2  ;;  %v3204_v36 = vadd.f32 %v3203_v14, %v3155_v34  ;;  %v3159_v44 = vadd.f32 %v3158_v29, %v3078_v8 }
 0x250   :  { %v3381_v27 = vpop.f32.mrf.mxu3  ;;  %v3265_v25 = vadd.f32 %v3264_v50, %v3204_v36 }
 0x252   :  { %v3382_v20 = vadd.f32 %v3381_v27, %v3265_v25 }
 0x257   :  { %v3207_v30 = vpop.f32.mrf.mxu1  ;;  %v3439_v61 = vpop.f32.mrf.mxu0 }
 0x258   :  { %v3272_v52 = vpop.f32.mrf.mxu2  ;;  %v3440_v24 = vadd.f32 %v3439_v61, %v3374_v19  ;;  %v3208_v13 = vadd.f32 %v3207_v30, %v3159_v44 }
 0x25a   :  { %v3385_v6 = vpop.f32.mrf.mxu3  ;;  %v3273_v23 = vadd.f32 %v3272_v52, %v3208_v13 }
 0x25c   :  { %v3386_v58 = vadd.f32 %v3385_v6, %v3273_v23 }
 0x25f   :  { %v3493_v51 = vpop.f32.mrf.mxu1  ;;  %v3444_v12 = vpop.f32.mrf.mxu0 }
 0x260   :  { %v3494_v11 = vadd.f32 %v3493_v51, %v3440_v24  ;;  %v3445_v60 = vadd.f32 %v3444_v12, %v3378_v16 }
 0x261   :  { %v3580_v7 = vpop.f32.mrf.mxu2 }
 0x262   :  { %v3581_v45 = vadd.f32 %v3580_v7, %v3494_v11 }
 0x264   :  { %v3629_v46 = vpop.f32.mrf.mxu3 }
 0x265   :  { %v3630_v3 = vadd.f32 %v3629_v46, %v3581_v45 }
 0x267   :  { %3644 = vxpose.xlu0.b32.start [1/4] (short) (narrow) %v3630_v3, 32  ;;  %v3499_v43 = vpop.f32.mrf.mxu1  ;;  %v3449_v49 = vpop.f32.mrf.mxu0 }
 0x268   :  { %v3500_v22 = vadd.f32 %v3499_v43, %v3445_v60  ;;  %v3450_v26 = vadd.f32 %v3449_v49, %v3382_v20 }
 0x269   :  { %v3584_v35 = vpop.f32.mrf.mxu2 }
 0x26a   :  { %v3585_v39 = vadd.f32 %v3584_v35, %v3500_v22 }
 0x26c   :  { %v3633_v15 = vpop.f32.mrf.mxu3 }
 0x26d   :  { %v3634_v47 = vadd.f32 %v3633_v15, %v3585_v39 }
 0x26f   :  { %3645 = vxpose.xlu0.b32.cont [2/4] (short) (narrow) %v3634_v47, 32  ;;  %v3505_v18 = vpop.f32.mrf.mxu1  ;;  %v3454_v31 = vpop.f32.mrf.mxu0 }
 0x270   :  { %v3506_v28 = vadd.f32 %v3505_v18, %v3450_v26  ;;  %v3455_v56 = vadd.f32 %v3454_v31, %v3386_v58 }
 0x271   :  { %v3588_v63 = vpop.f32.mrf.mxu2 }
 0x272   :  { %v3589_v57 = vadd.f32 %v3588_v63, %v3506_v28 }
 0x274   :  { %v3637_v59 = vpop.f32.mrf.mxu3 }
 0x275   :  { %v3638_v40 = vadd.f32 %v3637_v59, %v3589_v57 }
 0x277   :  { %3646 = vxpose.xlu0.b32.cont [3/4] (short) (narrow) %v3638_v40, 32  ;;  %v3511_v33 = vpop.f32.mrf.mxu1 }
 0x278   :  { %v3512_v37 = vadd.f32 %v3511_v33, %v3455_v56 }
 0x279   :  { %v3592_v14 = vpop.f32.mrf.mxu2 }
 0x27a   :  { %v3593_v41 = vadd.f32 %v3592_v14, %v3512_v37 }
 0x27c   :  { %v3641_v29 = vpop.f32.mrf.mxu3 }
 0x27d   :  { %v3642_v50 = vadd.f32 %v3641_v29, %v3593_v41 }
 0x27f   :  { %3647 = vxpose.xlu0.b32.end [4/4] (short) (narrow) %v3642_v50, 32 }
 0x30b   :  { %v3660_v32 = vpop.trf.xlu0 }
 0x30c   :  { %v3677_v38 = vsel %vm3676_vm0, %v3660_v32, -inf }
 0x30d   :  { %3678 = vmax.xlane.f32.xlu1 %v3677_v38 }
 0x313   :  { %v3661_v27 = vpop.trf.xlu0 }
 0x314   :  { %v3680_v54 = vsel %vm3676_vm0, %v3661_v27, -inf }
 0x315   :  { %3681 = vmax.xlane.f32.xlu1 %v3680_v54 }
 0x31b   :  { %v3662_v2 = vpop.trf.xlu0 }
 0x31c   :  { %v3683_v0 = vsel %vm3676_vm0, %v3662_v2, -inf }
 0x31d   :  { %3684 = vmax.xlane.f32.xlu2 %v3683_v0 }
 0x323   :  { %v3663_v53 = vpop.trf.xlu0 }
 0x324   :  { %v3686_v30 = vsel %vm3676_vm0, %v3663_v53, -inf }
 0x325   :  { %3687 = vmax.xlane.f32.xlu2 %v3686_v30 }
 0x380   :  { %v3679_v62 = vpop.xlane.xlu1 %3678 }
 0x381   :  { %v3689_v10 = vsub.f32 %v3660_v32, %v3679_v62 }
 0x383   :  { %v3693_v17 = vmul.f32 1.442695, %v3689_v10 }
 0x385   :  { %3799 = vpow2.f32 %v3693_v17 }
 0x388   :  { %v3682_v61 = vpop.xlane.xlu1 %3681 }
 0x389   :  { %v3690_v52 = vsub.f32 %v3661_v27, %v3682_v61 }
 0x38b   :  { %v3800_v5 = vpop.eup %3799  ;;  %v3695_v6 = vmul.f32 1.442695, %v3690_v52 }
 0x38c   :  { %v3701_v21 = vsel %vm3676_vm0, %v3800_v5, 0.0 }
 0x38d   :  { %3801 = vpow2.f32 %v3695_v6  ;;  %3702 = vadd.xlane.f32.xlu1 %v3701_v21 }
 0x390   :  { %v3685_v19 = vpop.xlane.xlu2 %3684 }
 0x391   :  { %v3691_v42 = vsub.f32 %v3662_v2, %v3685_v19 }
 0x393   :  { %v3802_v48 = vpop.eup %3801  ;;  %v3697_v24 = vmul.f32 1.442695, %v3691_v42 }
 0x394   :  { %v3704_v51 = vsel %vm3676_vm0, %v3802_v48, 0.0 }
 0x395   :  { %3803 = vpow2.f32 %v3697_v24  ;;  %3705 = vadd.xlane.f32.xlu2 %v3704_v51 }
 0x398   :  { %v3688_v1 = vpop.xlane.xlu2 %3687 }
 0x399   :  { %v3692_v9 = vsub.f32 %v3663_v53, %v3688_v1 }
 0x39b   :  { %v7048_v55 = vpop.eup %3803  ;;  %v3699_v12 = vmul.f32 1.442695, %v3692_v9 }
 0x39c   :  { %v3707_v11 = vsel %vm3676_vm0, %v7048_v55, 0.0 }
 0x39d   :  { %3805 = vpow2.f32 %v3699_v12  ;;  %3708 = vadd.xlane.f32.xlu1 %v3707_v11 }
 0x3a3   :  { %v7052_v34 = vpop.eup %3805 }
 0x3a4   :  { %v3710_v7 = vsel %vm3676_vm0, %v7052_v34, 0.0 }
 0x3a5   :  { %3711 = vadd.xlane.f32.xlu2 %v3710_v7 }
 0x400   :  { %v3703_v45 = vpop.xlane.xlu1 %3702 }
 0x401   :  { %3807 = vrcp.f32 %v3703_v45  ;;  %v3724_v3 = vand.u32 2147483648, %v3703_v45  ;;  %v3722_v43 = vand.u32 2147483647, %v3703_v45  ;;  %vm3718_vm2 = vweird.f32 %v3703_v45 }
 0x403   :  { %v3725_v22 = vor.u32 1.1754944e-38, %v3724_v3  ;;  %vm3723_vm4 = vcmp.eq.f32.partialorder %v3722_v43, 8.507059e+37 }
 0x407   :  { %v3808_v4 = vpop.eup %3807 }
 0x408   :  { %v3714_v16 = vmul.f32 %v3808_v4, %v3703_v45  ;;  %v3706_v36 = vpop.xlane.xlu2 %3705  ;;  %vm3719_vm1 = vweird.f32 %v3808_v4 }
 0x409   :  { %3809 = vrcp.f32 %v3706_v36  ;;  %vm3720_vm3 = vmor %vm3718_vm2, %vm3719_vm1  ;;  %v3739_v15 = vand.u32 2147483648, %v3706_v36  ;;  %v3737_v26 = vand.u32 2147483647, %v3706_v36  ;;  %vm3733_vm6 = vweird.f32 %v3706_v36 }
 0x40a   :  { %v3715_v46 = vsub.f32 1.0, %v3714_v16 }
 0x40b   :  { %v3740_v28 = vor.u32 1.1754944e-38, %v3739_v15  ;;  %vm3738_vm8 = vcmp.eq.f32.partialorder %v3737_v26, 8.507059e+37 }
 0x40c   :  { %v3716_v60 = vmul.f32 %v3808_v4, %v3715_v46 }
 0x40e   :  { %v3717_v8 = vadd.f32 %v3808_v4, %v3716_v60 }
 0x40f   :  { %v3810_v25 = vpop.eup %3809 }
 0x410   :  { %v3721_v49 = vsel %vm3720_vm3, %v3808_v4, %v3717_v8  ;;  %v3729_v44 = vmul.f32 %v3810_v25, %v3706_v36  ;;  %v3709_v35 = vpop.xlane.xlu1 %3708  ;;  %vm3734_vm5 = vweird.f32 %v3810_v25 }
 0x411   :  { %v3726_v39 = vsel %vm3723_vm4, %v3725_v22, %v3721_v49  ;;  %3811 = vrcp.f32 %v3709_v35  ;;  %vm3735_vm7 = vmor %vm3733_vm6, %vm3734_vm5  ;;  %v3754_v56 = vand.u32 2147483648, %v3709_v35  ;;  %v3752_v37 = vand.u32 2147483647, %v3709_v35 }
 0x412   :  { %v3727_v20 = vmul.f32 %v3800_v5, %v3726_v39  ;;  %v3730_v13 = vsub.f32 1.0, %v3729_v44  ;;  %vm3748_vm10 = vweird.f32 %v3709_v35 }
 0x413   :  { %v3755_v29 = vor.u32 1.1754944e-38, %v3754_v56  ;;  %vm3753_vm12 = vcmp.eq.f32.partialorder %v3752_v37, 8.507059e+37 }
 0x414   :  { %3773 = vst.msk [vmem:[#allocation2] sm:$0xff] %vm3676_vm0, %v3727_v20  ;;  %v3731_v47 = vmul.f32 %v3810_v25, %v3730_v13 }
 0x416   :  { %v3732_v18 = vadd.f32 %v3810_v25, %v3731_v47 }
 0x417   :  { %v3812_v23 = vpop.eup %3811 }
 0x418   :  { %v3736_v63 = vsel %vm3735_vm7, %v3810_v25, %v3732_v18  ;;  %v3744_v31 = vmul.f32 %v3812_v23, %v3709_v35  ;;  %v3712_v57 = vpop.xlane.xlu2 %3711  ;;  %vm3749_vm9 = vweird.f32 %v3812_v23 }
 0x419   :  { %v3741_v58 = vsel %vm3738_vm8, %v3740_v28, %v3736_v63  ;;  %3813 = vrcp.f32 %v3712_v57  ;;  %vm3750_vm11 = vmor %vm3748_vm10, %vm3749_vm9  ;;  %v3769_v2 = vand.u32 2147483648, %v3712_v57  ;;  %v3767_v53 = vand.u32 2147483647, %v3712_v57 }
 0x41a   :  { %v3742_v59 = vmul.f32 %v3802_v48, %v3741_v58  ;;  %v3745_v40 = vsub.f32 1.0, %v3744_v31  ;;  %vm3763_vm14 = vweird.f32 %v3712_v57 }
 0x41b   :  { %v3770_v62 = vor.u32 1.1754944e-38, %v3769_v2  ;;  %vm3768_vm1 = vcmp.eq.f32.partialorder %v3767_v53, 8.507059e+37 }
 0x41c   :  { %3774 = vst.msk [vmem:[#allocation2 + $0x8] sm:$0xff] %vm3676_vm0, %v3742_v59  ;;  %v3746_v33 = vmul.f32 %v3812_v23, %v3745_v40 }
 0x41e   :  { %v3747_v14 = vadd.f32 %v3812_v23, %v3746_v33 }
 0x41f   :  { %v3814_v41 = vpop.eup %3813 }
 0x420   :  { %v3751_v50 = vsel %vm3750_vm11, %v3812_v23, %v3747_v14  ;;  %v3759_v32 = vmul.f32 %v3814_v41, %v3712_v57  ;;  %vm3764_vm13 = vweird.f32 %v3814_v41 }
 0x421   :  { %v3756_v38 = vsel %vm3753_vm12, %v3755_v29, %v3751_v50  ;;  %vm3765_vm15 = vmor %vm3763_vm14, %vm3764_vm13 }
 0x422   :  { %v3757_v27 = vmul.f32 %v7048_v55, %v3756_v38  ;;  %v3760_v54 = vsub.f32 1.0, %v3759_v32 }
 0x424   :  { %3775 = vst.msk [vmem:[#allocation2 + $0x10] sm:$0xff] %vm3676_vm0, %v3757_v27  ;;  %v3761_v0 = vmul.f32 %v3814_v41, %v3760_v54 }
 0x426   :  { %v3762_v30 = vadd.f32 %v3814_v41, %v3761_v0 }
 0x428   :  { %v3766_v10 = vsel %vm3765_vm15, %v3814_v41, %v3762_v30 }
 0x429   :  { %v3771_v17 = vsel %vm3768_vm1, %v3770_v62, %v3766_v10 }
 0x42a   :  { %v3772_v61 = vmul.f32 %v7052_v34, %v3771_v17 }
 0x42c   :  { %3776 = vst.msk [vmem:[#allocation2 + $0x18] sm:$0xff] %vm3676_vm0, %v3772_v61 }
 0x42d   :  { %3789 = dma.vmem_to_hbm [thread:$0]  %s3782_s20, 512, %s3784_s23, [#allocation3], %s3842_s24, %s3842_s24, %s3843_s25  }
 0x42e   :  { %3839 = dma.done.wait [#allocation3], 512  }
 0x42f   :  { %3840 = vsyncadd [#allocation3], 4294966784 }
 0x430   :  { %3794 = vsyncpa [#allocation3], 1 }

</bundles_post_ra>
